<compile_context>
chip_gen: v5e
topology: v5e:2x2
jax: 0.10.0
libtpu: 0.0.40
codegen_flags: <defaults>
</compile_context>

<pallas_src>
import jax
import jax.numpy as jnp
from jax.experimental import pallas as pl
from jax.experimental.pallas import tpu as pltpu

# ---- model dims (small, consistent with the module) ----
B, S, D = 2, 16, 32          # batch, sequence, model dim (channels)
HEADS = 4
DIM_HEAD = D // HEADS
DEPTH = 2
FF_INNER = 4 * D
QKV_COLS = 128               # [Wq | Wk | Wv | 0-pad] -> full 128-lane output tile
EPS = 1e-5


# ---------------- in-kernel helpers ----------------
def _layernorm(h, gamma, beta):
    mu = jnp.mean(h, axis=-1, keepdims=True)
    var = jnp.mean((h - mu) ** 2, axis=-1, keepdims=True)
    return (h - mu) * jax.lax.rsqrt(var + EPS) * gamma + beta


# ---------------- fused encoder kernel ----------------
def encoder_kernel(x_ref,
                   attn_g_ref, attn_b_ref, wqkv_ref, wo_ref, bo_ref,
                   ff_g_ref, ff_b_ref, w1_ref, b1_ref, w2_ref, b2_ref,
                   fin_g_ref, fin_b_ref,
                   o_ref):
    scale = 1.0 / (DIM_HEAD ** 0.5)

    # kernel consumes channels-last (B, S, D); flatten rows once (leading-dim merge, no relayout)
    h = x_ref[...].astype(jnp.float32).reshape(B * S, D)             # (B*S, D)

    for lyr in range(DEPTH):                                         # static unroll, DEPTH=2
        # ---------- pre-LN multi-head self-attention + residual ----------
        ln = _layernorm(h, attn_g_ref[lyr], attn_b_ref[lyr])         # (B*S, D)
        # fused QKV projection, N = 128 (zero-padded) -> unmasked, lane-dense MXU output
        qkv = jnp.dot(ln, wqkv_ref[lyr],
                      preferred_element_type=jnp.float32)            # (B*S, 128)

        # ONE relayout for the whole qkv tensor, then tile-aligned head split
        qkv_t = jnp.transpose(qkv.reshape(B, S, QKV_COLS), (0, 2, 1))      # (B, 128, S)
        qT = qkv_t[:, 0 * D:1 * D].reshape(B * HEADS, DIM_HEAD, S)         # (BH, dh, S)
        kT = qkv_t[:, 1 * D:2 * D].reshape(B * HEADS, DIM_HEAD, S)         # (BH, dh, S)
        vT = qkv_t[:, 2 * D:3 * D].reshape(B * HEADS, DIM_HEAD, S)         # (BH, dh, S)
        q = jnp.swapaxes(qT, 1, 2) * scale                                 # (BH, S, dh)

        # single (B*H)-batched MXU dot for the scores of all batches/heads
        sc = jax.lax.dot_general(q, kT, (((2,), (1,)), ((0,), (0,))),
                                 preferred_element_type=jnp.float32)       # (BH, S, S)
        sc = sc - jnp.max(sc, axis=-1, keepdims=True)
        p = jnp.exp(sc)
        p = p / jnp.sum(p, axis=-1, keepdims=True)       # exact softmax (matches torch f32)

        # single (B*H)-batched dot for p @ v, contracting the key axis of both operands:
        # (BH, dh, S_k) x (BH, S_q, S_k) -> (BH, dh, S_q)
        oT = jax.lax.dot_general(vT, p, (((2,), (2,)), ((0,), (0,))),
                                 preferred_element_type=jnp.float32)
        # merge heads back into features, back to (B*S, D) rows (one transpose, no concat)
        av = jnp.transpose(oT.reshape(B, D, S), (0, 2, 1)).reshape(B * S, D)

        h = h + jnp.dot(av, wo_ref[lyr],
                        preferred_element_type=jnp.float32) + bo_ref[lyr]

        # ---------- pre-LN feed-forward (GELU) + residual ----------
        ln2 = _layernorm(h, ff_g_ref[lyr], ff_b_ref[lyr])
        u = jnp.dot(ln2, w1_ref[lyr],
                    preferred_element_type=jnp.float32) + b1_ref[lyr]
        # TODO(synk): PyTorch nn.GELU default is exact erf; tanh approximation used here.
        u = jax.nn.gelu(u, approximate=True)
        h = h + jnp.dot(u, w2_ref[lyr],
                        preferred_element_type=jnp.float32) + b2_ref[lyr]

    # ---------- final LayerNorm ----------
    h = _layernorm(h, fin_g_ref[...], fin_b_ref[...])                # (B*S, D)
    o_ref[...] = h.reshape(B, S, D).astype(o_ref.dtype)              # channels-last out


# ---------------- pallas_call wrapper ----------------
def _encoder_call(x_cl, weights):
    # Grid-less single invocation: the whole working set fits VMEM on v5e/v6e/v7x.
    # TODO(synk): when many conditioning sequences are processed, batch them into one call and
    # add a token-tile grid with dimension_semantics=("parallel",...) so v7x's second TensorCore
    # and the 256-wide MXU on v6e/v7x are used; at B=2, S=16 this would only add overhead.
    vmem = pl.BlockSpec(memory_space=pltpu.MemorySpace.VMEM)
    return pl.pallas_call(
        encoder_kernel,
        out_shape=jax.ShapeDtypeStruct((B, S, D), x_cl.dtype),
        in_specs=[vmem] * (1 + len(weights)),
        out_specs=vmem,
    )(x_cl, *weights)


# ---------------- parameter construction (deterministic) ----------------
def init_params(key):
    def dense(k, shape, scale=0.02):
        return scale * jax.random.normal(k, shape, jnp.float32)

    attn_g, attn_b, wqkv, wo, bo = [], [], [], [], []
    ff_g, ff_b, w1, b1, w2, b2 = [], [], [], [], [], []
    for _ in range(DEPTH):
        key, *ks = jax.random.split(key, 7)
        attn_g.append(jnp.ones((1, D), jnp.float32))
        attn_b.append(jnp.zeros((1, D), jnp.float32))
        # fused [Wq | Wk | Wv | zero-pad] -> 128 columns (lane-dense QKV matmul output)
        wqkv.append(jnp.concatenate(
            [dense(ks[0], (D, D)), dense(ks[1], (D, D)), dense(ks[2], (D, D)),
             jnp.zeros((D, QKV_COLS - 3 * D), jnp.float32)], axis=1))
        wo.append(dense(ks[3], (D, D)))
        bo.append(jnp.zeros((1, D), jnp.float32))
        ff_g.append(jnp.ones((1, D), jnp.float32))
        ff_b.append(jnp.zeros((1, D), jnp.float32))
        w1.append(dense(ks[4], (D, FF_INNER)))
        b1.append(jnp.zeros((1, FF_INNER), jnp.float32))
        w2.append(dense(ks[5], (FF_INNER, D)))
        b2.append(jnp.zeros((1, D), jnp.float32))

    stack = lambda xs: jnp.stack(xs, axis=0)
    return dict(
        attn_g=stack(attn_g), attn_b=stack(attn_b),
        wqkv=stack(wqkv), wo=stack(wo), bo=stack(bo),
        ff_g=stack(ff_g), ff_b=stack(ff_b),
        w1=stack(w1), b1=stack(b1), w2=stack(w2), b2=stack(b2),
        final_g=jnp.ones((1, D), jnp.float32),
        final_b=jnp.zeros((1, D), jnp.float32),
    )


# ---------------- module forward ----------------
def checkpointed_xtransformer_encoder(x, params, needs_permute=True, exit_permute=True):
    # The module's permutes are done at the XLA level (negligible on an 8 KB tensor), so the
    # kernel consumes/produces channels-last and contains no entry/exit relayouts.
    if needs_permute:
        x = jnp.transpose(x, (0, 2, 1))          # channels-mid (B,C,S) -> channels-last (B,S,C)
    weights = (params["attn_g"], params["attn_b"], params["wqkv"], params["wo"], params["bo"],
               params["ff_g"], params["ff_b"], params["w1"], params["b1"], params["w2"],
               params["b2"], params["final_g"], params["final_b"])
    out = _encoder_call(x, weights)              # (B, S, C) channels-last
    if exit_permute:
        out = jnp.transpose(out, (0, 2, 1))      # back to channels-mid (B, C, S)
    return out


if __name__ == "__main__":
    key = jax.random.PRNGKey(0)
    kx, kp = jax.random.split(key)
    x = jax.random.normal(kx, (B, D, S), jnp.float32)    # (B, C, S) channels-mid input
    params = init_params(kp)

    out = checkpointed_xtransformer_encoder(x, params)
    out = jax.block_until_ready(out)
    assert out.shape == (B, D, S), out.shape
    assert bool(jnp.all(jnp.isfinite(out)))
    print("KERNEL_OK")
</pallas_src>

<mosaic_0001>
module attributes {stable_mosaic.version = 11 : i64} {
  func.func @encoder_kernel(%arg0: memref<2x16x32xf32, #tpu.memory_space<vmem>>, %arg1: memref<2x1x32xf32, #tpu.memory_space<vmem>>, %arg2: memref<2x1x32xf32, #tpu.memory_space<vmem>>, %arg3: memref<2x32x128xf32, #tpu.memory_space<vmem>>, %arg4: memref<2x32x32xf32, #tpu.memory_space<vmem>>, %arg5: memref<2x1x32xf32, #tpu.memory_space<vmem>>, %arg6: memref<2x1x32xf32, #tpu.memory_space<vmem>>, %arg7: memref<2x1x32xf32, #tpu.memory_space<vmem>>, %arg8: memref<2x32x128xf32, #tpu.memory_space<vmem>>, %arg9: memref<2x1x128xf32, #tpu.memory_space<vmem>>, %arg10: memref<2x128x32xf32, #tpu.memory_space<vmem>>, %arg11: memref<2x1x32xf32, #tpu.memory_space<vmem>>, %arg12: memref<1x32xf32, #tpu.memory_space<vmem>>, %arg13: memref<1x32xf32, #tpu.memory_space<vmem>>, %arg14: memref<2x16x32xf32, #tpu.memory_space<vmem>>) attributes {dimension_semantics = [], scalar_prefetch = 0 : i64, scratch_operands = 0 : i64, tpu.core_type = #tpu.core_type<tc>} {
    %c0 = arith.constant 0 : index
    %c0_0 = arith.constant 0 : index
    %c0_1 = arith.constant 0 : index
    %0 = vector.load %arg0[%c0, %c0_0, %c0_1] : memref<2x16x32xf32, #tpu.memory_space<vmem>>, vector<2x16x32xf32>
    %1 = vector.shape_cast %0 : vector<2x16x32xf32> to vector<32x32xf32>
    %c0_2 = arith.constant 0 : index
    %c0_3 = arith.constant 0 : index
    %c0_4 = arith.constant 0 : index
    %2 = vector.load %arg1[%c0_2, %c0_3, %c0_4] : memref<2x1x32xf32, #tpu.memory_space<vmem>>, vector<1x1x32xf32>
    %3 = vector.shape_cast %2 : vector<1x1x32xf32> to vector<1x32xf32>
    %c0_5 = arith.constant 0 : index
    %c0_6 = arith.constant 0 : index
    %c0_7 = arith.constant 0 : index
    %4 = vector.load %arg2[%c0_5, %c0_6, %c0_7] : memref<2x1x32xf32, #tpu.memory_space<vmem>>, vector<1x1x32xf32>
    %5 = vector.shape_cast %4 : vector<1x1x32xf32> to vector<1x32xf32>
    %cst = arith.constant dense<0.000000e+00> : vector<32xf32>
    %6 = vector.multi_reduction <add>, %1, %cst [1] : vector<32x32xf32> to vector<32xf32>
    %7 = vector.shape_cast %6 : vector<32xf32> to vector<32x1xf32>
    %cst_8 = arith.constant 3.200000e+01 : f32
    %8 = vector.broadcast %cst_8 : f32 to vector<32x1xf32>
    %9 = arith.divf %7, %8 : vector<32x1xf32>
    %10 = vector.broadcast %9 : vector<32x1xf32> to vector<32x32xf32>
    %11 = arith.subf %1, %10 : vector<32x32xf32>
    %12 = arith.mulf %11, %11 : vector<32x32xf32>
    %cst_9 = arith.constant dense<0.000000e+00> : vector<32xf32>
    %13 = vector.multi_reduction <add>, %12, %cst_9 [1] : vector<32x32xf32> to vector<32xf32>
    %14 = vector.shape_cast %13 : vector<32xf32> to vector<32x1xf32>
    %cst_10 = arith.constant 3.200000e+01 : f32
    %15 = vector.broadcast %cst_10 : f32 to vector<32x1xf32>
    %16 = arith.divf %14, %15 : vector<32x1xf32>
    %17 = vector.broadcast %9 : vector<32x1xf32> to vector<32x32xf32>
    %18 = arith.subf %1, %17 : vector<32x32xf32>
    %cst_11 = arith.constant 9.99999974E-6 : f32
    %19 = vector.broadcast %cst_11 : f32 to vector<32x1xf32>
    %20 = arith.addf %16, %19 : vector<32x1xf32>
    %21 = math.rsqrt %20 : vector<32x1xf32>
    %22 = vector.broadcast %21 : vector<32x1xf32> to vector<32x32xf32>
    %23 = arith.mulf %18, %22 : vector<32x32xf32>
    %24 = vector.broadcast %3 : vector<1x32xf32> to vector<32x32xf32>
    %25 = arith.mulf %23, %24 : vector<32x32xf32>
    %26 = vector.broadcast %5 : vector<1x32xf32> to vector<32x32xf32>
    %27 = arith.addf %25, %26 : vector<32x32xf32>
    %c0_12 = arith.constant 0 : index
    %c0_13 = arith.constant 0 : index
    %c0_14 = arith.constant 0 : index
    %28 = vector.load %arg3[%c0_12, %c0_13, %c0_14] : memref<2x32x128xf32, #tpu.memory_space<vmem>>, vector<1x32x128xf32>
    %29 = vector.shape_cast %28 : vector<1x32x128xf32> to vector<32x128xf32>
    %cst_15 = arith.constant dense<0.000000e+00> : vector<32x128xf32>
    %30 = tpu.matmul %27, %29, %cst_15 {dimension_numbers = #tpu.dot_dimension_numbers<[1], [0], [0], [1], [0, 0, 1, 1], [], []>} : vector<32x32xf32>, vector<32x128xf32>, vector<32x128xf32> -> vector<32x128xf32>
    %31 = vector.shape_cast %30 : vector<32x128xf32> to vector<2x16x128xf32>
    %32 = tpu.transpose %31, [0, 2, 1] : vector<2x16x128xf32> -> vector<2x128x16xf32>
    %33 = vector.extract_strided_slice %32 {offsets = [0, 0, 0], sizes = [2, 32, 16], strides = [1, 1, 1]} : vector<2x128x16xf32> to vector<2x32x16xf32>
    %34 = vector.shape_cast %33 : vector<2x32x16xf32> to vector<8x8x16xf32>
    %35 = vector.extract_strided_slice %32 {offsets = [0, 32, 0], sizes = [2, 32, 16], strides = [1, 1, 1]} : vector<2x128x16xf32> to vector<2x32x16xf32>
    %36 = vector.shape_cast %35 : vector<2x32x16xf32> to vector<8x8x16xf32>
    %37 = vector.extract_strided_slice %32 {offsets = [0, 64, 0], sizes = [2, 32, 16], strides = [1, 1, 1]} : vector<2x128x16xf32> to vector<2x32x16xf32>
    %38 = vector.shape_cast %37 : vector<2x32x16xf32> to vector<8x8x16xf32>
    %39 = tpu.transpose %34, [0, 2, 1] : vector<8x8x16xf32> -> vector<8x16x8xf32>
    %cst_16 = arith.constant 0.353553385 : f32
    %40 = vector.broadcast %cst_16 : f32 to vector<8x16x8xf32>
    %41 = arith.mulf %39, %40 : vector<8x16x8xf32>
    %cst_17 = arith.constant dense<0.000000e+00> : vector<8x16x16xf32>
    %42 = tpu.matmul %41, %36, %cst_17 {dimension_numbers = #tpu.dot_dimension_numbers<[2], [1], [1], [2], [0, 0, 0, 1, 1, 2], [0], [0]>} : vector<8x16x8xf32>, vector<8x8x16xf32>, vector<8x16x16xf32> -> vector<8x16x16xf32>
    %cst_18 = arith.constant dense<0xFF800000> : vector<8x16xf32>
    %43 = vector.multi_reduction <maximumf>, %42, %cst_18 [2] : vector<8x16x16xf32> to vector<8x16xf32>
    %44 = vector.shape_cast %43 : vector<8x16xf32> to vector<8x16x1xf32>
    %45 = vector.broadcast %44 : vector<8x16x1xf32> to vector<8x16x16xf32>
    %46 = arith.subf %42, %45 : vector<8x16x16xf32>
    %47 = math.exp %46 : vector<8x16x16xf32>
    %cst_19 = arith.constant dense<0.000000e+00> : vector<8x16xf32>
    %48 = vector.multi_reduction <add>, %47, %cst_19 [2] : vector<8x16x16xf32> to vector<8x16xf32>
    %49 = vector.shape_cast %48 : vector<8x16xf32> to vector<8x16x1xf32>
    %50 = vector.broadcast %49 : vector<8x16x1xf32> to vector<8x16x16xf32>
    %51 = arith.divf %47, %50 : vector<8x16x16xf32>
    %cst_20 = arith.constant dense<0.000000e+00> : vector<8x8x16xf32>
    %52 = tpu.matmul %38, %51, %cst_20 {dimension_numbers = #tpu.dot_dimension_numbers<[2], [2], [1], [1], [0, 0, 0, 1, 1, 1], [0], [0]>} : vector<8x8x16xf32>, vector<8x16x16xf32>, vector<8x8x16xf32> -> vector<8x8x16xf32>
    %53 = vector.shape_cast %52 : vector<8x8x16xf32> to vector<2x32x16xf32>
    %54 = tpu.transpose %53, [0, 2, 1] : vector<2x32x16xf32> -> vector<2x16x32xf32>
    %55 = vector.shape_cast %54 : vector<2x16x32xf32> to vector<32x32xf32>
    %c0_21 = arith.constant 0 : index
    %c0_22 = arith.constant 0 : index
    %c0_23 = arith.constant 0 : index
    %56 = vector.load %arg4[%c0_21, %c0_22, %c0_23] : memref<2x32x32xf32, #tpu.memory_space<vmem>>, vector<1x32x32xf32>
    %57 = vector.shape_cast %56 : vector<1x32x32xf32> to vector<32x32xf32>
    %cst_24 = arith.constant dense<0.000000e+00> : vector<32x32xf32>
    %58 = tpu.matmul %55, %57, %cst_24 {dimension_numbers = #tpu.dot_dimension_numbers<[1], [0], [0], [1], [0, 0, 1, 1], [], []>} : vector<32x32xf32>, vector<32x32xf32>, vector<32x32xf32> -> vector<32x32xf32>
    %59 = arith.addf %1, %58 : vector<32x32xf32>
    %c0_25 = arith.constant 0 : index
    %c0_26 = arith.constant 0 : index
    %c0_27 = arith.constant 0 : index
    %60 = vector.load %arg5[%c0_25, %c0_26, %c0_27] : memref<2x1x32xf32, #tpu.memory_space<vmem>>, vector<1x1x32xf32>
    %61 = vector.shape_cast %60 : vector<1x1x32xf32> to vector<1x32xf32>
    %62 = vector.broadcast %61 : vector<1x32xf32> to vector<32x32xf32>
    %63 = arith.addf %59, %62 : vector<32x32xf32>
    %c0_28 = arith.constant 0 : index
    %c0_29 = arith.constant 0 : index
    %c0_30 = arith.constant 0 : index
    %64 = vector.load %arg6[%c0_28, %c0_29, %c0_30] : memref<2x1x32xf32, #tpu.memory_space<vmem>>, vector<1x1x32xf32>
    %65 = vector.shape_cast %64 : vector<1x1x32xf32> to vector<1x32xf32>
    %c0_31 = arith.constant 0 : index
    %c0_32 = arith.constant 0 : index
    %c0_33 = arith.constant 0 : index
    %66 = vector.load %arg7[%c0_31, %c0_32, %c0_33] : memref<2x1x32xf32, #tpu.memory_space<vmem>>, vector<1x1x32xf32>
    %67 = vector.shape_cast %66 : vector<1x1x32xf32> to vector<1x32xf32>
    %cst_34 = arith.constant dense<0.000000e+00> : vector<32xf32>
    %68 = vector.multi_reduction <add>, %63, %cst_34 [1] : vector<32x32xf32> to vector<32xf32>
    %69 = vector.shape_cast %68 : vector<32xf32> to vector<32x1xf32>
    %cst_35 = arith.constant 3.200000e+01 : f32
    %70 = vector.broadcast %cst_35 : f32 to vector<32x1xf32>
    %71 = arith.divf %69, %70 : vector<32x1xf32>
    %72 = vector.broadcast %71 : vector<32x1xf32> to vector<32x32xf32>
    %73 = arith.subf %63, %72 : vector<32x32xf32>
    %74 = arith.mulf %73, %73 : vector<32x32xf32>
    %cst_36 = arith.constant dense<0.000000e+00> : vector<32xf32>
    %75 = vector.multi_reduction <add>, %74, %cst_36 [1] : vector<32x32xf32> to vector<32xf32>
    %76 = vector.shape_cast %75 : vector<32xf32> to vector<32x1xf32>
    %cst_37 = arith.constant 3.200000e+01 : f32
    %77 = vector.broadcast %cst_37 : f32 to vector<32x1xf32>
    %78 = arith.divf %76, %77 : vector<32x1xf32>
    %79 = vector.broadcast %71 : vector<32x1xf32> to vector<32x32xf32>
    %80 = arith.subf %63, %79 : vector<32x32xf32>
    %cst_38 = arith.constant 9.99999974E-6 : f32
    %81 = vector.broadcast %cst_38 : f32 to vector<32x1xf32>
    %82 = arith.addf %78, %81 : vector<32x1xf32>
    %83 = math.rsqrt %82 : vector<32x1xf32>
    %84 = vector.broadcast %83 : vector<32x1xf32> to vector<32x32xf32>
    %85 = arith.mulf %80, %84 : vector<32x32xf32>
    %86 = vector.broadcast %65 : vector<1x32xf32> to vector<32x32xf32>
    %87 = arith.mulf %85, %86 : vector<32x32xf32>
    %88 = vector.broadcast %67 : vector<1x32xf32> to vector<32x32xf32>
    %89 = arith.addf %87, %88 : vector<32x32xf32>
    %c0_39 = arith.constant 0 : index
    %c0_40 = arith.constant 0 : index
    %c0_41 = arith.constant 0 : index
    %90 = vector.load %arg8[%c0_39, %c0_40, %c0_41] : memref<2x32x128xf32, #tpu.memory_space<vmem>>, vector<1x32x128xf32>
    %91 = vector.shape_cast %90 : vector<1x32x128xf32> to vector<32x128xf32>
    %cst_42 = arith.constant dense<0.000000e+00> : vector<32x128xf32>
    %92 = tpu.matmul %89, %91, %cst_42 {dimension_numbers = #tpu.dot_dimension_numbers<[1], [0], [0], [1], [0, 0, 1, 1], [], []>} : vector<32x32xf32>, vector<32x128xf32>, vector<32x128xf32> -> vector<32x128xf32>
    %c0_43 = arith.constant 0 : index
    %c0_44 = arith.constant 0 : index
    %c0_45 = arith.constant 0 : index
    %93 = vector.load %arg9[%c0_43, %c0_44, %c0_45] : memref<2x1x128xf32, #tpu.memory_space<vmem>>, vector<1x1x128xf32>
    %94 = vector.shape_cast %93 : vector<1x1x128xf32> to vector<1x128xf32>
    %95 = vector.broadcast %94 : vector<1x128xf32> to vector<32x128xf32>
    %96 = arith.addf %92, %95 : vector<32x128xf32>
    %97 = arith.mulf %96, %96 : vector<32x128xf32>
    %98 = arith.mulf %96, %97 : vector<32x128xf32>
    %cst_46 = arith.constant 4.471500e-02 : f32
    %99 = vector.broadcast %cst_46 : f32 to vector<32x128xf32>
    %100 = arith.mulf %99, %98 : vector<32x128xf32>
    %101 = arith.addf %96, %100 : vector<32x128xf32>
    %cst_47 = arith.constant 0.797884583 : f32
    %102 = vector.broadcast %cst_47 : f32 to vector<32x128xf32>
    %103 = arith.mulf %102, %101 : vector<32x128xf32>
    %104 = math.tanh %103 : vector<32x128xf32>
    %cst_48 = arith.constant 1.000000e+00 : f32
    %105 = vector.broadcast %cst_48 : f32 to vector<32x128xf32>
    %106 = arith.addf %105, %104 : vector<32x128xf32>
    %cst_49 = arith.constant 5.000000e-01 : f32
    %107 = vector.broadcast %cst_49 : f32 to vector<32x128xf32>
    %108 = arith.mulf %107, %106 : vector<32x128xf32>
    %109 = arith.mulf %96, %108 : vector<32x128xf32>
    %c0_50 = arith.constant 0 : index
    %c0_51 = arith.constant 0 : index
    %c0_52 = arith.constant 0 : index
    %110 = vector.load %arg10[%c0_50, %c0_51, %c0_52] : memref<2x128x32xf32, #tpu.memory_space<vmem>>, vector<1x128x32xf32>
    %111 = vector.shape_cast %110 : vector<1x128x32xf32> to vector<128x32xf32>
    %cst_53 = arith.constant dense<0.000000e+00> : vector<32x32xf32>
    %112 = tpu.matmul %109, %111, %cst_53 {dimension_numbers = #tpu.dot_dimension_numbers<[1], [0], [0], [1], [0, 0, 1, 1], [], []>} : vector<32x128xf32>, vector<128x32xf32>, vector<32x32xf32> -> vector<32x32xf32>
    %113 = arith.addf %63, %112 : vector<32x32xf32>
    %c0_54 = arith.constant 0 : index
    %c0_55 = arith.constant 0 : index
    %c0_56 = arith.constant 0 : index
    %114 = vector.load %arg11[%c0_54, %c0_55, %c0_56] : memref<2x1x32xf32, #tpu.memory_space<vmem>>, vector<1x1x32xf32>
    %115 = vector.shape_cast %114 : vector<1x1x32xf32> to vector<1x32xf32>
    %116 = vector.broadcast %115 : vector<1x32xf32> to vector<32x32xf32>
    %117 = arith.addf %113, %116 : vector<32x32xf32>
    %c1 = arith.constant 1 : index
    %c0_57 = arith.constant 0 : index
    %c0_58 = arith.constant 0 : index
    %118 = vector.load %arg1[%c1, %c0_57, %c0_58] : memref<2x1x32xf32, #tpu.memory_space<vmem>>, vector<1x1x32xf32>
    %119 = vector.shape_cast %118 : vector<1x1x32xf32> to vector<1x32xf32>
    %c1_59 = arith.constant 1 : index
    %c0_60 = arith.constant 0 : index
    %c0_61 = arith.constant 0 : index
    %120 = vector.load %arg2[%c1_59, %c0_60, %c0_61] : memref<2x1x32xf32, #tpu.memory_space<vmem>>, vector<1x1x32xf32>
    %121 = vector.shape_cast %120 : vector<1x1x32xf32> to vector<1x32xf32>
    %cst_62 = arith.constant dense<0.000000e+00> : vector<32xf32>
    %122 = vector.multi_reduction <add>, %117, %cst_62 [1] : vector<32x32xf32> to vector<32xf32>
    %123 = vector.shape_cast %122 : vector<32xf32> to vector<32x1xf32>
    %cst_63 = arith.constant 3.200000e+01 : f32
    %124 = vector.broadcast %cst_63 : f32 to vector<32x1xf32>
    %125 = arith.divf %123, %124 : vector<32x1xf32>
    %126 = vector.broadcast %125 : vector<32x1xf32> to vector<32x32xf32>
    %127 = arith.subf %117, %126 : vector<32x32xf32>
    %128 = arith.mulf %127, %127 : vector<32x32xf32>
    %cst_64 = arith.constant dense<0.000000e+00> : vector<32xf32>
    %129 = vector.multi_reduction <add>, %128, %cst_64 [1] : vector<32x32xf32> to vector<32xf32>
    %130 = vector.shape_cast %129 : vector<32xf32> to vector<32x1xf32>
    %cst_65 = arith.constant 3.200000e+01 : f32
    %131 = vector.broadcast %cst_65 : f32 to vector<32x1xf32>
    %132 = arith.divf %130, %131 : vector<32x1xf32>
    %133 = vector.broadcast %125 : vector<32x1xf32> to vector<32x32xf32>
    %134 = arith.subf %117, %133 : vector<32x32xf32>
    %cst_66 = arith.constant 9.99999974E-6 : f32
    %135 = vector.broadcast %cst_66 : f32 to vector<32x1xf32>
    %136 = arith.addf %132, %135 : vector<32x1xf32>
    %137 = math.rsqrt %136 : vector<32x1xf32>
    %138 = vector.broadcast %137 : vector<32x1xf32> to vector<32x32xf32>
    %139 = arith.mulf %134, %138 : vector<32x32xf32>
    %140 = vector.broadcast %119 : vector<1x32xf32> to vector<32x32xf32>
    %141 = arith.mulf %139, %140 : vector<32x32xf32>
    %142 = vector.broadcast %121 : vector<1x32xf32> to vector<32x32xf32>
    %143 = arith.addf %141, %142 : vector<32x32xf32>
    %c1_67 = arith.constant 1 : index
    %c0_68 = arith.constant 0 : index
    %c0_69 = arith.constant 0 : index
    %144 = vector.load %arg3[%c1_67, %c0_68, %c0_69] : memref<2x32x128xf32, #tpu.memory_space<vmem>>, vector<1x32x128xf32>
    %145 = vector.shape_cast %144 : vector<1x32x128xf32> to vector<32x128xf32>
    %cst_70 = arith.constant dense<0.000000e+00> : vector<32x128xf32>
    %146 = tpu.matmul %143, %145, %cst_70 {dimension_numbers = #tpu.dot_dimension_numbers<[1], [0], [0], [1], [0, 0, 1, 1], [], []>} : vector<32x32xf32>, vector<32x128xf32>, vector<32x128xf32> -> vector<32x128xf32>
    %147 = vector.shape_cast %146 : vector<32x128xf32> to vector<2x16x128xf32>
    %148 = tpu.transpose %147, [0, 2, 1] : vector<2x16x128xf32> -> vector<2x128x16xf32>
    %149 = vector.extract_strided_slice %148 {offsets = [0, 0, 0], sizes = [2, 32, 16], strides = [1, 1, 1]} : vector<2x128x16xf32> to vector<2x32x16xf32>
    %150 = vector.shape_cast %149 : vector<2x32x16xf32> to vector<8x8x16xf32>
    %151 = vector.extract_strided_slice %148 {offsets = [0, 32, 0], sizes = [2, 32, 16], strides = [1, 1, 1]} : vector<2x128x16xf32> to vector<2x32x16xf32>
    %152 = vector.shape_cast %151 : vector<2x32x16xf32> to vector<8x8x16xf32>
    %153 = vector.extract_strided_slice %148 {offsets = [0, 64, 0], sizes = [2, 32, 16], strides = [1, 1, 1]} : vector<2x128x16xf32> to vector<2x32x16xf32>
    %154 = vector.shape_cast %153 : vector<2x32x16xf32> to vector<8x8x16xf32>
    %155 = tpu.transpose %150, [0, 2, 1] : vector<8x8x16xf32> -> vector<8x16x8xf32>
    %cst_71 = arith.constant 0.353553385 : f32
    %156 = vector.broadcast %cst_71 : f32 to vector<8x16x8xf32>
    %157 = arith.mulf %155, %156 : vector<8x16x8xf32>
    %cst_72 = arith.constant dense<0.000000e+00> : vector<8x16x16xf32>
    %158 = tpu.matmul %157, %152, %cst_72 {dimension_numbers = #tpu.dot_dimension_numbers<[2], [1], [1], [2], [0, 0, 0, 1, 1, 2], [0], [0]>} : vector<8x16x8xf32>, vector<8x8x16xf32>, vector<8x16x16xf32> -> vector<8x16x16xf32>
    %cst_73 = arith.constant dense<0xFF800000> : vector<8x16xf32>
    %159 = vector.multi_reduction <maximumf>, %158, %cst_73 [2] : vector<8x16x16xf32> to vector<8x16xf32>
    %160 = vector.shape_cast %159 : vector<8x16xf32> to vector<8x16x1xf32>
    %161 = vector.broadcast %160 : vector<8x16x1xf32> to vector<8x16x16xf32>
    %162 = arith.subf %158, %161 : vector<8x16x16xf32>
    %163 = math.exp %162 : vector<8x16x16xf32>
    %cst_74 = arith.constant dense<0.000000e+00> : vector<8x16xf32>
    %164 = vector.multi_reduction <add>, %163, %cst_74 [2] : vector<8x16x16xf32> to vector<8x16xf32>
    %165 = vector.shape_cast %164 : vector<8x16xf32> to vector<8x16x1xf32>
    %166 = vector.broadcast %165 : vector<8x16x1xf32> to vector<8x16x16xf32>
    %167 = arith.divf %163, %166 : vector<8x16x16xf32>
    %cst_75 = arith.constant dense<0.000000e+00> : vector<8x8x16xf32>
    %168 = tpu.matmul %154, %167, %cst_75 {dimension_numbers = #tpu.dot_dimension_numbers<[2], [2], [1], [1], [0, 0, 0, 1, 1, 1], [0], [0]>} : vector<8x8x16xf32>, vector<8x16x16xf32>, vector<8x8x16xf32> -> vector<8x8x16xf32>
    %169 = vector.shape_cast %168 : vector<8x8x16xf32> to vector<2x32x16xf32>
    %170 = tpu.transpose %169, [0, 2, 1] : vector<2x32x16xf32> -> vector<2x16x32xf32>
    %171 = vector.shape_cast %170 : vector<2x16x32xf32> to vector<32x32xf32>
    %c1_76 = arith.constant 1 : index
    %c0_77 = arith.constant 0 : index
    %c0_78 = arith.constant 0 : index
    %172 = vector.load %arg4[%c1_76, %c0_77, %c0_78] : memref<2x32x32xf32, #tpu.memory_space<vmem>>, vector<1x32x32xf32>
    %173 = vector.shape_cast %172 : vector<1x32x32xf32> to vector<32x32xf32>
    %cst_79 = arith.constant dense<0.000000e+00> : vector<32x32xf32>
    %174 = tpu.matmul %171, %173, %cst_79 {dimension_numbers = #tpu.dot_dimension_numbers<[1], [0], [0], [1], [0, 0, 1, 1], [], []>} : vector<32x32xf32>, vector<32x32xf32>, vector<32x32xf32> -> vector<32x32xf32>
    %175 = arith.addf %117, %174 : vector<32x32xf32>
    %c1_80 = arith.constant 1 : index
    %c0_81 = arith.constant 0 : index
    %c0_82 = arith.constant 0 : index
    %176 = vector.load %arg5[%c1_80, %c0_81, %c0_82] : memref<2x1x32xf32, #tpu.memory_space<vmem>>, vector<1x1x32xf32>
    %177 = vector.shape_cast %176 : vector<1x1x32xf32> to vector<1x32xf32>
    %178 = vector.broadcast %177 : vector<1x32xf32> to vector<32x32xf32>
    %179 = arith.addf %175, %178 : vector<32x32xf32>
    %c1_83 = arith.constant 1 : index
    %c0_84 = arith.constant 0 : index
    %c0_85 = arith.constant 0 : index
    %180 = vector.load %arg6[%c1_83, %c0_84, %c0_85] : memref<2x1x32xf32, #tpu.memory_space<vmem>>, vector<1x1x32xf32>
    %181 = vector.shape_cast %180 : vector<1x1x32xf32> to vector<1x32xf32>
    %c1_86 = arith.constant 1 : index
    %c0_87 = arith.constant 0 : index
    %c0_88 = arith.constant 0 : index
    %182 = vector.load %arg7[%c1_86, %c0_87, %c0_88] : memref<2x1x32xf32, #tpu.memory_space<vmem>>, vector<1x1x32xf32>
    %183 = vector.shape_cast %182 : vector<1x1x32xf32> to vector<1x32xf32>
    %cst_89 = arith.constant dense<0.000000e+00> : vector<32xf32>
    %184 = vector.multi_reduction <add>, %179, %cst_89 [1] : vector<32x32xf32> to vector<32xf32>
    %185 = vector.shape_cast %184 : vector<32xf32> to vector<32x1xf32>
    %cst_90 = arith.constant 3.200000e+01 : f32
    %186 = vector.broadcast %cst_90 : f32 to vector<32x1xf32>
    %187 = arith.divf %185, %186 : vector<32x1xf32>
    %188 = vector.broadcast %187 : vector<32x1xf32> to vector<32x32xf32>
    %189 = arith.subf %179, %188 : vector<32x32xf32>
    %190 = arith.mulf %189, %189 : vector<32x32xf32>
    %cst_91 = arith.constant dense<0.000000e+00> : vector<32xf32>
    %191 = vector.multi_reduction <add>, %190, %cst_91 [1] : vector<32x32xf32> to vector<32xf32>
    %192 = vector.shape_cast %191 : vector<32xf32> to vector<32x1xf32>
    %cst_92 = arith.constant 3.200000e+01 : f32
    %193 = vector.broadcast %cst_92 : f32 to vector<32x1xf32>
    %194 = arith.divf %192, %193 : vector<32x1xf32>
    %195 = vector.broadcast %187 : vector<32x1xf32> to vector<32x32xf32>
    %196 = arith.subf %179, %195 : vector<32x32xf32>
    %cst_93 = arith.constant 9.99999974E-6 : f32
    %197 = vector.broadcast %cst_93 : f32 to vector<32x1xf32>
    %198 = arith.addf %194, %197 : vector<32x1xf32>
    %199 = math.rsqrt %198 : vector<32x1xf32>
    %200 = vector.broadcast %199 : vector<32x1xf32> to vector<32x32xf32>
    %201 = arith.mulf %196, %200 : vector<32x32xf32>
    %202 = vector.broadcast %181 : vector<1x32xf32> to vector<32x32xf32>
    %203 = arith.mulf %201, %202 : vector<32x32xf32>
    %204 = vector.broadcast %183 : vector<1x32xf32> to vector<32x32xf32>
    %205 = arith.addf %203, %204 : vector<32x32xf32>
    %c1_94 = arith.constant 1 : index
    %c0_95 = arith.constant 0 : index
    %c0_96 = arith.constant 0 : index
    %206 = vector.load %arg8[%c1_94, %c0_95, %c0_96] : memref<2x32x128xf32, #tpu.memory_space<vmem>>, vector<1x32x128xf32>
    %207 = vector.shape_cast %206 : vector<1x32x128xf32> to vector<32x128xf32>
    %cst_97 = arith.constant dense<0.000000e+00> : vector<32x128xf32>
    %208 = tpu.matmul %205, %207, %cst_97 {dimension_numbers = #tpu.dot_dimension_numbers<[1], [0], [0], [1], [0, 0, 1, 1], [], []>} : vector<32x32xf32>, vector<32x128xf32>, vector<32x128xf32> -> vector<32x128xf32>
    %c1_98 = arith.constant 1 : index
    %c0_99 = arith.constant 0 : index
    %c0_100 = arith.constant 0 : index
    %209 = vector.load %arg9[%c1_98, %c0_99, %c0_100] : memref<2x1x128xf32, #tpu.memory_space<vmem>>, vector<1x1x128xf32>
    %210 = vector.shape_cast %209 : vector<1x1x128xf32> to vector<1x128xf32>
    %211 = vector.broadcast %210 : vector<1x128xf32> to vector<32x128xf32>
    %212 = arith.addf %208, %211 : vector<32x128xf32>
    %213 = arith.mulf %212, %212 : vector<32x128xf32>
    %214 = arith.mulf %212, %213 : vector<32x128xf32>
    %cst_101 = arith.constant 4.471500e-02 : f32
    %215 = vector.broadcast %cst_101 : f32 to vector<32x128xf32>
    %216 = arith.mulf %215, %214 : vector<32x128xf32>
    %217 = arith.addf %212, %216 : vector<32x128xf32>
    %cst_102 = arith.constant 0.797884583 : f32
    %218 = vector.broadcast %cst_102 : f32 to vector<32x128xf32>
    %219 = arith.mulf %218, %217 : vector<32x128xf32>
    %220 = math.tanh %219 : vector<32x128xf32>
    %cst_103 = arith.constant 1.000000e+00 : f32
    %221 = vector.broadcast %cst_103 : f32 to vector<32x128xf32>
    %222 = arith.addf %221, %220 : vector<32x128xf32>
    %cst_104 = arith.constant 5.000000e-01 : f32
    %223 = vector.broadcast %cst_104 : f32 to vector<32x128xf32>
    %224 = arith.mulf %223, %222 : vector<32x128xf32>
    %225 = arith.mulf %212, %224 : vector<32x128xf32>
    %c1_105 = arith.constant 1 : index
    %c0_106 = arith.constant 0 : index
    %c0_107 = arith.constant 0 : index
    %226 = vector.load %arg10[%c1_105, %c0_106, %c0_107] : memref<2x128x32xf32, #tpu.memory_space<vmem>>, vector<1x128x32xf32>
    %227 = vector.shape_cast %226 : vector<1x128x32xf32> to vector<128x32xf32>
    %cst_108 = arith.constant dense<0.000000e+00> : vector<32x32xf32>
    %228 = tpu.matmul %225, %227, %cst_108 {dimension_numbers = #tpu.dot_dimension_numbers<[1], [0], [0], [1], [0, 0, 1, 1], [], []>} : vector<32x128xf32>, vector<128x32xf32>, vector<32x32xf32> -> vector<32x32xf32>
    %229 = arith.addf %179, %228 : vector<32x32xf32>
    %c1_109 = arith.constant 1 : index
    %c0_110 = arith.constant 0 : index
    %c0_111 = arith.constant 0 : index
    %230 = vector.load %arg11[%c1_109, %c0_110, %c0_111] : memref<2x1x32xf32, #tpu.memory_space<vmem>>, vector<1x1x32xf32>
    %231 = vector.shape_cast %230 : vector<1x1x32xf32> to vector<1x32xf32>
    %232 = vector.broadcast %231 : vector<1x32xf32> to vector<32x32xf32>
    %233 = arith.addf %229, %232 : vector<32x32xf32>
    %c0_112 = arith.constant 0 : index
    %c0_113 = arith.constant 0 : index
    %234 = vector.load %arg12[%c0_112, %c0_113] : memref<1x32xf32, #tpu.memory_space<vmem>>, vector<1x32xf32>
    %c0_114 = arith.constant 0 : index
    %c0_115 = arith.constant 0 : index
    %235 = vector.load %arg13[%c0_114, %c0_115] : memref<1x32xf32, #tpu.memory_space<vmem>>, vector<1x32xf32>
    %cst_116 = arith.constant dense<0.000000e+00> : vector<32xf32>
    %236 = vector.multi_reduction <add>, %233, %cst_116 [1] : vector<32x32xf32> to vector<32xf32>
    %237 = vector.shape_cast %236 : vector<32xf32> to vector<32x1xf32>
    %cst_117 = arith.constant 3.200000e+01 : f32
    %238 = vector.broadcast %cst_117 : f32 to vector<32x1xf32>
    %239 = arith.divf %237, %238 : vector<32x1xf32>
    %240 = vector.broadcast %239 : vector<32x1xf32> to vector<32x32xf32>
    %241 = arith.subf %233, %240 : vector<32x32xf32>
    %242 = arith.mulf %241, %241 : vector<32x32xf32>
    %cst_118 = arith.constant dense<0.000000e+00> : vector<32xf32>
    %243 = vector.multi_reduction <add>, %242, %cst_118 [1] : vector<32x32xf32> to vector<32xf32>
    %244 = vector.shape_cast %243 : vector<32xf32> to vector<32x1xf32>
    %cst_119 = arith.constant 3.200000e+01 : f32
    %245 = vector.broadcast %cst_119 : f32 to vector<32x1xf32>
    %246 = arith.divf %244, %245 : vector<32x1xf32>
    %247 = vector.broadcast %239 : vector<32x1xf32> to vector<32x32xf32>
    %248 = arith.subf %233, %247 : vector<32x32xf32>
    %cst_120 = arith.constant 9.99999974E-6 : f32
    %249 = vector.broadcast %cst_120 : f32 to vector<32x1xf32>
    %250 = arith.addf %246, %249 : vector<32x1xf32>
    %251 = math.rsqrt %250 : vector<32x1xf32>
    %252 = vector.broadcast %251 : vector<32x1xf32> to vector<32x32xf32>
    %253 = arith.mulf %248, %252 : vector<32x32xf32>
    %254 = vector.broadcast %234 : vector<1x32xf32> to vector<32x32xf32>
    %255 = arith.mulf %253, %254 : vector<32x32xf32>
    %256 = vector.broadcast %235 : vector<1x32xf32> to vector<32x32xf32>
    %257 = arith.addf %255, %256 : vector<32x32xf32>
    %258 = vector.shape_cast %257 : vector<32x32xf32> to vector<2x16x32xf32>
    %c0_121 = arith.constant 0 : index
    %c0_122 = arith.constant 0 : index
    %c0_123 = arith.constant 0 : index
    %259 = vector.load %arg14[%c0_121, %c0_122, %c0_123] : memref<2x16x32xf32, #tpu.memory_space<vmem>>, vector<2x16x32xf32>
    tpu.vector_store %arg14[%c0_121, %c0_122, %c0_123], %258 {strides = array<i32>} : memref<2x16x32xf32, #tpu.memory_space<vmem>>, vector<2x16x32xf32>,
    return
  }
}

</mosaic_0001>

<bundles_post_ra>
// kernel: tpu_custom_call.1
= control target key start
LH: loop header
LB: loop body
LE: loop exit
PB: predicated region body
PF: predicated region fallthrough
CT: control target
= control target key end

     0   :  { %vm54_vm0 = vcmask 261120   ;;  %s5095_s0 = inlined_call_operand.vmem [shape: f32[2,16,32], index: 0, kind: input, shape index: {}]   ;;  %s5096_s1 = inlined_call_operand.vmem [shape: f32[2,1,32], index: 1, kind: input, shape index: {}]   ;;  %s5097_s2 = inlined_call_operand.vmem [shape: f32[2,1,32], index: 2, kind: input, shape index: {}]   ;;  %s5098_s3 = inlined_call_operand.vmem [shape: f32[2,32,128], index: 3, kind: input, shape index: {}]   ;;  %s5099_s4 = inlined_call_operand.vmem [shape: f32[2,32,32], index: 4, kind: input, shape index: {}]   ;;  %s5100_s5 = inlined_call_operand.vmem [shape: f32[2,1,32], index: 5, kind: input, shape index: {}]   ;;  %s5101_s6 = inlined_call_operand.vmem [shape: f32[2,1,32], index: 6, kind: input, shape index: {}]   ;;  %s5102_s7 = inlined_call_operand.vmem [shape: f32[2,1,32], index: 7, kind: input, shape index: {}]   ;;  %s5103_s8 = inlined_call_operand.vmem [shape: f32[2,32,128], index: 8, kind: input, shape index: {}]   ;;  %s5104_s9 = inlined_call_operand.vmem [shape: f32[2,1,128], index: 9, kind: input, shape index: {}]   ;;  %s5105_s10 = inlined_call_operand.vmem [shape: f32[2,128,32], index: 10, kind: input, shape index: {}]   ;;  %s5106_s11 = inlined_call_operand.vmem [shape: f32[2,1,32], index: 11, kind: input, shape index: {}]   ;;  %s5107_s12 = inlined_call_operand.vmem [shape: f32[1,32], index: 12, kind: input, shape index: {}]   ;;  %s5108_s13 = inlined_call_operand.vmem [shape: f32[1,32], index: 13, kind: input, shape index: {}]   ;;  %s5109_s14 = inlined_call_operand.hbm [shape: f32[2,16,32], index: 14, kind: output, shape index: {}]  }
   0x1   :  { %v50_v0 = vld [vmem:[%s5095_s0 + $0x10] sm:$0xff]  ;;  %v48_v1 = vld [vmem:[%s5095_s0] sm:$0xff]  ;;  %v51_v4 = vld [vmem:[%s5095_s0 + $0x18] sm:$0xff] }
   0x2   :  { %v61_v2 = vsel %vm54_vm0, %v50_v0, 0.0  ;;  %v55_v3 = vsel %vm54_vm0, %v48_v1, 0.0  ;;  %v49_v5 = vld [vmem:[%s5095_s0 + $0x8] sm:$0xff]  ;;  %v64_v6 = vsel %vm54_vm0, %v51_v4, 0.0 }
   0x3   :  { %62 = vadd.xlane.f32.xlu1 %v61_v2  ;;  %56 = vadd.xlane.f32.xlu0 %v55_v3  ;;  %v58_v7 = vsel %vm54_vm0, %v49_v5, 0.0 }
   0x4   :  { %19 = vsyncpa [#allocation3], 0  ;;  %v3975_v8 = vmov 32.0   ;;  %v167_v35 = vld [vmem:[%s5098_s3 + $0x18] sm:$0xff]  ;;  %v166_v36 = vld [vmem:[%s5098_s3 + $0x10] sm:$0xff]  ;;  %vm545_vm14 = vcmask 64512  }
   0x5   :  { %3759 = vrcp.f32 %v3975_v8  ;;  %192 = vmatpush.msra.mxu0 %v167_v35  ;;  %v165_v37 = vld [vmem:[%s5098_s3 + $0x8] sm:$0xff]  ;;  %v164_v38 = vld [vmem:[%s5098_s3] sm:$0xff]  ;;  %vm778_vm15 = vcmask 130048   ;;  %s3587_s17 = sshll.u32 %s5109_s14, 4  ;;  %s3977_s18 = smov 128   ;;  %s3588_s17 = int_to_ptr.hbm [resolvable:$true] %s3587_s17 }
   0x7   :  { %193 = vmatpush.msra.mxu0 %v166_v36 }
   0x9   :  { %194 = vmatpush.msra.mxu0 %v165_v37 }
   0xb   :  { %65 = vadd.xlane.f32.xlu1 %v64_v6  ;;  %59 = vadd.xlane.f32.xlu0 %v58_v7  ;;  %v3760_v9 = vpop.eup %3759 }
   0xc   :  { %v68_v10 = vmul.f32 32.0, %v3760_v9  ;;  %vm72_vm1 = vweird.f32 %v3760_v9  ;;  %195 = vmatpush.msra.mxu0 %v164_v38 }
   0xe   :  { %v69_v11 = vsub.f32 1.0, %v68_v10 }
  0x10   :  { %v70_v12 = vmul.f32 %v3760_v9, %v69_v11 }
  0x12   :  { %v71_v13 = vadd.f32 %v3760_v9, %v70_v12 }
  0x14   :  { %v4070_v14 = vsel %vm72_vm1, %v3760_v9, %v71_v13 }
  0x76   :  { %v63_v15 = vpop.xlane.xlu1 %62  ;;  %v57_v16 = vpop.xlane.xlu0 %56 }
  0x77   :  { %v76_v17 = vmul.f32 %v4070_v14, %v63_v15  ;;  %v74_v18 = vmul.f32 %v4070_v14, %v57_v16 }
  0x79   :  { %v4074_v19 = vsub.f32 %v50_v0, %v76_v17  ;;  %v4076_v20 = vsub.f32 %v48_v1, %v74_v18  ;;  %v3743_v1 = vld [vmem:[%s5096_s1] ss:$0 sm:$0xff] }
  0x7b   :  { %v84_v21 = vmul.f32 %v4074_v19, %v4074_v19  ;;  %v82_v22 = vmul.f32 %v4076_v20, %v4076_v20 }
  0x7d   :  { %v92_v23 = vsel %vm54_vm0, %v84_v21, 0.0  ;;  %v86_v24 = vsel %vm54_vm0, %v82_v22, 0.0 }
  0x7e   :  { %v66_v25 = vpop.xlane.xlu1 %65  ;;  %93 = vadd.xlane.f32.xlu0 %v92_v23  ;;  %87 = vadd.xlane.f32.xlu2 %v86_v24  ;;  %v60_v26 = vpop.xlane.xlu0 %59 }
  0x7f   :  { %v77_v27 = vmul.f32 %v4070_v14, %v66_v25  ;;  %v75_v28 = vmul.f32 %v4070_v14, %v60_v26 }
  0x81   :  { %v4086_v29 = vsub.f32 %v51_v4, %v77_v27  ;;  %v4088_v30 = vsub.f32 %v49_v5, %v75_v28  ;;  %v3744_v5 = vld [vmem:[%s5097_s2] ss:$0 sm:$0xff] }
  0x83   :  { %v85_v31 = vmul.f32 %v4086_v29, %v4086_v29  ;;  %v83_v32 = vmul.f32 %v4088_v30, %v4088_v30 }
  0x85   :  { %v95_v33 = vsel %vm54_vm0, %v85_v31, 0.0  ;;  %v89_v34 = vsel %vm54_vm0, %v83_v32, 0.0 }
  0x86   :  { %96 = vadd.xlane.f32.xlu1 %v95_v33  ;;  %90 = vadd.xlane.f32.xlu2 %v89_v34 }
  0xf1   :  { %v88_v39 = vpop.xlane.xlu2 %87  ;;  %v94_v40 = vpop.xlane.xlu0 %93 }
  0xf2   :  { %v98_v41 = vmul.f32 %v88_v39, %v4070_v14  ;;  %v100_v42 = vmul.f32 %v94_v40, %v4070_v14 }
  0xf4   :  { %v102_v43 = vadd.f32 1e-05, %v98_v41  ;;  %v104_v44 = vadd.f32 1e-05, %v100_v42 }
  0xf6   :  { %3761 = vrsqrt.f32 %v102_v43  ;;  %vm112_vm3 = vweird.f32 %v102_v43  ;;  %vm132_vm5 = vweird.f32 %v104_v44 }
  0xf7   :  { %3763 = vrsqrt.f32 %v104_v44 }
  0xf9   :  { %v97_v45 = vpop.xlane.xlu1 %96  ;;  %v91_v46 = vpop.xlane.xlu2 %90 }
  0xfa   :  { %v101_v47 = vmul.f32 %v97_v45, %v4070_v14  ;;  %v99_v48 = vmul.f32 %v91_v46, %v4070_v14 }
  0xfc   :  { %v3762_v49 = vpop.eup %3761  ;;  %v105_v50 = vadd.f32 1e-05, %v101_v47  ;;  %v103_v51 = vadd.f32 1e-05, %v99_v48 }
  0xfd   :  { %v3764_v52 = vpop.eup %3763  ;;  %v107_v53 = vmul.f32 %v3762_v49, %v102_v43  ;;  %vm113_vm2 = vweird.f32 %v3762_v49 }
  0xfe   :  { %v127_v54 = vmul.f32 %v3764_v52, %v104_v44  ;;  %3765 = vrsqrt.f32 %v105_v50  ;;  %vm114_vm4 = vmor %vm112_vm3, %vm113_vm2  ;;  %vm133_vm6 = vweird.f32 %v3764_v52  ;;  %vm122_vm9 = vweird.f32 %v103_v51 }
  0xff   :  { %v108_v55 = vmul.f32 %v3762_v49, %v107_v53  ;;  %3767 = vrsqrt.f32 %v103_v51  ;;  %vm134_vm8 = vmor %vm132_vm5, %vm133_vm6  ;;  %vm142_vm11 = vweird.f32 %v105_v50 }
 0x100   :  { %v128_v57 = vmul.f32 %v3764_v52, %v127_v54 }
 0x101   :  { %v109_v56 = vmul.f32 0.5, %v108_v55 }
 0x102   :  { %v129_v62 = vmul.f32 0.5, %v128_v57 }
 0x103   :  { %v110_v58 = vsub.f32 1.5, %v109_v56 }
 0x104   :  { %v3766_v59 = vpop.eup %3765  ;;  %v130_v6 = vsub.f32 1.5, %v129_v62 }
 0x105   :  { %v3768_v60 = vpop.eup %3767  ;;  %v111_v61 = vmul.f32 %v3762_v49, %v110_v58  ;;  %v137_v63 = vmul.f32 %v3766_v59, %v105_v50  ;;  %vm143_vm12 = vweird.f32 %v3766_v59 }
 0x106   :  { %v117_v0 = vmul.f32 %v3768_v60, %v103_v51  ;;  %vm123_vm7 = vweird.f32 %v3768_v60  ;;  %v131_v12 = vmul.f32 %v3764_v52, %v130_v6  ;;  %vm144_vm13 = vmor %vm142_vm11, %vm143_vm12 }
 0x107   :  { %v115_v2 = vsel %vm114_vm4, %v3762_v49, %v111_v61  ;;  %v138_v7 = vmul.f32 %v3766_v59, %v137_v63  ;;  %vm124_vm10 = vmor %vm122_vm9, %vm123_vm7 }
 0x108   :  { %v118_v3 = vmul.f32 %v3768_v60, %v117_v0  ;;  %v146_v4 = vmul.f32 %v115_v2, %v4076_v20  ;;  %v135_v18 = vsel %vm134_vm8, %v3764_v52, %v131_v12 }
 0x109   :  { %v139_v13 = vmul.f32 0.5, %v138_v7  ;;  %v148_v23 = vmul.f32 %v135_v18, %v4074_v19 }
 0x10a   :  { %v119_v8 = vmul.f32 0.5, %v118_v3  ;;  %v153_v9 = vmul.f32 %v3743_v1, %v146_v4 }
 0x10b   :  { %v140_v20 = vsub.f32 1.5, %v139_v13  ;;  %v155_v25 = vmul.f32 %v3743_v1, %v148_v23 }
 0x10c   :  { %v120_v10 = vsub.f32 1.5, %v119_v8  ;;  %v160_v11 = vadd.f32 %v3744_v5, %v153_v9 }
 0x10d   :  { %v141_v24 = vmul.f32 %v3766_v59, %v140_v20  ;;  %v162_v27 = vadd.f32 %v3744_v5, %v155_v25 }
 0x10e   :  { %v121_v15 = vmul.f32 %v3768_v60, %v120_v10  ;;  %3599 = vmatmul.msk.f32.vlgmr.msra.gmra.mxu0 %vm54_vm0, %v160_v11 }
 0x10f   :  { %v145_v26 = vsel %vm144_vm13, %v3766_v59, %v141_v24 }
 0x110   :  { %v125_v16 = vsel %vm124_vm10, %v3768_v60, %v121_v15  ;;  %v149_v28 = vmul.f32 %v145_v26, %v4086_v29 }
 0x111   :  { %v147_v17 = vmul.f32 %v125_v16, %v4088_v30 }
 0x112   :  { %v156_v30 = vmul.f32 %v3743_v1, %v149_v28 }
 0x113   :  { %v154_v21 = vmul.f32 %v3743_v1, %v147_v17 }
 0x114   :  { %v163_v31 = vadd.f32 %v3744_v5, %v156_v30 }
 0x115   :  { %v161_v22 = vadd.f32 %v3744_v5, %v154_v21 }
 0x117   :  { %3600 = vmatmul.msk.f32.gmra.mxu0 %vm54_vm0, %v161_v22 }
 0x11f   :  { %3601 = vmatmul.msk.f32.gmra.mxu0 %vm54_vm0, %v162_v27 }
 0x127   :  { %3602 = vmatmul.msk.f32.gmra.mxu0 %vm54_vm0, %v163_v31 }
 0x18b   :  { %v197_v32 = vpop.f32.mrf.mxu0 }
 0x18c   :  { %209 = vxpose.xlu2.b32.start [1/2] (short) (narrow) %v197_v32, 96 }
 0x194   :  { %v200_v33 = vpop.f32.mrf.mxu0 }
 0x195   :  { %210 = vxpose.xlu2.b32.end [2/2] (short) (narrow) %v200_v33, 96 }
 0x19c   :  { %v203_v19 = vpop.f32.mrf.mxu0 }
 0x19d   :  { %241 = vxpose.xlu1.b32.start [1/2] (short) (narrow) %v203_v19, 96 }
 0x1a4   :  { %v206_v34 = vpop.f32.mrf.mxu0 }
 0x1a5   :  { %242 = vxpose.xlu1.b32.end [2/2] (short) (narrow) %v206_v34, 96 }
 0x226   :  { %v225_v35 = vpop.trf.xlu2 }
 0x227   :  { %273 = vxpose.xlu0.b32.start.end [1/1] (short) (narrow) %v225_v35, 16 }
 0x22e   :  { %v226_v36 = vpop.trf.xlu2 }
 0x236   :  { %v227_v37 = vpop.trf.xlu2 }
 0x237   :  { %305 = vxpose.xlu0.b32.start.end [1/1] (short) (narrow) %v226_v36, 16  ;;  %337 = vxpose.xlu2.b32.start.end [1/1] (short) (narrow) %v227_v37, 16 }
 0x23e   :  { %v228_v38 = vpop.trf.xlu2 }
 0x241   :  { %v257_v29 = vpop.trf.xlu1 }
 0x242   :  { %401 = vxpose.xlu1.b32.start.end [1/1] (short) (narrow) %v257_v29, 16 }
 0x246   :  { %v229_v41 = vpop.trf.xlu2 }
 0x247   :  { %369 = vxpose.xlu0.b32.start.end [1/1] (short) (narrow) %v228_v38, 16  ;;  %567 = vmatpush.msra.mxu3 %v229_v41 }
 0x249   :  { %v258_v39 = vpop.trf.xlu1 }
 0x24e   :  { %v230_v43 = vpop.trf.xlu2 }
 0x24f   :  { %596 = vmatpush.msra.mxu2 %v230_v43 }
 0x251   :  { %v259_v40 = vpop.trf.xlu1 }
 0x256   :  { %v231_v45 = vpop.trf.xlu2 }
 0x257   :  { %433 = vxpose.xlu0.b32.start.end [1/1] (short) (narrow) %v258_v39, 16  ;;  %625 = vmatpush.msrb.mxu3 %v231_v45 }
 0x259   :  { %v260_v42 = vpop.trf.xlu1 }
 0x25e   :  { %v232_v47 = vpop.trf.xlu2 }
 0x25f   :  { %654 = vmatpush.msra.mxu1 %v232_v47 }
 0x261   :  { %v261_v44 = vpop.trf.xlu1 }
 0x262   :  { %683 = vmatpush.msrb.mxu2 %v261_v44 }
 0x266   :  { %v4126_v49 = vpop.trf.xlu2 }
 0x267   :  { %465 = vxpose.xlu0.b32.start.end [1/1] (short) (narrow) %v259_v40, 16 }
 0x269   :  { %v262_v46 = vpop.trf.xlu1 }
 0x26e   :  { %v4128_v51 = vpop.trf.xlu2 }
 0x271   :  { %v263_v48 = vpop.trf.xlu1 }
 0x272   :  { %741 = vmatpush.msrb.mxu1 %v263_v48 }
 0x276   :  { %v4132_v53 = vpop.trf.xlu2 }
 0x277   :  { %497 = vxpose.xlu0.b32.start.end [1/1] (short) (narrow) %v260_v42, 16 }
 0x279   :  { %v264_v50 = vpop.trf.xlu1 }
 0x27e   :  { %v4136_v56 = vpop.trf.xlu2 }
 0x281   :  { %v4130_v52 = vpop.trf.xlu1 }
 0x289   :  { %v4134_v54 = vpop.trf.xlu1 }
 0x291   :  { %v4139_v58 = vpop.trf.xlu1 }
 0x299   :  { %v4142_v1 = vpop.trf.xlu1 }
 0x2cb   :  { %v289_v55 = vpop.trf.xlu0 }
 0x2cc   :  { %v529_v57 = vmul.f32 0.35355338, %v289_v55 }
 0x2ce   :  { %3603 = vmatmul.msk.f32.vlgmr.msra.gmra.mxu3 %vm545_vm14, %v529_v57 }
 0x2cf   :  { %712 = vmatpush.msra.mxu3 %v262_v46 }
 0x2d0   :  { %v353_v61 = vpop.trf.xlu2 }
 0x2d1   :  { %v533_v62 = vmul.f32 0.35355338, %v353_v61 }
 0x2d3   :  { %v290_v59 = vpop.trf.xlu0 }
 0x2d4   :  { %v530_v60 = vmul.f32 0.35355338, %v290_v59 }
 0x2d6   :  { %3604 = vmatmul.msk.f32.gmra.mxu3 %vm545_vm14, %v530_v60 }
 0x2d8   :  { %v354_v2 = vpop.trf.xlu2 }
 0x2d9   :  { %v534_v3 = vmul.f32 0.35355338, %v354_v2 }
 0x2db   :  { %v321_v63 = vpop.trf.xlu0 }
 0x2dc   :  { %v531_v0 = vmul.f32 0.35355338, %v321_v63 }
 0x2de   :  { %3605 = vmatmul.msk.f32.vlgmr.msra.gmra.mxu2 %vm545_vm14, %v531_v0  ;;  %3607 = vmatmul.msk.f32.vlgmr.msrb.gmra.mxu3 %vm545_vm14, %v533_v62 }
 0x2df   :  { %770 = vmatpush.msra.mxu2 %v264_v50 }
 0x2e3   :  { %v322_v4 = vpop.trf.xlu0 }
 0x2e4   :  { %v532_v5 = vmul.f32 0.35355338, %v322_v4 }
 0x2e6   :  { %3606 = vmatmul.msk.f32.gmra.mxu2 %vm545_vm14, %v532_v5  ;;  %3608 = vmatmul.msk.f32.gmra.mxu3 %vm545_vm14, %v534_v3  ;;  %v417_v6 = vpop.trf.xlu1 }
 0x2e7   :  { %v537_v7 = vmul.f32 0.35355338, %v417_v6 }
 0x2eb   :  { %v385_v8 = vpop.trf.xlu0 }
 0x2ec   :  { %v535_v9 = vmul.f32 0.35355338, %v385_v8 }
 0x2ee   :  { %3609 = vmatmul.msk.f32.vlgmr.msra.gmra.mxu1 %vm545_vm14, %v535_v9  ;;  %3611 = vmatmul.msk.f32.vlgmr.msrb.gmra.mxu2 %vm545_vm14, %v537_v7  ;;  %v418_v10 = vpop.trf.xlu1 }
 0x2ef   :  { %v538_v11 = vmul.f32 0.35355338, %v418_v10 }
 0x2f3   :  { %v386_v12 = vpop.trf.xlu0 }
 0x2f4   :  { %v536_v13 = vmul.f32 0.35355338, %v386_v12 }
 0x2f6   :  { %3610 = vmatmul.msk.f32.gmra.mxu1 %vm545_vm14, %v536_v13  ;;  %3612 = vmatmul.msk.f32.gmra.mxu2 %vm545_vm14, %v538_v11 }
 0x2fb   :  { %v449_v15 = vpop.trf.xlu0 }
 0x2fc   :  { %v539_v16 = vmul.f32 0.35355338, %v449_v15 }
 0x2fe   :  { %3613 = vmatmul.msk.f32.vlgmr.msra.gmra.mxu3 %vm545_vm14, %v539_v16 }
 0x303   :  { %v450_v17 = vpop.trf.xlu0 }
 0x304   :  { %v540_v18 = vmul.f32 0.35355338, %v450_v17 }
 0x306   :  { %3614 = vmatmul.msk.f32.gmra.mxu3 %vm545_vm14, %v540_v18 }
 0x30b   :  { %v481_v20 = vpop.trf.xlu0 }
 0x30c   :  { %v541_v21 = vmul.f32 0.35355338, %v481_v20 }
 0x30e   :  { %3615 = vmatmul.msk.f32.vlgmr.msrb.gmra.mxu1 %vm545_vm14, %v541_v21 }
 0x313   :  { %v482_v22 = vpop.trf.xlu0 }
 0x314   :  { %v542_v23 = vmul.f32 0.35355338, %v482_v22 }
 0x316   :  { %3616 = vmatmul.msk.f32.gmra.mxu1 %vm545_vm14, %v542_v23 }
 0x31b   :  { %v513_v24 = vpop.trf.xlu0 }
 0x31c   :  { %v543_v25 = vmul.f32 0.35355338, %v513_v24 }
 0x31e   :  { %3617 = vmatmul.msk.f32.vlgmr.msra.gmra.mxu2 %vm545_vm14, %v543_v25 }
 0x323   :  { %v514_v26 = vpop.trf.xlu0 }
 0x324   :  { %v544_v27 = vmul.f32 0.35355338, %v514_v26 }
 0x326   :  { %3618 = vmatmul.msk.f32.gmra.mxu2 %vm545_vm14, %v544_v27 }
 0x351   :  { %v569_v28 = vpop.f32.mrf.mxu3 }
 0x352   :  { %v779_v30 = vsel %vm778_vm15, %v569_v28, -inf }
 0x353   :  { %780 = vmax.xlane.f32.xlu2 %v779_v30 }
 0x359   :  { %v572_v31 = vpop.f32.mrf.mxu3 }
 0x35a   :  { %v782_v32 = vsel %vm778_vm15, %v572_v31, -inf }
 0x35b   :  { %783 = vmax.xlane.f32.xlu0 %v782_v32 }
 0x361   :  { %v4160_v33 = vpop.f32.mrf.mxu2  ;;  %v4162_v19 = vpop.f32.mrf.mxu3 }
 0x362   :  { %v785_v34 = vsel %vm778_vm15, %v4160_v33, -inf  ;;  %v791_v39 = vsel %vm778_vm15, %v4162_v19, -inf }
 0x363   :  { %786 = vmax.xlane.f32.xlu2 %v785_v34 }
 0x369   :  { %v601_v35 = vpop.f32.mrf.mxu2  ;;  %v630_v36 = vpop.f32.mrf.mxu3 }
 0x36a   :  { %v794_v37 = vsel %vm778_vm15, %v630_v36, -inf  ;;  %v788_v29 = vsel %vm778_vm15, %v601_v35, -inf }
 0x36b   :  { %795 = vmax.xlane.f32.xlu1 %v794_v37  ;;  %789 = vmax.xlane.f32.xlu0 %v788_v29  ;;  %v4168_v38 = vpop.f32.mrf.mxu1 }
 0x36c   :  { %v797_v40 = vsel %vm778_vm15, %v4168_v38, -inf }
 0x371   :  { %v4174_v41 = vpop.f32.mrf.mxu2 }
 0x372   :  { %v803_v48 = vsel %vm778_vm15, %v4174_v41, -inf }
 0x373   :  { %792 = vmax.xlane.f32.xlu0 %v791_v39  ;;  %798 = vmax.xlane.f32.xlu1 %v797_v40  ;;  %v4176_v42 = vpop.f32.mrf.mxu1 }
 0x374   :  { %v800_v43 = vsel %vm778_vm15, %v4176_v42, -inf }
 0x379   :  { %v4180_v44 = vpop.f32.mrf.mxu2 }
 0x37a   :  { %v806_v45 = vsel %vm778_vm15, %v4180_v44, -inf }
 0x37b   :  { %801 = vmax.xlane.f32.xlu0 %v800_v43 }
 0x381   :  { %v4184_v46 = vpop.f32.mrf.mxu3 }
 0x382   :  { %v809_v57 = vsel %vm778_vm15, %v4184_v46, -inf }
 0x383   :  { %807 = vmax.xlane.f32.xlu0 %v806_v45 }
 0x389   :  { %v4186_v47 = vpop.f32.mrf.mxu3 }
 0x38a   :  { %v812_v50 = vsel %vm778_vm15, %v4186_v47, -inf }
 0x38b   :  { %804 = vmax.xlane.f32.xlu0 %v803_v48  ;;  %813 = vmax.xlane.f32.xlu2 %v812_v50  ;;  %v4192_v55 = vpop.f32.mrf.mxu1 }
 0x38c   :  { %v815_v61 = vsel %vm778_vm15, %v4192_v55, -inf }
 0x393   :  { %810 = vmax.xlane.f32.xlu2 %v809_v57  ;;  %v4196_v59 = vpop.f32.mrf.mxu1 }
 0x394   :  { %v818_v60 = vsel %vm778_vm15, %v4196_v59, -inf }
 0x395   :  { %819 = vmax.xlane.f32.xlu1 %v818_v60 }
 0x39d   :  { %816 = vmax.xlane.f32.xlu1 %v815_v61 }
 0x3a1   :  { %v4202_v62 = vpop.f32.mrf.mxu2 }
 0x3a2   :  { %v821_v63 = vsel %vm778_vm15, %v4202_v62, -inf }
 0x3a3   :  { %822 = vmax.xlane.f32.xlu0 %v821_v63 }
 0x3a9   :  { %v4206_v0 = vpop.f32.mrf.mxu2 }
 0x3aa   :  { %v824_v2 = vsel %vm778_vm15, %v4206_v0, -inf }
 0x3ab   :  { %825 = vmax.xlane.f32.xlu2 %v824_v2 }
 0x3c6   :  { %v781_v3 = vpop.xlane.xlu2 %780 }
 0x3c7   :  { %v827_v4 = vsub.f32 %v569_v28, %v781_v3 }
 0x3c9   :  { %v843_v5 = vmul.f32 1.442695, %v827_v4 }
 0x3cb   :  { %3769 = vpow2.f32 %v843_v5 }
 0x3ce   :  { %v784_v6 = vpop.xlane.xlu0 %783 }
 0x3cf   :  { %v828_v7 = vsub.f32 %v572_v31, %v784_v6 }
 0x3d1   :  { %v4210_v8 = vpop.eup %3769  ;;  %v845_v9 = vmul.f32 1.442695, %v828_v7 }
 0x3d2   :  { %v875_v10 = vsel %vm778_vm15, %v4210_v8, 0.0 }
 0x3d3   :  { %3771 = vpow2.f32 %v845_v9  ;;  %876 = vadd.xlane.f32.xlu2 %v875_v10 }
 0x3d6   :  { %v787_v13 = vpop.xlane.xlu2 %786 }
 0x3d7   :  { %v829_v20 = vsub.f32 %v4160_v33, %v787_v13 }
 0x3d9   :  { %v4214_v11 = vpop.eup %3771  ;;  %v847_v23 = vmul.f32 1.442695, %v829_v20 }
 0x3da   :  { %v878_v12 = vsel %vm778_vm15, %v4214_v11, 0.0 }
 0x3db   :  { %879 = vadd.xlane.f32.xlu1 %v878_v12 }
 0x3de   :  { %v796_v15 = vpop.xlane.xlu1 %795  ;;  %v790_v16 = vpop.xlane.xlu0 %789 }
 0x3df   :  { %v832_v17 = vsub.f32 %v630_v36, %v796_v15  ;;  %v830_v18 = vsub.f32 %v601_v35, %v790_v16 }
 0x3e1   :  { %v853_v21 = vmul.f32 1.442695, %v832_v17  ;;  %v849_v22 = vmul.f32 1.442695, %v830_v18 }
 0x3e3   :  { %3773 = vpow2.f32 %v853_v21 }
 0x3e4   :  { %3775 = vpow2.f32 %v849_v22 }
 0x3e5   :  { %3777 = vpow2.f32 %v847_v23 }
 0x3e6   :  { %v793_v24 = vpop.xlane.xlu0 %792  ;;  %v799_v25 = vpop.xlane.xlu1 %798 }
 0x3e7   :  { %v831_v26 = vsub.f32 %v4162_v19, %v793_v24  ;;  %v833_v31 = vsub.f32 %v4168_v38, %v799_v25 }
 0x3e9   :  { %v4220_v27 = vpop.eup %3773  ;;  %v851_v28 = vmul.f32 1.442695, %v831_v26  ;;  %v855_v34 = vmul.f32 1.442695, %v833_v31 }
 0x3ea   :  { %v4222_v30 = vpop.eup %3775  ;;  %v890_v32 = vsel %vm778_vm15, %v4220_v27, 0.0 }
 0x3eb   :  { %891 = vadd.xlane.f32.xlu0 %v890_v32  ;;  %v884_v33 = vsel %vm778_vm15, %v4222_v30, 0.0  ;;  %3779 = vpow2.f32 %v851_v28  ;;  %v4229_v19 = vpop.eup %3777 }
 0x3ec   :  { %885 = vadd.xlane.f32.xlu1 %v884_v33  ;;  %3781 = vpow2.f32 %v855_v34  ;;  %v881_v38 = vsel %vm778_vm15, %v4229_v19, 0.0 }
 0x3ee   :  { %v802_v35 = vpop.xlane.xlu0 %801 }
 0x3ef   :  { %v834_v36 = vsub.f32 %v4176_v42, %v802_v35 }
 0x3f1   :  { %v857_v37 = vmul.f32 1.442695, %v834_v36  ;;  %v4232_v29 = vpop.eup %3779 }
 0x3f2   :  { %v887_v39 = vsel %vm778_vm15, %v4232_v29, 0.0  ;;  %v4239_v45 = vpop.eup %3781 }
 0x3f3   :  { %3783 = vpow2.f32 %v857_v37  ;;  %882 = vadd.xlane.f32.xlu0 %v881_v38  ;;  %888 = vadd.xlane.f32.xlu2 %v887_v39  ;;  %v893_v57 = vsel %vm778_vm15, %v4239_v45, 0.0 }
 0x3f6   :  { %v808_v40 = vpop.xlane.xlu0 %807 }
 0x3f7   :  { %v836_v43 = vsub.f32 %v4180_v44, %v808_v40 }
 0x3f9   :  { %v4241_v48 = vpop.eup %3783  ;;  %v861_v42 = vmul.f32 1.442695, %v836_v43 }
 0x3fa   :  { %v896_v50 = vsel %vm778_vm15, %v4241_v48, 0.0 }
 0x3fb   :  { %3785 = vpow2.f32 %v861_v42  ;;  %897 = vadd.xlane.f32.xlu1 %v896_v50  ;;  %894 = vadd.xlane.f32.xlu2 %v893_v57 }
 0x3fe   :  { %v814_v60 = vpop.xlane.xlu2 %813  ;;  %v805_v61 = vpop.xlane.xlu0 %804 }
 0x3ff   :  { %v838_v63 = vsub.f32 %v4186_v47, %v814_v60  ;;  %v835_v44 = vsub.f32 %v4174_v41, %v805_v61 }
 0x401   :  { %v4249_v2 = vpop.eup %3785  ;;  %v865_v3 = vmul.f32 1.442695, %v838_v63  ;;  %v859_v4 = vmul.f32 1.442695, %v835_v44 }
 0x402   :  { %v902_v5 = vsel %vm778_vm15, %v4249_v2, 0.0 }
 0x403   :  { %3787 = vpow2.f32 %v865_v3  ;;  %903 = vadd.xlane.f32.xlu1 %v902_v5 }
 0x404   :  { %3789 = vpow2.f32 %v859_v4 }
 0x406   :  { %v811_v6 = vpop.xlane.xlu2 %810 }
 0x407   :  { %v837_v7 = vsub.f32 %v4184_v46, %v811_v6 }
 0x408   :  { %v820_v9 = vpop.xlane.xlu1 %819 }
 0x409   :  { %v4254_v10 = vpop.eup %3787  ;;  %v863_v12 = vmul.f32 1.442695, %v837_v7  ;;  %v840_v47 = vsub.f32 %v4196_v59, %v820_v9 }
 0x40a   :  { %v4257_v41 = vpop.eup %3789  ;;  %v908_v13 = vsel %vm778_vm15, %v4254_v10, 0.0 }
 0x40b   :  { %3791 = vpow2.f32 %v863_v12  ;;  %v869_v15 = vmul.f32 1.442695, %v840_v47  ;;  %909 = vadd.xlane.f32.xlu0 %v908_v13  ;;  %v899_v16 = vsel %vm778_vm15, %v4257_v41, 0.0 }
 0x40c   :  { %900 = vadd.xlane.f32.xlu1 %v899_v16 }
 0x40d   :  { %3793 = vpow2.f32 %v869_v15 }
 0x410   :  { %v817_v46 = vpop.xlane.xlu1 %816 }
 0x411   :  { %v4263_v17 = vpop.eup %3791  ;;  %v839_v18 = vsub.f32 %v4192_v55, %v817_v46 }
 0x412   :  { %v905_v59 = vsel %vm778_vm15, %v4263_v17, 0.0 }
 0x413   :  { %v4268_v20 = vpop.eup %3793  ;;  %v867_v21 = vmul.f32 1.442695, %v839_v18  ;;  %906 = vadd.xlane.f32.xlu0 %v905_v59 }
 0x414   :  { %v914_v22 = vsel %vm778_vm15, %v4268_v20, 0.0 }
 0x415   :  { %3795 = vpow2.f32 %v867_v21  ;;  %915 = vadd.xlane.f32.xlu2 %v914_v22 }
 0x416   :  { %v823_v23 = vpop.xlane.xlu0 %822 }
 0x417   :  { %v841_v24 = vsub.f32 %v4202_v62, %v823_v23 }
 0x419   :  { %v871_v25 = vmul.f32 1.442695, %v841_v24 }
 0x41b   :  { %v4273_v26 = vpop.eup %3795  ;;  %3797 = vpow2.f32 %v871_v25 }
 0x41c   :  { %v911_v55 = vsel %vm778_vm15, %v4273_v26, 0.0 }
 0x41d   :  { %912 = vadd.xlane.f32.xlu2 %v911_v55 }
 0x41e   :  { %v826_v28 = vpop.xlane.xlu2 %825 }
 0x41f   :  { %v842_v31 = vsub.f32 %v4206_v0, %v826_v28 }
 0x421   :  { %v4278_v32 = vpop.eup %3797  ;;  %v873_v33 = vmul.f32 1.442695, %v842_v31 }
 0x422   :  { %v917_v34 = vsel %vm778_vm15, %v4278_v32, 0.0 }
 0x423   :  { %3799 = vpow2.f32 %v873_v33  ;;  %918 = vadd.xlane.f32.xlu1 %v917_v34 }
 0x429   :  { %v4282_v62 = vpop.eup %3799 }
 0x42a   :  { %v920_v35 = vsel %vm778_vm15, %v4282_v62, 0.0 }
 0x42b   :  { %921 = vadd.xlane.f32.xlu0 %v920_v35 }
 0x446   :  { %v877_v36 = vpop.xlane.xlu2 %876 }
 0x447   :  { %3801 = vrcp.f32 %v877_v36  ;;  %v934_v44 = vand.u32 2147483648, %v877_v36  ;;  %vm928_vm4 = vweird.f32 %v877_v36  ;;  %v932_v4 = vand.u32 2147483647, %v877_v36 }
 0x449   :  { %v935_v13 = vor.u32 1.1754944e-38, %v934_v44  ;;  %vm933_vm8 = vcmp.eq.f32.partialorder %v932_v4, 8.507059e+37 }
 0x44d   :  { %v3802_v37 = vpop.eup %3801 }
 0x44e   :  { %v880_v38 = vpop.xlane.xlu1 %879  ;;  %v924_v39 = vmul.f32 %v3802_v37, %v877_v36  ;;  %vm929_vm2 = vweird.f32 %v3802_v37 }
 0x44f   :  { %3803 = vrcp.f32 %v880_v38  ;;  %v949_v57 = vand.u32 2147483648, %v880_v38  ;;  %v947_v61 = vand.u32 2147483647, %v880_v38  ;;  %vm943_vm3 = vweird.f32 %v880_v38  ;;  %vm930_vm6 = vmor %vm928_vm4, %vm929_vm2 }
 0x450   :  { %v925_v0 = vsub.f32 1.0, %v924_v39 }
 0x451   :  { %v950_v5 = vor.u32 1.1754944e-38, %v949_v57  ;;  %vm948_vm7 = vcmp.eq.f32.partialorder %v947_v61, 8.507059e+37 }
 0x452   :  { %v926_v42 = vmul.f32 %v3802_v37, %v925_v0 }
 0x454   :  { %v927_v63 = vadd.f32 %v3802_v37, %v926_v42 }
 0x455   :  { %v3804_v40 = vpop.eup %3803 }
 0x456   :  { %v939_v43 = vmul.f32 %v3804_v40, %v880_v38  ;;  %vm944_vm1 = vweird.f32 %v3804_v40  ;;  %v931_v47 = vsel %vm930_vm6, %v3802_v37, %v927_v63 }
 0x457   :  { %vm945_vm5 = vmor %vm943_vm3, %vm944_vm1  ;;  %v936_v16 = vsel %vm933_vm8, %v935_v13, %v931_v47 }
 0x458   :  { %v940_v50 = vsub.f32 1.0, %v939_v43  ;;  %v937_v18 = vmul.f32 %v4210_v8, %v936_v16 }
 0x45a   :  { %v941_v60 = vmul.f32 %v3804_v40, %v940_v50 }
 0x45c   :  { %v942_v3 = vadd.f32 %v3804_v40, %v941_v60 }
 0x45e   :  { %v946_v6 = vsel %vm945_vm5, %v3804_v40, %v942_v3  ;;  %v892_v7 = vpop.xlane.xlu0 %891 }
 0x45f   :  { %v951_v9 = vsel %vm948_vm7, %v950_v5, %v946_v6  ;;  %v886_v12 = vpop.xlane.xlu1 %885  ;;  %3805 = vrcp.f32 %v892_v7  ;;  %v1009_v55 = vand.u32 2147483648, %v892_v7  ;;  %v1007_v31 = vand.u32 2147483647, %v892_v7 }
 0x460   :  { %3807 = vrcp.f32 %v886_v12  ;;  %v952_v15 = vmul.f32 %v4214_v11, %v951_v9  ;;  %v979_v33 = vand.u32 2147483648, %v886_v12  ;;  %v977_v34 = vand.u32 2147483647, %v886_v12 }
 0x461   :  { %vm1003_vm11 = vweird.f32 %v892_v7  ;;  %vm973_vm12 = vweird.f32 %v886_v12  ;;  %v1010_v38 = vor.u32 1.1754944e-38, %v1009_v55  ;;  %vm1008_vm2 = vcmp.eq.f32.partialorder %v1007_v31, 8.507059e+37 }
 0x462   :  { %3619 = vmatpush.xpose.msk.msrb.mxu3 %vm778_vm15, %v952_v15  ;;  %v980_v50 = vor.u32 1.1754944e-38, %v979_v33  ;;  %vm978_vm3 = vcmp.eq.f32.partialorder %v977_v34, 8.507059e+37 }
 0x465   :  { %v3806_v46 = vpop.eup %3805 }
 0x466   :  { %v3808_v59 = vpop.eup %3807  ;;  %v999_v21 = vmul.f32 %v3806_v46, %v892_v7  ;;  %v4289_v22 = vpop.xlane.xlu0 %882  ;;  %3620 = vmatpush.xpose.msk.msrb.mxu3 %vm778_vm15, %v937_v18  ;;  %vm1004_vm9 = vweird.f32 %v3806_v46 }
 0x467   :  { %v969_v23 = vmul.f32 %v3808_v59, %v886_v12  ;;  %v4292_v24 = vpop.xlane.xlu2 %888  ;;  %3809 = vrcp.f32 %v4289_v22  ;;  %vm974_vm10 = vweird.f32 %v3808_v59  ;;  %vm1005_vm13 = vmor %vm1003_vm11, %vm1004_vm9  ;;  %v964_v6 = vand.u32 2147483648, %v4289_v22 }
 0x468   :  { %v1000_v25 = vsub.f32 1.0, %v999_v21  ;;  %3811 = vrcp.f32 %v4292_v24  ;;  %vm4298_vm1 = vmor %vm973_vm12, %vm974_vm10  ;;  %v994_v12 = vand.u32 2147483648, %v4292_v24  ;;  %v962_v47 = vand.u32 2147483647, %v4289_v22 }
 0x469   :  { %v970_v11 = vsub.f32 1.0, %v969_v23  ;;  %3621 = vmatmul.msk.f32.vlgmr.msrb.gmra.mxu3 %vm778_vm15, %v4126_v49  ;;  %v992_v13 = vand.u32 2147483647, %v4292_v24  ;;  %vm958_vm6 = vweird.f32 %v4289_v22  ;;  %vm988_vm8 = vweird.f32 %v4292_v24 }
 0x46a   :  { %v1001_v28 = vmul.f32 %v3806_v46, %v1000_v25  ;;  %v995_v21 = vor.u32 1.1754944e-38, %v994_v12  ;;  %vm963_vm10 = vcmp.eq.f32.partialorder %v962_v47, 8.507059e+37 }
 0x46b   :  { %v971_v8 = vmul.f32 %v3808_v59, %v970_v11  ;;  %vm993_vm11 = vcmp.eq.f32.partialorder %v992_v13, 8.507059e+37 }
 0x46c   :  { %v1002_v35 = vadd.f32 %v3806_v46, %v1001_v28 }
 0x46d   :  { %v3810_v36 = vpop.eup %3809  ;;  %v972_v37 = vadd.f32 %v3808_v59, %v971_v8 }
 0x46e   :  { %v3812_v39 = vpop.eup %3811  ;;  %v1006_v40 = vsel %vm1005_vm13, %v3806_v46, %v1002_v35  ;;  %v954_v49 = vmul.f32 %v3810_v36, %v4289_v22  ;;  %v4303_v43 = vpop.xlane.xlu1 %897  ;;  %vm959_vm4 = vweird.f32 %v3810_v36 }
 0x46f   :  { %v976_v42 = vsel %vm4298_vm1, %v3808_v59, %v972_v37  ;;  %v1011_v57 = vsel %vm1008_vm2, %v1010_v38, %v1006_v40  ;;  %v984_v60 = vmul.f32 %v3812_v39, %v4292_v24  ;;  %v4308_v61 = vpop.xlane.xlu2 %894  ;;  %vm989_vm5 = vweird.f32 %v3812_v39  ;;  %vm960_vm7 = vmor %vm958_vm6, %vm959_vm4 }
 0x470   :  { %v955_v63 = vsub.f32 1.0, %v954_v49  ;;  %3813 = vrcp.f32 %v4308_v61  ;;  %v981_v3 = vsel %vm978_vm3, %v980_v50, %v976_v42  ;;  %v1012_v4 = vmul.f32 %v4220_v27, %v1011_v57  ;;  %vm990_vm9 = vmor %vm988_vm8, %vm989_vm5 }
 0x471   :  { %v985_v44 = vsub.f32 1.0, %v984_v60  ;;  %3815 = vrcp.f32 %v4303_v43  ;;  %v982_v7 = vmul.f32 %v4222_v30, %v981_v3  ;;  %v965_v30 = vor.u32 1.1754944e-38, %v964_v6 }
 0x472   :  { %v956_v5 = vmul.f32 %v3810_v36, %v955_v63  ;;  %3625 = vmatpush.xpose.msk.msra.mxu3 %vm778_vm15, %v1012_v4  ;;  %v1039_v35 = vand.u32 2147483648, %v4303_v43  ;;  %v1024_v37 = vand.u32 2147483648, %v4308_v61  ;;  %v1037_v38 = vand.u32 2147483647, %v4303_v43 }
 0x473   :  { %v986_v9 = vmul.f32 %v3812_v39, %v985_v44  ;;  %3622 = vmatpush.xpose.msk.msra.mxu1 %vm778_vm15, %v982_v7  ;;  %vm1033_vm1 = vweird.f32 %v4303_v43  ;;  %v1022_v49 = vand.u32 2147483647, %v4308_v61  ;;  %vm1018_vm2 = vweird.f32 %v4308_v61 }
 0x474   :  { %v957_v15 = vadd.f32 %v3810_v36, %v956_v5  ;;  %v1025_v50 = vor.u32 1.1754944e-38, %v1024_v37  ;;  %vm1038_vm4 = vcmp.eq.f32.partialorder %v1037_v38, 8.507059e+37 }
 0x475   :  { %v987_v27 = vadd.f32 %v3812_v39, %v986_v9 }
 0x476   :  { %v3814_v16 = vpop.eup %3813  ;;  %v4322_v46 = vpop.xlane.xlu1 %903  ;;  %v961_v18 = vsel %vm960_vm7, %v3810_v36, %v957_v15  ;;  %vm1023_vm7 = vcmp.eq.f32.partialorder %v1022_v49, 8.507059e+37 }
 0x477   :  { %v3816_v59 = vpop.eup %3815  ;;  %v1014_v23 = vmul.f32 %v3814_v16, %v4308_v61  ;;  %3817 = vrcp.f32 %v4322_v46  ;;  %v966_v25 = vsel %vm963_vm10, %v965_v30, %v961_v18  ;;  %v991_v11 = vsel %vm990_vm9, %v3812_v39, %v987_v27 }
 0x478   :  { %v1029_v22 = vmul.f32 %v3816_v59, %v4303_v43  ;;  %v967_v24 = vmul.f32 %v4229_v19, %v966_v25  ;;  %v996_v28 = vsel %vm993_vm11, %v995_v21, %v991_v11  ;;  %vm1034_vm12 = vweird.f32 %v3816_v59 }
 0x479   :  { %v1015_v55 = vsub.f32 1.0, %v1014_v23  ;;  %v997_v8 = vmul.f32 %v4232_v29, %v996_v28  ;;  %vm1019_vm13 = vweird.f32 %v3814_v16  ;;  %vm1035_vm3 = vmor %vm1033_vm1, %vm1034_vm12  ;;  %v1069_v57 = vand.u32 2147483648, %v4322_v46 }
 0x47a   :  { %v1030_v31 = vsub.f32 1.0, %v1029_v22  ;;  %3623 = vmatpush.xpose.msk.msra.mxu1 %vm778_vm15, %v967_v24  ;;  %vm1020_vm5 = vmor %vm1018_vm2, %vm1019_vm13  ;;  %v1067_v44 = vand.u32 2147483647, %v4322_v46  ;;  %vm1063_vm8 = vweird.f32 %v4322_v46 }
 0x47b   :  { %v1016_v33 = vmul.f32 %v3814_v16, %v1015_v55  ;;  %3626 = vmatpush.xpose.msk.msra.mxu3 %vm778_vm15, %v997_v8  ;;  %v1070_v9 = vor.u32 1.1754944e-38, %v1069_v57 }
 0x47c   :  { %v1031_v34 = vmul.f32 %v3816_v59, %v1030_v31  ;;  %vm1068_vm10 = vcmp.eq.f32.partialorder %v1067_v44, 8.507059e+37 }
 0x47d   :  { %v3818_v36 = vpop.eup %3817  ;;  %3624 = vmatmul.msk.f32.vlgmr.msra.gmra.mxu1 %vm778_vm15, %v4128_v51  ;;  %v1017_v0 = vadd.f32 %v3814_v16, %v1016_v33  ;;  %v1040_v51 = vor.u32 1.1754944e-38, %v1039_v35 }
 0x47e   :  { %v1059_v19 = vmul.f32 %v3818_v36, %v4322_v46  ;;  %v4337_v29 = vpop.xlane.xlu0 %909  ;;  %v1032_v39 = vadd.f32 %v3816_v59, %v1031_v34  ;;  %3627 = vmatmul.msk.f32.vlgmr.msra.gmra.mxu3 %vm778_vm15, %v4132_v53  ;;  %vm1064_vm6 = vweird.f32 %v3818_v36 }
 0x47f   :  { %v4341_v40 = vpop.xlane.xlu1 %900  ;;  %3819 = vrcp.f32 %v4337_v29  ;;  %v1021_v63 = vsel %vm1020_vm5, %v3814_v16, %v1017_v0  ;;  %vm1065_vm9 = vmor %vm1063_vm8, %vm1064_vm6  ;;  %v1099_v46 = vand.u32 2147483648, %v4337_v29  ;;  %v1097_v21 = vand.u32 2147483647, %v4337_v29 }
 0x480   :  { %v1060_v42 = vsub.f32 1.0, %v1059_v19  ;;  %3821 = vrcp.f32 %v4341_v40  ;;  %v1036_v53 = vsel %vm1035_vm3, %v3816_v59, %v1032_v39  ;;  %v1026_v4 = vsel %vm1023_vm7, %v1025_v50, %v1021_v63 }
 0x481   :  { %v1041_v43 = vsel %vm1038_vm4, %v1040_v51, %v1036_v53  ;;  %v1054_v18 = vand.u32 2147483648, %v4341_v40  ;;  %v1052_v23 = vand.u32 2147483647, %v4341_v40  ;;  %vm1093_vm13 = vweird.f32 %v4337_v29 }
 0x482   :  { %v1061_v60 = vmul.f32 %v3818_v36, %v1060_v42  ;;  %v1042_v61 = vmul.f32 %v4241_v48, %v1041_v43  ;;  %v1027_v48 = vmul.f32 %v4239_v45, %v1026_v4  ;;  %vm1048_vm1 = vweird.f32 %v4341_v40 }
 0x483   :  { %v1100_v24 = vor.u32 1.1754944e-38, %v1099_v46  ;;  %v1055_v28 = vor.u32 1.1754944e-38, %v1054_v18  ;;  %vm1098_vm4 = vcmp.eq.f32.partialorder %v1097_v21, 8.507059e+37  ;;  %vm1053_vm5 = vcmp.eq.f32.partialorder %v1052_v23, 8.507059e+37 }
 0x484   :  { %v1062_v3 = vadd.f32 %v3818_v36, %v1061_v60  ;;  %3628 = vmatpush.xpose.msk.msrb.mxu0 %vm778_vm15, %v1042_v61 }
 0x485   :  { %v3820_v5 = vpop.eup %3819 }
 0x486   :  { %v3822_v6 = vpop.eup %3821  ;;  %v1066_v7 = vsel %vm1065_vm9, %v3818_v36, %v1062_v3  ;;  %v1089_v12 = vmul.f32 %v3820_v5, %v4337_v29  ;;  %v4356_v47 = vpop.xlane.xlu0 %906  ;;  %vm1094_vm11 = vweird.f32 %v3820_v5 }
 0x487   :  { %v1044_v13 = vmul.f32 %v3822_v6, %v4341_v40  ;;  %3823 = vrcp.f32 %v4356_v47  ;;  %v1071_v15 = vsel %vm1068_vm10, %v1070_v9, %v1066_v7  ;;  %vm1049_vm12 = vweird.f32 %v3822_v6  ;;  %vm1095_vm2 = vmor %vm1093_vm13, %vm1094_vm11 }
 0x488   :  { %v1090_v27 = vsub.f32 1.0, %v1089_v12  ;;  %v4361_v16 = vpop.xlane.xlu2 %915  ;;  %3629 = vmatpush.xpose.msk.msrb.mxu0 %vm778_vm15, %v1027_v48  ;;  %v1072_v22 = vmul.f32 %v4249_v2, %v1071_v15  ;;  %vm1050_vm3 = vmor %vm1048_vm1, %vm1049_vm12  ;;  %v1084_v38 = vand.u32 2147483648, %v4356_v47  ;;  %vm1078_vm7 = vweird.f32 %v4356_v47 }
 0x489   :  { %v1045_v30 = vsub.f32 1.0, %v1044_v13  ;;  %3825 = vrcp.f32 %v4361_v16  ;;  %v1082_v40 = vand.u32 2147483647, %v4356_v47  ;;  %v1129_v49 = vand.u32 2147483648, %v4361_v16 }
 0x48a   :  { %v1091_v59 = vmul.f32 %v3820_v5, %v1090_v27  ;;  %3631 = vmatpush.xpose.msk.msrb.mxu1 %vm778_vm15, %v1072_v22  ;;  %v1127_v50 = vand.u32 2147483647, %v4361_v16  ;;  %vm1123_vm10 = vweird.f32 %v4361_v16 }
 0x48b   :  { %v1046_v45 = vmul.f32 %v3822_v6, %v1045_v30  ;;  %3630 = vmatmul.msk.f32.vlgmr.msrb.gmra.mxu0 %vm778_vm15, %v4136_v56  ;;  %vm1083_vm11 = vcmp.eq.f32.partialorder %v1082_v40, 8.507059e+37  ;;  %v1130_v63 = vor.u32 1.1754944e-38, %v1129_v49 }
 0x48c   :  { %v1092_v25 = vadd.f32 %v3820_v5, %v1091_v59  ;;  %vm1128_vm13 = vcmp.eq.f32.partialorder %v1127_v50, 8.507059e+37 }
 0x48d   :  { %v3824_v11 = vpop.eup %3823  ;;  %v1047_v55 = vadd.f32 %v3822_v6, %v1046_v45 }
 0x48e   :  { %v1096_v31 = vsel %vm1095_vm2, %v3820_v5, %v1092_v25  ;;  %v1074_v2 = vmul.f32 %v3824_v11, %v4356_v47  ;;  %vm1079_vm6 = vweird.f32 %v3824_v11 }
 0x48f   :  { %v3826_v8 = vpop.eup %3825  ;;  %v1101_v33 = vsel %vm1098_vm4, %v1100_v24, %v1096_v31  ;;  %v1051_v34 = vsel %vm1050_vm3, %v3822_v6, %v1047_v55  ;;  %vm4387_vm9 = vmor %vm1078_vm7, %vm1079_vm6 }
 0x490   :  { %v1075_v35 = vsub.f32 1.0, %v1074_v2  ;;  %v1119_v56 = vmul.f32 %v3826_v8, %v4361_v16  ;;  %v913_v36 = vpop.xlane.xlu2 %912  ;;  %v1056_v37 = vsel %vm1053_vm5, %v1055_v28, %v1051_v34  ;;  %v1102_v0 = vmul.f32 %v4254_v10, %v1101_v33 }
 0x491   :  { %3827 = vrcp.f32 %v913_v36  ;;  %v1057_v39 = vmul.f32 %v4257_v41, %v1056_v37  ;;  %vm1124_vm8 = vweird.f32 %v3826_v8  ;;  %v1085_v10 = vor.u32 1.1754944e-38, %v1084_v38  ;;  %v1459_v38 = vld [vmem:[%s5099_s4] sm:$0xff] }
 0x492   :  { %v1076_v19 = vmul.f32 %v3824_v11, %v1075_v35  ;;  %v1120_v29 = vsub.f32 1.0, %v1119_v56  ;;  %3634 = vmatpush.xpose.msk.msrb.mxu2 %vm778_vm15, %v1102_v0  ;;  %vm1125_vm12 = vmor %vm1123_vm10, %vm1124_vm8  ;;  %v1114_v9 = vand.u32 2147483648, %v913_v36  ;;  %v1112_v47 = vand.u32 2147483647, %v913_v36  ;;  %v3945_v41 = vld [vmem:[%s5095_s0] sm:$0xff] }
 0x493   :  { %3632 = vmatpush.xpose.msk.msrb.mxu1 %vm778_vm15, %v1057_v39  ;;  %vm1108_vm2 = vweird.f32 %v913_v36 }
 0x494   :  { %v1077_v42 = vadd.f32 %v3824_v11, %v1076_v19  ;;  %v1121_v51 = vmul.f32 %v3826_v8, %v1120_v29  ;;  %vm1113_vm4 = vcmp.eq.f32.partialorder %v1112_v47, 8.507059e+37 }
 0x496   :  { %v1122_v57 = vadd.f32 %v3826_v8, %v1121_v51  ;;  %v919_v53 = vpop.xlane.xlu1 %918  ;;  %v1081_v60 = vsel %vm4387_vm9, %v3824_v11, %v1077_v42  ;;  %3633 = vmatmul.msk.f32.vlgmr.msrb.gmra.mxu1 %vm778_vm15, %v4130_v52  ;;  %v3745_v51 = vld [vmem:[%s5100_s5] ss:$0 sm:$0xff] }
 0x497   :  { %v3828_v43 = vpop.eup %3827  ;;  %3829 = vrcp.f32 %v919_v53  ;;  %v1086_v3 = vsel %vm1083_vm11, %v1085_v10, %v1081_v60  ;;  %vm1138_vm7 = vweird.f32 %v919_v53  ;;  %v1144_v25 = vand.u32 2147483648, %v919_v53 }
 0x498   :  { %v1126_v44 = vsel %vm1125_vm12, %v3826_v8, %v1122_v57  ;;  %v1104_v61 = vmul.f32 %v3828_v43, %v913_v36  ;;  %v1087_v5 = vmul.f32 %v4263_v17, %v1086_v3  ;;  %vm1109_vm1 = vweird.f32 %v3828_v43 }
 0x499   :  { %v1131_v4 = vsel %vm1128_vm13, %v1130_v63, %v1126_v44  ;;  %vm1110_vm3 = vmor %vm1108_vm2, %vm1109_vm1  ;;  %v1115_v17 = vor.u32 1.1754944e-38, %v1114_v9  ;;  %v1142_v11 = vand.u32 2147483647, %v919_v53  ;;  %v1145_v31 = vor.u32 1.1754944e-38, %v1144_v25 }
 0x49a   :  { %v1105_v6 = vsub.f32 1.0, %v1104_v61  ;;  %v1132_v7 = vmul.f32 %v4268_v20, %v1131_v4  ;;  %3635 = vmatpush.xpose.msk.msrb.mxu2 %vm778_vm15, %v1087_v5  ;;  %v3947_v4 = vld [vmem:[%s5095_s0 + $0x10] sm:$0xff] }
 0x49b   :  { %vm1143_vm12 = vcmp.eq.f32.partialorder %v1142_v11, 8.507059e+37 }
 0x49c   :  { %v1106_v12 = vmul.f32 %v3828_v43, %v1105_v6  ;;  %3637 = vmatpush.xpose.msk.msrb.mxu3 %vm778_vm15, %v1132_v7 }
 0x49d   :  { %v3830_v52 = vpop.eup %3829  ;;  %3636 = vmatmul.msk.f32.vlgmr.msrb.gmra.mxu2 %vm778_vm15, %v4134_v54 }
 0x49e   :  { %v1107_v13 = vadd.f32 %v3828_v43, %v1106_v12  ;;  %v1134_v48 = vmul.f32 %v3830_v52, %v919_v53  ;;  %v922_v15 = vpop.xlane.xlu0 %921  ;;  %vm1139_vm5 = vweird.f32 %v3830_v52  ;;  %v3948_v12 = vld [vmem:[%s5095_s0 + $0x18] sm:$0xff] }
 0x49f   :  { %3831 = vrcp.f32 %v922_v15  ;;  %v1159_v54 = vand.u32 2147483648, %v922_v15  ;;  %v1157_v22 = vand.u32 2147483647, %v922_v15  ;;  %vm1140_vm8 = vmor %vm1138_vm7, %vm1139_vm5  ;;  %vm1153_vm9 = vweird.f32 %v922_v15 }
 0x4a0   :  { %v1111_v20 = vsel %vm1110_vm3, %v3828_v43, %v1107_v13  ;;  %v1135_v16 = vsub.f32 1.0, %v1134_v48  ;;  %v3946_v43 = vld [vmem:[%s5095_s0 + $0x8] sm:$0xff]  ;;  %s3978_s0 = smov 8  }
 0x4a1   :  { %v1116_v27 = vsel %vm1113_vm4, %v1115_v17, %v1111_v20  ;;  %v1160_v55 = vor.u32 1.1754944e-38, %v1159_v54  ;;  %vm1158_vm11 = vcmp.eq.f32.partialorder %v1157_v22, 8.507059e+37 }
 0x4a2   :  { %v1117_v30 = vmul.f32 %v4273_v26, %v1116_v27  ;;  %v1136_v18 = vmul.f32 %v3830_v52, %v1135_v16 }
 0x4a4   :  { %3638 = vmatpush.xpose.msk.msrb.mxu3 %vm778_vm15, %v1117_v30  ;;  %v1137_v45 = vadd.f32 %v3830_v52, %v1136_v18 }
 0x4a5   :  { %v3832_v46 = vpop.eup %3831 }
 0x4a6   :  { %v1149_v59 = vmul.f32 %v3832_v46, %v922_v15  ;;  %vm1154_vm6 = vweird.f32 %v3832_v46  ;;  %v1141_v28 = vsel %vm1140_vm8, %v3830_v52, %v1137_v45 }
 0x4a7   :  { %3639 = vmatmul.msk.f32.vlgmr.msrb.gmra.mxu3 %vm778_vm15, %v4139_v58  ;;  %vm1155_vm10 = vmor %vm1153_vm9, %vm1154_vm6  ;;  %v1146_v8 = vsel %vm1143_vm12, %v1145_v31, %v1141_v28  ;;  %v1623_v28 = vld [vmem:[%s5103_s8 + $0x18] sm:$0xff]  ;;  %v1622_v31 = vld [vmem:[%s5103_s8 + $0x10] sm:$0xff] }
 0x4a8   :  { %v1150_v21 = vsub.f32 1.0, %v1149_v59  ;;  %v1147_v33 = vmul.f32 %v4278_v32, %v1146_v8  ;;  %v1461_v32 = vld [vmem:[%s5099_s4 + $0x10] sm:$0xff]  ;;  %1652 = vmatpush.msra.mxu3 %v1623_v28 }
 0x4aa   :  { %v1151_v23 = vmul.f32 %v3832_v46, %v1150_v21  ;;  %1653 = vmatpush.msra.mxu3 %v1622_v31 }
 0x4ac   :  { %v1152_v26 = vadd.f32 %v3832_v46, %v1151_v23 }
 0x4ae   :  { %v1156_v24 = vsel %vm1155_vm10, %v3832_v46, %v1152_v26 }
 0x4af   :  { %v1161_v58 = vsel %vm1158_vm11, %v1160_v55, %v1156_v24 }
 0x4b0   :  { %v1162_v2 = vmul.f32 %v4282_v62, %v1161_v58  ;;  %v1462_v62 = vld [vmem:[%s5099_s4 + $0x18] sm:$0xff]  ;;  %v1621_v58 = vld [vmem:[%s5103_s8 + $0x8] sm:$0xff] }
 0x4b1   :  { %1487 = vmatpush.msra.mxu1 %v1462_v62  ;;  %1654 = vmatpush.msra.mxu3 %v1621_v58 }
 0x4b2   :  { %3640 = vmatpush.xpose.msk.msra.mxu0 %vm778_vm15, %v1162_v2  ;;  %v1620_v2 = vld [vmem:[%s5103_s8] sm:$0xff] }
 0x4b3   :  { %1488 = vmatpush.msra.mxu1 %v1461_v32  ;;  %1655 = vmatpush.msra.mxu3 %v1620_v2 }
 0x4b6   :  { %3641 = vmatpush.xpose.msk.msra.mxu0 %vm778_vm15, %v1147_v33 }
 0x4b9   :  { %3642 = vmatmul.msk.f32.vlgmr.msra.gmra.mxu0 %vm778_vm15, %v4142_v1  ;;  %v1460_v1 = vld [vmem:[%s5099_s4 + $0x8] sm:$0xff] }
 0x4ba   :  { %1489 = vmatpush.msra.mxu1 %v1460_v1 }
 0x4bc   :  { %1490 = vmatpush.msra.mxu1 %v1459_v38 }
 0x4ec   :  { %v1189_v34 = vpop.f32.mrf.mxu3 }
 0x4ed   :  { %1395 = vxpose.xlu2.b32.start [1/4] (short) (narrow) %v1189_v34, 16 }
 0x4fa   :  { %v1218_v35 = vpop.f32.mrf.mxu1 }
 0x4fb   :  { %1396 = vxpose.xlu2.b32.cont [2/4] (short) (narrow) %v1218_v35, 16 }
 0x501   :  { %v1247_v56 = vpop.f32.mrf.mxu3 }
 0x503   :  { %1397 = vxpose.xlu2.b32.cont [3/4] (short) (narrow) %v1247_v56, 16 }
 0x508   :  { %v1276_v36 = vpop.f32.mrf.mxu0 }
 0x50b   :  { %1398 = vxpose.xlu2.b32.end [4/4] (short) (narrow) %v1276_v36, 16 }
 0x513   :  { %v1305_v37 = vpop.f32.mrf.mxu1 }
 0x514   :  { %1427 = vxpose.xlu0.b32.start [1/4] (short) (narrow) %v1305_v37, 16 }
 0x520   :  { %v1334_v19 = vpop.f32.mrf.mxu2 }
 0x521   :  { %1428 = vxpose.xlu0.b32.cont [2/4] (short) (narrow) %v1334_v19, 16 }
 0x52a   :  { %v1363_v29 = vpop.f32.mrf.mxu3 }
 0x52b   :  { %1429 = vxpose.xlu0.b32.cont [3/4] (short) (narrow) %v1363_v29, 16 }
 0x536   :  { %v1392_v39 = vpop.f32.mrf.mxu0 }
 0x537   :  { %1430 = vxpose.xlu0.b32.end [4/4] (short) (narrow) %v1392_v39, 16 }
 0x58c   :  { %v1411_v0 = vpop.trf.xlu2 }
 0x58d   :  { %3643 = vmatmul.msk.f32.vlgmr.msra.gmra.mxu1 %vm54_vm0, %v1411_v0  ;;  %v3746_v0 = vld [vmem:[%s5101_s6] ss:$0 sm:$0xff] }
 0x594   :  { %v1412_v40 = vpop.trf.xlu2 }
 0x595   :  { %3644 = vmatmul.msk.f32.gmra.mxu1 %vm54_vm0, %v1412_v40 }
 0x5c3   :  { %v1443_v49 = vpop.trf.xlu0 }
 0x5c4   :  { %3645 = vmatmul.msk.f32.gmra.mxu1 %vm54_vm0, %v1443_v49 }
 0x5cb   :  { %v1444_v42 = vpop.trf.xlu0 }
 0x5cc   :  { %3646 = vmatmul.msk.f32.gmra.mxu1 %vm54_vm0, %v1444_v42 }
 0x60a   :  { %v1492_v50 = vpop.f32.mrf.mxu1 }
 0x60b   :  { %v1504_v10 = vadd.f32 %v3945_v41, %v1492_v50 }
 0x60d   :  { %v4434_v57 = vadd.f32 %v3745_v51, %v1504_v10 }
 0x60f   :  { %v1518_v53 = vsel %vm54_vm0, %v4434_v57, 0.0 }
 0x610   :  { %1519 = vadd.xlane.f32.xlu1 %v1518_v53 }
 0x612   :  { %v1495_v60 = vpop.f32.mrf.mxu1 }
 0x613   :  { %v1505_v63 = vadd.f32 %v3946_v43, %v1495_v60 }
 0x615   :  { %v4441_v44 = vadd.f32 %v3745_v51, %v1505_v63 }
 0x617   :  { %v1521_v61 = vsel %vm54_vm0, %v4441_v44, 0.0 }
 0x618   :  { %1522 = vadd.xlane.f32.xlu1 %v1521_v61 }
 0x641   :  { %v1498_v3 = vpop.f32.mrf.mxu1 }
 0x642   :  { %v1506_v5 = vadd.f32 %v3947_v4, %v1498_v3 }
 0x644   :  { %v4448_v6 = vadd.f32 %v3745_v51, %v1506_v5 }
 0x646   :  { %v1524_v7 = vsel %vm54_vm0, %v4448_v6, 0.0 }
 0x647   :  { %1525 = vadd.xlane.f32.xlu1 %v1524_v7 }
 0x649   :  { %v1501_v9 = vpop.f32.mrf.mxu1 }
 0x64a   :  { %v1507_v47 = vadd.f32 %v3948_v12, %v1501_v9  ;;  %v1720_v9 = vld [vmem:[%s5105_s10 + $0x78] sm:$0xff]  ;;  %v1719_v12 = vld [vmem:[%s5105_s10 + $0x70] sm:$0xff] }
 0x64b   :  { %1721 = vmatpush.msrb.mxu3 %v1720_v9 }
 0x64c   :  { %v4455_v52 = vadd.f32 %v3745_v51, %v1507_v47  ;;  %v3747_v51 = vld [vmem:[%s5102_s7] ss:$0 sm:$0xff]  ;;  %v1718_v47 = vld [vmem:[%s5105_s10 + $0x68] sm:$0xff] }
 0x64d   :  { %1722 = vmatpush.msrb.mxu3 %v1719_v12 }
 0x64e   :  { %v1527_v13 = vsel %vm54_vm0, %v4455_v52, 0.0 }
 0x64f   :  { %1528 = vadd.xlane.f32.xlu1 %v1527_v13  ;;  %1723 = vmatpush.msrb.mxu3 %v1718_v47 }
 0x683   :  { %v1520_v48 = vpop.xlane.xlu1 %1519 }
 0x684   :  { %v1530_v15 = vmul.f32 %v1520_v48, %v4070_v14 }
 0x686   :  { %v1534_v17 = vsub.f32 %v4434_v57, %v1530_v15 }
 0x688   :  { %v1538_v20 = vmul.f32 %v1534_v17, %v1534_v17 }
 0x68a   :  { %v1542_v27 = vsel %vm54_vm0, %v1538_v20, 0.0 }
 0x68b   :  { %v1523_v16 = vpop.xlane.xlu1 %1522  ;;  %1543 = vadd.xlane.f32.xlu1 %v1542_v27 }
 0x68c   :  { %v1531_v30 = vmul.f32 %v1523_v16, %v4070_v14 }
 0x68e   :  { %v1535_v46 = vsub.f32 %v4441_v44, %v1531_v30 }
 0x690   :  { %v1539_v18 = vmul.f32 %v1535_v46, %v1535_v46 }
 0x692   :  { %v1545_v59 = vsel %vm54_vm0, %v1539_v18, 0.0 }
 0x693   :  { %1546 = vadd.xlane.f32.xlu1 %v1545_v59 }
 0x6ba   :  { %v1526_v21 = vpop.xlane.xlu1 %1525 }
 0x6bb   :  { %v1532_v54 = vmul.f32 %v1526_v21, %v4070_v14 }
 0x6bd   :  { %v4467_v45 = vsub.f32 %v4448_v6, %v1532_v54 }
 0x6bf   :  { %v1540_v23 = vmul.f32 %v4467_v45, %v4467_v45 }
 0x6c1   :  { %v1548_v22 = vsel %vm54_vm0, %v1540_v23, 0.0 }
 0x6c2   :  { %1549 = vadd.xlane.f32.xlu1 %v1548_v22  ;;  %v1529_v25 = vpop.xlane.xlu1 %1528 }
 0x6c3   :  { %v1533_v11 = vmul.f32 %v1529_v25, %v4070_v14 }
 0x6c5   :  { %v4474_v26 = vsub.f32 %v4455_v52, %v1533_v11 }
 0x6c7   :  { %v1541_v55 = vmul.f32 %v4474_v26, %v4474_v26 }
 0x6c9   :  { %v1551_v24 = vsel %vm54_vm0, %v1541_v55, 0.0 }
 0x6ca   :  { %1552 = vadd.xlane.f32.xlu1 %v1551_v24 }
 0x6fe   :  { %v1544_v8 = vpop.xlane.xlu1 %1543 }
 0x6ff   :  { %v1554_v33 = vmul.f32 %v1544_v8, %v4070_v14  ;;  %v1716_v8 = vld [vmem:[%s5105_s10 + $0x58] sm:$0xff] }
 0x701   :  { %v1558_v34 = vadd.f32 1e-05, %v1554_v33  ;;  %v1715_v33 = vld [vmem:[%s5105_s10 + $0x50] sm:$0xff] }
 0x703   :  { %3833 = vrsqrt.f32 %v1558_v34  ;;  %vm1568_vm1 = vweird.f32 %v1558_v34 }
 0x706   :  { %v1547_v35 = vpop.xlane.xlu1 %1546 }
 0x707   :  { %v1555_v56 = vmul.f32 %v1547_v35, %v4070_v14  ;;  %v1712_v35 = vld [vmem:[%s5105_s10 + $0x38] sm:$0xff] }
 0x709   :  { %v3834_v36 = vpop.eup %3833  ;;  %v1559_v37 = vadd.f32 1e-05, %v1555_v56  ;;  %v1711_v56 = vld [vmem:[%s5105_s10 + $0x30] sm:$0xff] }
 0x70a   :  { %v1563_v62 = vmul.f32 %v3834_v36, %v1558_v34  ;;  %vm1569_vm13 = vweird.f32 %v3834_v36  ;;  %v1713_v34 = vld [vmem:[%s5105_s10 + $0x40] sm:$0xff] }
 0x70b   :  { %3835 = vrsqrt.f32 %v1559_v37  ;;  %vm1570_vm2 = vmor %vm1568_vm1, %vm1569_vm13  ;;  %vm1578_vm4 = vweird.f32 %v1559_v37 }
 0x70c   :  { %v1564_v32 = vmul.f32 %v3834_v36, %v1563_v62  ;;  %v1708_v62 = vld [vmem:[%s5105_s10 + $0x18] sm:$0xff] }
 0x70e   :  { %v1565_v1 = vmul.f32 0.5, %v1564_v32  ;;  %v1707_v32 = vld [vmem:[%s5105_s10 + $0x10] sm:$0xff] }
 0x710   :  { %v1566_v38 = vsub.f32 1.5, %v1565_v1  ;;  %v1706_v1 = vld [vmem:[%s5105_s10 + $0x8] sm:$0xff] }
 0x711   :  { %v3836_v19 = vpop.eup %3835 }
 0x712   :  { %v1567_v29 = vmul.f32 %v3834_v36, %v1566_v38  ;;  %v1573_v39 = vmul.f32 %v3836_v19, %v1559_v37  ;;  %vm1579_vm3 = vweird.f32 %v3836_v19  ;;  %v1709_v37 = vld [vmem:[%s5105_s10 + $0x20] sm:$0xff] }
 0x713   :  { %vm1580_vm5 = vmor %vm1578_vm4, %vm1579_vm3  ;;  %v1705_v38 = vld [vmem:[%s5105_s10] sm:$0xff] }
 0x714   :  { %v1571_v40 = vsel %vm1570_vm2, %v3834_v36, %v1567_v29  ;;  %v1574_v49 = vmul.f32 %v3836_v19, %v1573_v39  ;;  %v1710_v36 = vld [vmem:[%s5105_s10 + $0x28] sm:$0xff] }
 0x715   :  { %v1602_v42 = vmul.f32 %v1571_v40, %v1534_v17 }
 0x716   :  { %v1575_v50 = vmul.f32 0.5, %v1574_v49 }
 0x717   :  { %v1609_v41 = vmul.f32 %v3746_v0, %v1602_v42 }
 0x718   :  { %v1576_v10 = vsub.f32 1.5, %v1575_v50 }
 0x719   :  { %v1616_v53 = vadd.f32 %v3747_v51, %v1609_v41 }
 0x71a   :  { %v1577_v60 = vmul.f32 %v3836_v19, %v1576_v10 }
 0x71b   :  { %3647 = vmatmul.msk.f32.vlgmr.msra.gmra.mxu3 %vm54_vm0, %v1616_v53 }
 0x71c   :  { %v1581_v43 = vsel %vm1580_vm5, %v3836_v19, %v1577_v60  ;;  %v3748_v19 = vld [vmem:[%s5104_s9] ss:$0 sm:$0xff] }
 0x71d   :  { %v1603_v63 = vmul.f32 %v1581_v43, %v1535_v46 }
 0x71f   :  { %v1610_v61 = vmul.f32 %v3746_v0, %v1603_v63 }
 0x721   :  { %v1617_v3 = vadd.f32 %v3747_v51, %v1610_v61 }
 0x723   :  { %3648 = vmatmul.msk.f32.gmra.mxu3 %vm54_vm0, %v1617_v3 }
 0x735   :  { %v1550_v4 = vpop.xlane.xlu1 %1549 }
 0x736   :  { %v1556_v5 = vmul.f32 %v1550_v4, %v4070_v14 }
 0x738   :  { %v1560_v7 = vadd.f32 1e-05, %v1556_v5 }
 0x73a   :  { %3837 = vrsqrt.f32 %v1560_v7  ;;  %vm1588_vm7 = vweird.f32 %v1560_v7 }
 0x73d   :  { %v1553_v13 = vpop.xlane.xlu1 %1552 }
 0x73e   :  { %v1557_v48 = vmul.f32 %v1553_v13, %v4070_v14 }
 0x740   :  { %v3838_v15 = vpop.eup %3837  ;;  %v1561_v17 = vadd.f32 1e-05, %v1557_v48 }
 0x741   :  { %v1583_v20 = vmul.f32 %v3838_v15, %v1560_v7  ;;  %vm1589_vm6 = vweird.f32 %v3838_v15 }
 0x742   :  { %3839 = vrsqrt.f32 %v1561_v17  ;;  %vm1590_vm8 = vmor %vm1588_vm7, %vm1589_vm6  ;;  %vm1598_vm10 = vweird.f32 %v1561_v17 }
 0x743   :  { %v1584_v27 = vmul.f32 %v3838_v15, %v1583_v20 }
 0x745   :  { %v1585_v16 = vmul.f32 0.5, %v1584_v27 }
 0x747   :  { %v1586_v30 = vsub.f32 1.5, %v1585_v16 }
 0x748   :  { %v3840_v46 = vpop.eup %3839 }
 0x749   :  { %v1587_v18 = vmul.f32 %v3838_v15, %v1586_v30  ;;  %v1593_v59 = vmul.f32 %v3840_v46, %v1561_v17  ;;  %vm1599_vm9 = vweird.f32 %v3840_v46 }
 0x74a   :  { %vm1600_vm11 = vmor %vm1598_vm10, %vm1599_vm9 }
 0x74b   :  { %v1591_v21 = vsel %vm1590_vm8, %v3838_v15, %v1587_v18  ;;  %v1594_v54 = vmul.f32 %v3840_v46, %v1593_v59 }
 0x74c   :  { %v1604_v23 = vmul.f32 %v1591_v21, %v4467_v45  ;;  %v1717_v45 = vld [vmem:[%s5105_s10 + $0x60] sm:$0xff] }
 0x74d   :  { %v1595_v22 = vmul.f32 0.5, %v1594_v54  ;;  %1724 = vmatpush.msrb.mxu3 %v1717_v45 }
 0x74e   :  { %v1611_v25 = vmul.f32 %v3746_v0, %v1604_v23 }
 0x74f   :  { %v1596_v11 = vsub.f32 1.5, %v1595_v22  ;;  %1725 = vmatpush.msrb.mxu3 %v1716_v8 }
 0x750   :  { %v1618_v55 = vadd.f32 %v3747_v51, %v1611_v25 }
 0x751   :  { %v1597_v24 = vmul.f32 %v3840_v46, %v1596_v11  ;;  %1726 = vmatpush.msrb.mxu3 %v1715_v33 }
 0x752   :  { %3649 = vmatmul.msk.f32.gmra.mxu3 %vm54_vm0, %v1618_v55 }
 0x753   :  { %v1601_v28 = vsel %vm1600_vm11, %v3840_v46, %v1597_v24 }
 0x754   :  { %v1605_v31 = vmul.f32 %v1601_v28, %v4474_v26  ;;  %v1714_v26 = vld [vmem:[%s5105_s10 + $0x48] sm:$0xff] }
 0x755   :  { %1727 = vmatpush.msrb.mxu3 %v1714_v26 }
 0x756   :  { %v1612_v58 = vmul.f32 %v3746_v0, %v1605_v31 }
 0x757   :  { %1728 = vmatpush.msrb.mxu3 %v1713_v34 }
 0x758   :  { %v1619_v2 = vadd.f32 %v3747_v51, %v1612_v58 }
 0x759   :  { %1729 = vmatpush.msrb.mxu3 %v1712_v35 }
 0x75a   :  { %3650 = vmatmul.msk.f32.gmra.mxu3 %vm54_vm0, %v1619_v2  ;;  %v3749_v2 = vld [vmem:[%s5106_s11] ss:$0 sm:$0xff] }
 0x75b   :  { %1730 = vmatpush.msrb.mxu3 %v1711_v56 }
 0x75d   :  { %1731 = vmatpush.msrb.mxu3 %v1710_v36 }
 0x75f   :  { %1732 = vmatpush.msrb.mxu3 %v1709_v37 }
 0x761   :  { %1733 = vmatpush.msrb.mxu3 %v1708_v62 }
 0x763   :  { %1734 = vmatpush.msrb.mxu3 %v1707_v32 }
 0x765   :  { %1735 = vmatpush.msrb.mxu3 %v1706_v1 }
 0x767   :  { %1736 = vmatpush.msrb.mxu3 %v1705_v38 }
 0x79e   :  { %v1657_v29 = vpop.f32.mrf.mxu3 }
 0x79f   :  { %v1658_v39 = vadd.f32 %v3748_v19, %v1657_v29 }
 0x7a1   :  { %v1669_v0 = vmul.f32 %v1658_v39, %v1658_v39 }
 0x7a3   :  { %v1673_v40 = vmul.f32 %v1669_v0, %v1658_v39 }
 0x7a5   :  { %v1677_v49 = vmul.f32 0.044715, %v1673_v40 }
 0x7a6   :  { %v1660_v42 = vpop.f32.mrf.mxu3 }
 0x7a7   :  { %v1681_v51 = vadd.f32 %v1677_v49, %v1658_v39  ;;  %v1661_v50 = vadd.f32 %v3748_v19, %v1660_v42 }
 0x7a9   :  { %v1685_v41 = vmul.f32 0.7978846, %v1681_v51  ;;  %v1670_v10 = vmul.f32 %v1661_v50, %v1661_v50 }
 0x7ab   :  { %3841 = vtanh.f32 %v1685_v41  ;;  %v1674_v53 = vmul.f32 %v1670_v10, %v1661_v50 }
 0x7ad   :  { %v1678_v60 = vmul.f32 0.044715, %v1674_v53 }
 0x7af   :  { %v1682_v43 = vadd.f32 %v1678_v60, %v1661_v50 }
 0x7b1   :  { %v3842_v63 = vpop.eup %3841  ;;  %v1686_v61 = vmul.f32 0.7978846, %v1682_v43 }
 0x7b2   :  { %v1693_v3 = vadd.f32 1.0, %v3842_v63 }
 0x7b3   :  { %3843 = vtanh.f32 %v1686_v61 }
 0x7b4   :  { %v1697_v4 = vmul.f32 0.5, %v1693_v3 }
 0x7b6   :  { %v1701_v5 = vmul.f32 %v1697_v4, %v1658_v39 }
 0x7b8   :  { %1737 = vmatmul.f32.vlgmr.msrb.gmra.mxu3 %v1701_v5 }
 0x7b9   :  { %v3844_v7 = vpop.eup %3843 }
 0x7ba   :  { %v1694_v9 = vadd.f32 1.0, %v3844_v7  ;;  %v3656_v7 = vld [vmem:[%s5098_s3 + $0x38] sm:$0xff] }
 0x7bb   :  { %1897 = vmatpush.msrb.mxu0 %v3656_v7 }
 0x7bc   :  { %v1698_v12 = vmul.f32 0.5, %v1694_v9  ;;  %v3655_v9 = vld [vmem:[%s5098_s3 + $0x30] sm:$0xff] }
 0x7bd   :  { %1898 = vmatpush.msrb.mxu0 %v3655_v9 }
 0x7be   :  { %v1702_v47 = vmul.f32 %v1698_v12, %v1661_v50  ;;  %v3654_v12 = vld [vmem:[%s5098_s3 + $0x28] sm:$0xff] }
 0x7bf   :  { %1899 = vmatpush.msrb.mxu0 %v3654_v12 }
 0x7c0   :  { %1740 = vmatmul.f32.gmra.mxu3 %v1702_v47  ;;  %v3653_v47 = vld [vmem:[%s5098_s3 + $0x20] sm:$0xff] }
 0x7c1   :  { %1900 = vmatpush.msrb.mxu0 %v3653_v47 }
 0x7d5   :  { %v1663_v13 = vpop.f32.mrf.mxu3 }
 0x7d6   :  { %v1664_v48 = vadd.f32 %v3748_v19, %v1663_v13 }
 0x7d8   :  { %v1671_v15 = vmul.f32 %v1664_v48, %v1664_v48 }
 0x7da   :  { %v1675_v17 = vmul.f32 %v1671_v15, %v1664_v48 }
 0x7dc   :  { %v1679_v20 = vmul.f32 0.044715, %v1675_v17 }
 0x7dd   :  { %v1666_v27 = vpop.f32.mrf.mxu3 }
 0x7de   :  { %v1667_v16 = vadd.f32 %v3748_v19, %v1666_v27  ;;  %v1683_v30 = vadd.f32 %v1679_v20, %v1664_v48 }
 0x7e0   :  { %v1672_v46 = vmul.f32 %v1667_v16, %v1667_v16  ;;  %v1687_v18 = vmul.f32 0.7978846, %v1683_v30 }
 0x7e2   :  { %v1676_v59 = vmul.f32 %v1672_v46, %v1667_v16  ;;  %3845 = vtanh.f32 %v1687_v18 }
 0x7e4   :  { %v1680_v21 = vmul.f32 0.044715, %v1676_v59 }
 0x7e6   :  { %v1684_v54 = vadd.f32 %v1680_v21, %v1667_v16 }
 0x7e8   :  { %v3846_v23 = vpop.eup %3845  ;;  %v1688_v22 = vmul.f32 0.7978846, %v1684_v54 }
 0x7e9   :  { %v1695_v25 = vadd.f32 1.0, %v3846_v23 }
 0x7ea   :  { %3847 = vtanh.f32 %v1688_v22  ;;  %v3750_v22 = vld [vmem:[%s5096_s1 + $0x1] ss:$0 sm:$0xff] }
 0x7eb   :  { %v1699_v11 = vmul.f32 0.5, %v1695_v25 }
 0x7ed   :  { %v1703_v55 = vmul.f32 %v1699_v11, %v1664_v48 }
 0x7ef   :  { %1743 = vmatmul.f32.gmra.mxu3 %v1703_v55 }
 0x7f0   :  { %v3848_v24 = vpop.eup %3847 }
 0x7f1   :  { %v1696_v28 = vadd.f32 1.0, %v3848_v24  ;;  %v3751_v24 = vld [vmem:[%s5097_s2 + $0x1] ss:$0 sm:$0xff] }
 0x7f3   :  { %v1700_v31 = vmul.f32 0.5, %v1696_v28 }
 0x7f5   :  { %v1704_v58 = vmul.f32 %v1700_v31, %v1667_v16 }
 0x7f7   :  { %1746 = vmatmul.f32.gmra.mxu3 %v1704_v58 }
 0x83b   :  { %v1738_v45 = vpop.f32.mrf.mxu3 }
 0x83c   :  { %v1750_v8 = vadd.f32 %v1738_v45, %v4434_v57 }
 0x83e   :  { %v4562_v33 = vadd.f32 %v3749_v2, %v1750_v8 }
 0x840   :  { %v1766_v26 = vsel %vm54_vm0, %v4562_v33, 0.0 }
 0x841   :  { %1767 = vadd.xlane.f32.xlu2 %v1766_v26 }
 0x843   :  { %v1741_v34 = vpop.f32.mrf.mxu3 }
 0x844   :  { %v1751_v35 = vadd.f32 %v1741_v34, %v4441_v44 }
 0x846   :  { %v4567_v56 = vadd.f32 %v3749_v2, %v1751_v35 }
 0x848   :  { %v1769_v36 = vsel %vm54_vm0, %v4567_v56, 0.0 }
 0x849   :  { %1770 = vadd.xlane.f32.xlu1 %v1769_v36 }
 0x872   :  { %v1744_v37 = vpop.f32.mrf.mxu3 }
 0x873   :  { %v1752_v62 = vadd.f32 %v1744_v37, %v4448_v6 }
 0x875   :  { %v4572_v32 = vadd.f32 %v3749_v2, %v1752_v62 }
 0x877   :  { %v1772_v57 = vsel %vm54_vm0, %v4572_v32, 0.0 }
 0x878   :  { %1773 = vadd.xlane.f32.xlu0 %v1772_v57 }
 0x87a   :  { %v1747_v1 = vpop.f32.mrf.mxu3 }
 0x87b   :  { %v1753_v38 = vadd.f32 %v1747_v1, %v4455_v52 }
 0x87d   :  { %v4577_v19 = vadd.f32 %v3749_v2, %v1753_v38 }
 0x87f   :  { %v1775_v44 = vsel %vm54_vm0, %v4577_v19, 0.0 }
 0x880   :  { %1776 = vadd.xlane.f32.xlu1 %v1775_v44 }
 0x8b4   :  { %v1768_v29 = vpop.xlane.xlu2 %1767 }
 0x8b5   :  { %v1778_v39 = vmul.f32 %v1768_v29, %v4070_v14 }
 0x8b7   :  { %v1782_v6 = vsub.f32 %v4562_v33, %v1778_v39 }
 0x8b9   :  { %v1786_v0 = vmul.f32 %v1782_v6, %v1782_v6 }
 0x8bb   :  { %v1790_v40 = vsel %vm54_vm0, %v1786_v0, 0.0 }
 0x8bc   :  { %v1771_v49 = vpop.xlane.xlu1 %1770  ;;  %1791 = vadd.xlane.f32.xlu1 %v1790_v40 }
 0x8bd   :  { %v1779_v42 = vmul.f32 %v1771_v49, %v4070_v14 }
 0x8bf   :  { %v1783_v52 = vsub.f32 %v4567_v56, %v1779_v42 }
 0x8c1   :  { %v1787_v51 = vmul.f32 %v1783_v52, %v1783_v52 }
 0x8c3   :  { %v1793_v50 = vsel %vm54_vm0, %v1787_v51, 0.0 }
 0x8c4   :  { %1794 = vadd.xlane.f32.xlu1 %v1793_v50 }
 0x8eb   :  { %v1774_v41 = vpop.xlane.xlu0 %1773 }
 0x8ec   :  { %v1780_v10 = vmul.f32 %v1774_v41, %v4070_v14 }
 0x8ee   :  { %v4589_v53 = vsub.f32 %v4572_v32, %v1780_v10 }
 0x8f0   :  { %v1788_v60 = vmul.f32 %v4589_v53, %v4589_v53 }
 0x8f2   :  { %v1796_v43 = vsel %vm54_vm0, %v1788_v60, 0.0 }
 0x8f3   :  { %1797 = vadd.xlane.f32.xlu1 %v1796_v43  ;;  %v1777_v63 = vpop.xlane.xlu1 %1776 }
 0x8f4   :  { %v1781_v61 = vmul.f32 %v1777_v63, %v4070_v14 }
 0x8f6   :  { %v4596_v3 = vsub.f32 %v4577_v19, %v1781_v61 }
 0x8f8   :  { %v1789_v4 = vmul.f32 %v4596_v3, %v4596_v3 }
 0x8fa   :  { %v1799_v5 = vsel %vm54_vm0, %v1789_v4, 0.0 }
 0x8fb   :  { %1800 = vadd.xlane.f32.xlu1 %v1799_v5 }
 0x92f   :  { %v1792_v13 = vpop.xlane.xlu1 %1791 }
 0x930   :  { %v1802_v48 = vmul.f32 %v1792_v13, %v4070_v14 }
 0x932   :  { %v1806_v15 = vadd.f32 1e-05, %v1802_v48 }
 0x934   :  { %3849 = vrsqrt.f32 %v1806_v15  ;;  %vm1816_vm13 = vweird.f32 %v1806_v15 }
 0x937   :  { %v1795_v17 = vpop.xlane.xlu1 %1794 }
 0x938   :  { %v1803_v20 = vmul.f32 %v1795_v17, %v4070_v14 }
 0x93a   :  { %v3850_v27 = vpop.eup %3849  ;;  %v1807_v16 = vadd.f32 1e-05, %v1803_v20 }
 0x93b   :  { %v1811_v30 = vmul.f32 %v3850_v27, %v1806_v15  ;;  %vm1817_vm12 = vweird.f32 %v3850_v27 }
 0x93c   :  { %3851 = vrsqrt.f32 %v1807_v16  ;;  %vm1818_vm1 = vmor %vm1816_vm13, %vm1817_vm12  ;;  %vm1826_vm3 = vweird.f32 %v1807_v16 }
 0x93d   :  { %v1812_v46 = vmul.f32 %v3850_v27, %v1811_v30 }
 0x93f   :  { %v1813_v18 = vmul.f32 0.5, %v1812_v46 }
 0x941   :  { %v1814_v59 = vsub.f32 1.5, %v1813_v18 }
 0x942   :  { %v3852_v21 = vpop.eup %3851 }
 0x943   :  { %v1815_v54 = vmul.f32 %v3850_v27, %v1814_v59  ;;  %v1821_v23 = vmul.f32 %v3852_v21, %v1807_v16  ;;  %vm1827_vm2 = vweird.f32 %v3852_v21 }
 0x944   :  { %vm1828_vm4 = vmor %vm1826_vm3, %vm1827_vm2 }
 0x945   :  { %v1819_v25 = vsel %vm1818_vm1, %v3850_v27, %v1815_v54  ;;  %v1822_v11 = vmul.f32 %v3852_v21, %v1821_v23 }
 0x946   :  { %v1850_v55 = vmul.f32 %v1819_v25, %v1782_v6 }
 0x947   :  { %v1823_v28 = vmul.f32 0.5, %v1822_v11 }
 0x948   :  { %v1857_v31 = vmul.f32 %v3750_v22, %v1850_v55 }
 0x949   :  { %v1824_v58 = vsub.f32 1.5, %v1823_v28 }
 0x94a   :  { %v1864_v2 = vadd.f32 %v3751_v24, %v1857_v31 }
 0x94b   :  { %v1825_v45 = vmul.f32 %v3852_v21, %v1824_v58 }
 0x94c   :  { %3657 = vmatmul.msk.f32.vlgmr.msrb.gmra.mxu0 %vm54_vm0, %v1864_v2 }
 0x94d   :  { %v1829_v8 = vsel %vm1828_vm4, %v3852_v21, %v1825_v45 }
 0x94e   :  { %v1851_v26 = vmul.f32 %v1829_v8, %v1783_v52 }
 0x950   :  { %v1858_v34 = vmul.f32 %v3750_v22, %v1851_v26 }
 0x952   :  { %v1865_v35 = vadd.f32 %v3751_v24, %v1858_v34 }
 0x954   :  { %3658 = vmatmul.msk.f32.gmra.mxu0 %vm54_vm0, %v1865_v35 }
 0x966   :  { %v1798_v36 = vpop.xlane.xlu1 %1797 }
 0x967   :  { %v1804_v37 = vmul.f32 %v1798_v36, %v4070_v14 }
 0x969   :  { %v1808_v62 = vadd.f32 1e-05, %v1804_v37 }
 0x96b   :  { %3853 = vrsqrt.f32 %v1808_v62  ;;  %vm1836_vm6 = vweird.f32 %v1808_v62 }
 0x96e   :  { %v1801_v57 = vpop.xlane.xlu1 %1800 }
 0x96f   :  { %v1805_v1 = vmul.f32 %v1801_v57, %v4070_v14 }
 0x971   :  { %v3854_v38 = vpop.eup %3853  ;;  %v1809_v44 = vadd.f32 1e-05, %v1805_v1 }
 0x972   :  { %v1831_v29 = vmul.f32 %v3854_v38, %v1808_v62  ;;  %vm1837_vm5 = vweird.f32 %v3854_v38 }
 0x973   :  { %3855 = vrsqrt.f32 %v1809_v44  ;;  %vm1838_vm7 = vmor %vm1836_vm6, %vm1837_vm5  ;;  %vm1846_vm9 = vweird.f32 %v1809_v44 }
 0x974   :  { %v1832_v39 = vmul.f32 %v3854_v38, %v1831_v29 }
 0x976   :  { %v1833_v6 = vmul.f32 0.5, %v1832_v39 }
 0x978   :  { %v1834_v0 = vsub.f32 1.5, %v1833_v6 }
 0x979   :  { %v3856_v40 = vpop.eup %3855 }
 0x97a   :  { %v1835_v49 = vmul.f32 %v3854_v38, %v1834_v0  ;;  %v1841_v42 = vmul.f32 %v3856_v40, %v1809_v44  ;;  %vm1847_vm8 = vweird.f32 %v3856_v40 }
 0x97b   :  { %vm1848_vm10 = vmor %vm1846_vm9, %vm1847_vm8 }
 0x97c   :  { %v1839_v52 = vsel %vm1838_vm7, %v3854_v38, %v1835_v49  ;;  %v1842_v51 = vmul.f32 %v3856_v40, %v1841_v42 }
 0x97d   :  { %v1852_v50 = vmul.f32 %v1839_v52, %v4589_v53 }
 0x97e   :  { %v1843_v41 = vmul.f32 0.5, %v1842_v51 }
 0x97f   :  { %v1859_v10 = vmul.f32 %v3750_v22, %v1852_v50 }
 0x980   :  { %v1844_v60 = vsub.f32 1.5, %v1843_v41 }
 0x981   :  { %v1866_v43 = vadd.f32 %v3751_v24, %v1859_v10 }
 0x982   :  { %v1845_v63 = vmul.f32 %v3856_v40, %v1844_v60 }
 0x983   :  { %3659 = vmatmul.msk.f32.gmra.mxu0 %vm54_vm0, %v1866_v43 }
 0x984   :  { %v1849_v61 = vsel %vm1848_vm10, %v3856_v40, %v1845_v63 }
 0x985   :  { %v1853_v4 = vmul.f32 %v1849_v61, %v4596_v3 }
 0x987   :  { %v1860_v5 = vmul.f32 %v3750_v22, %v1853_v4 }
 0x989   :  { %v1867_v7 = vadd.f32 %v3751_v24, %v1860_v5 }
 0x98b   :  { %3660 = vmatmul.msk.f32.gmra.mxu0 %vm54_vm0, %v1867_v7 }
 0x9c9   :  { %v1902_v9 = vpop.f32.mrf.mxu0 }
 0x9ca   :  { %1914 = vxpose.xlu1.b32.start [1/2] (short) (narrow) %v1902_v9, 96 }
 0x9d1   :  { %v1905_v53 = vpop.f32.mrf.mxu0 }
 0x9d2   :  { %1915 = vxpose.xlu1.b32.end [2/2] (short) (narrow) %v1905_v53, 96 }
 0xa00   :  { %v1908_v12 = vpop.f32.mrf.mxu0 }
 0xa01   :  { %1946 = vxpose.xlu0.b32.start [1/2] (short) (narrow) %v1908_v12, 96 }
 0xa08   :  { %v1911_v47 = vpop.f32.mrf.mxu0 }
 0xa09   :  { %1947 = vxpose.xlu0.b32.end [2/2] (short) (narrow) %v1911_v47, 96 }
 0xa6e   :  { %v1930_v13 = vpop.trf.xlu1 }
 0xa6f   :  { %1978 = vxpose.xlu2.b32.start.end [1/1] (short) (narrow) %v1930_v13, 16 }
 0xa76   :  { %v1931_v48 = vpop.trf.xlu1 }
 0xa77   :  { %2010 = vxpose.xlu1.b32.start.end [1/1] (short) (narrow) %v1931_v48, 16 }
 0xa7e   :  { %v1932_v15 = vpop.trf.xlu1 }
 0xa7f   :  { %2042 = vxpose.xlu2.b32.start.end [1/1] (short) (narrow) %v1932_v15, 16 }
 0xa86   :  { %v1933_v17 = vpop.trf.xlu1 }
 0xa87   :  { %2074 = vxpose.xlu0.b32.start.end [1/1] (short) (narrow) %v1933_v17, 16 }
 0xa8e   :  { %v1934_v20 = vpop.trf.xlu1 }
 0xa8f   :  { %2271 = vmatpush.msrb.mxu1 %v1934_v20 }
 0xa96   :  { %v1935_v16 = vpop.trf.xlu1 }
 0xa97   :  { %2300 = vmatpush.msra.mxu2 %v1935_v16 }
 0xa9e   :  { %v1936_v46 = vpop.trf.xlu1 }
 0xa9f   :  { %2329 = vmatpush.msra.mxu0 %v1936_v46 }
 0xaa5   :  { %v1962_v3 = vpop.trf.xlu0 }
 0xaa6   :  { %2106 = vxpose.xlu2.b32.start.end [1/1] (short) (narrow) %v1962_v3, 16  ;;  %v1937_v59 = vpop.trf.xlu1 }
 0xaa7   :  { %2358 = vmatpush.msra.mxu1 %v1937_v59 }
 0xaad   :  { %v1963_v27 = vpop.trf.xlu0 }
 0xaae   :  { %v4629_v22 = vpop.trf.xlu1 }
 0xab5   :  { %v1964_v30 = vpop.trf.xlu0 }
 0xab6   :  { %2170 = vxpose.xlu2.b32.start.end [1/1] (short) (narrow) %v1964_v30, 16  ;;  %v4631_v11 = vpop.trf.xlu1 }
 0xabd   :  { %v1965_v18 = vpop.trf.xlu0 }
 0xabe   :  { %2202 = vxpose.xlu1.b32.start.end [1/1] (short) (narrow) %v1965_v18, 16  ;;  %v4635_v24 = vpop.trf.xlu1 }
 0xac5   :  { %v1966_v21 = vpop.trf.xlu0 }
 0xac6   :  { %2138 = vxpose.xlu2.b32.start.end [1/1] (short) (narrow) %v1963_v27, 16  ;;  %2387 = vmatpush.msrb.mxu2 %v1966_v21  ;;  %v4640_v8 = vpop.trf.xlu1 }
 0xacd   :  { %v1967_v54 = vpop.trf.xlu0 }
 0xace   :  { %2416 = vmatpush.msrb.mxu0 %v1967_v54 }
 0xad5   :  { %v1968_v23 = vpop.trf.xlu0 }
 0xad6   :  { %2445 = vmatpush.msra.mxu3 %v1968_v23 }
 0xadd   :  { %v1969_v25 = vpop.trf.xlu0 }
 0xae5   :  { %v4633_v55 = vpop.trf.xlu0 }
 0xaed   :  { %v4638_v58 = vpop.trf.xlu0 }
 0xaf5   :  { %v4643_v26 = vpop.trf.xlu0 }
 0xafd   :  { %v4647_v1 = vpop.trf.xlu0 }
 0xb08   :  { %v1994_v28 = vpop.trf.xlu2 }
 0xb09   :  { %v2234_v31 = vmul.f32 0.35355338, %v1994_v28 }
 0xb0b   :  { %3661 = vmatmul.msk.f32.vlgmr.msrb.gmra.mxu1 %vm545_vm14, %v2234_v31 }
 0xb0c   :  { %2474 = vmatpush.msrb.mxu1 %v1969_v25 }
 0xb10   :  { %v1995_v2 = vpop.trf.xlu2 }
 0xb11   :  { %v2235_v45 = vmul.f32 0.35355338, %v1995_v2 }
 0xb13   :  { %3662 = vmatmul.msk.f32.gmra.mxu1 %vm545_vm14, %v2235_v45 }
 0xb18   :  { %v2058_v34 = vpop.trf.xlu2 }
 0xb19   :  { %v2238_v35 = vmul.f32 0.35355338, %v2058_v34 }
 0xb1b   :  { %3665 = vmatmul.msk.f32.vlgmr.msra.gmra.mxu0 %vm545_vm14, %v2238_v35  ;;  %v2026_v36 = vpop.trf.xlu1 }
 0xb1c   :  { %v2236_v37 = vmul.f32 0.35355338, %v2026_v36 }
 0xb1e   :  { %3663 = vmatmul.msk.f32.vlgmr.msra.gmra.mxu2 %vm545_vm14, %v2236_v37 }
 0xb20   :  { %v2059_v62 = vpop.trf.xlu2 }
 0xb21   :  { %v2239_v57 = vmul.f32 0.35355338, %v2059_v62 }
 0xb23   :  { %3666 = vmatmul.msk.f32.gmra.mxu0 %vm545_vm14, %v2239_v57  ;;  %v2027_v38 = vpop.trf.xlu1 }
 0xb24   :  { %v2237_v44 = vmul.f32 0.35355338, %v2027_v38 }
 0xb26   :  { %3664 = vmatmul.msk.f32.gmra.mxu2 %vm545_vm14, %v2237_v44 }
 0xb2b   :  { %v2090_v29 = vpop.trf.xlu0 }
 0xb2c   :  { %v2240_v39 = vmul.f32 0.35355338, %v2090_v29 }
 0xb2e   :  { %3667 = vmatmul.msk.f32.vlgmr.msra.gmra.mxu1 %vm545_vm14, %v2240_v39 }
 0xb33   :  { %v2091_v6 = vpop.trf.xlu0 }
 0xb34   :  { %v2241_v0 = vmul.f32 0.35355338, %v2091_v6 }
 0xb36   :  { %3668 = vmatmul.msk.f32.gmra.mxu1 %vm545_vm14, %v2241_v0 }
 0xb3f   :  { %v2122_v40 = vpop.trf.xlu2 }
 0xb40   :  { %v2242_v49 = vmul.f32 0.35355338, %v2122_v40 }
 0xb42   :  { %3669 = vmatmul.msk.f32.vlgmr.msrb.gmra.mxu2 %vm545_vm14, %v2242_v49 }
 0xb47   :  { %v2123_v42 = vpop.trf.xlu2 }
 0xb48   :  { %v2243_v52 = vmul.f32 0.35355338, %v2123_v42 }
 0xb4a   :  { %3670 = vmatmul.msk.f32.gmra.mxu2 %vm545_vm14, %v2243_v52 }
 0xb4f   :  { %v2186_v51 = vpop.trf.xlu2 }
 0xb50   :  { %v2246_v50 = vmul.f32 0.35355338, %v2186_v51 }
 0xb52   :  { %3673 = vmatmul.msk.f32.vlgmr.msra.gmra.mxu3 %vm545_vm14, %v2246_v50 }
 0xb57   :  { %v2187_v41 = vpop.trf.xlu2 }
 0xb58   :  { %v2247_v10 = vmul.f32 0.35355338, %v2187_v41 }
 0xb5a   :  { %3674 = vmatmul.msk.f32.gmra.mxu3 %vm545_vm14, %v2247_v10 }
 0xb5f   :  { %v2154_v60 = vpop.trf.xlu2 }
 0xb60   :  { %v2244_v43 = vmul.f32 0.35355338, %v2154_v60 }
 0xb62   :  { %3671 = vmatmul.msk.f32.vlgmr.msrb.gmra.mxu0 %vm545_vm14, %v2244_v43  ;;  %v2218_v63 = vpop.trf.xlu1 }
 0xb63   :  { %v2248_v61 = vmul.f32 0.35355338, %v2218_v63 }
 0xb65   :  { %3675 = vmatmul.msk.f32.vlgmr.msrb.gmra.mxu1 %vm545_vm14, %v2248_v61 }
 0xb67   :  { %v2155_v4 = vpop.trf.xlu2 }
 0xb68   :  { %v2245_v5 = vmul.f32 0.35355338, %v2155_v4 }
 0xb6a   :  { %3672 = vmatmul.msk.f32.gmra.mxu0 %vm545_vm14, %v2245_v5  ;;  %v2219_v7 = vpop.trf.xlu1 }
 0xb6b   :  { %v2249_v9 = vmul.f32 0.35355338, %v2219_v7 }
 0xb6d   :  { %3676 = vmatmul.msk.f32.gmra.mxu1 %vm545_vm14, %v2249_v9 }
 0xb88   :  { %v2273_v53 = vpop.f32.mrf.mxu1 }
 0xb89   :  { %v2482_v12 = vsel %vm778_vm15, %v2273_v53, -inf }
 0xb8a   :  { %2483 = vmax.xlane.f32.xlu1 %v2482_v12 }
 0xb90   :  { %v2276_v47 = vpop.f32.mrf.mxu1 }
 0xb91   :  { %v2485_v13 = vsel %vm778_vm15, %v2276_v47, -inf }
 0xb92   :  { %2486 = vmax.xlane.f32.xlu2 %v2485_v13 }
 0xb98   :  { %v2331_v48 = vpop.f32.mrf.mxu0 }
 0xb99   :  { %v2494_v15 = vsel %vm778_vm15, %v2331_v48, -inf }
 0xb9a   :  { %2495 = vmax.xlane.f32.xlu2 %v2494_v15 }
 0xba0   :  { %v2334_v17 = vpop.f32.mrf.mxu0 }
 0xba1   :  { %v4664_v3 = vpop.f32.mrf.mxu2  ;;  %v2497_v20 = vsel %vm778_vm15, %v2334_v17, -inf }
 0xba2   :  { %2498 = vmax.xlane.f32.xlu0 %v2497_v20  ;;  %v2488_v18 = vsel %vm778_vm15, %v4664_v3, -inf }
 0xba9   :  { %v4667_v27 = vpop.f32.mrf.mxu2 }
 0xbaa   :  { %v2491_v16 = vsel %vm778_vm15, %v4667_v27, -inf }
 0xbab   :  { %v4671_v30 = vpop.f32.mrf.mxu1  ;;  %2492 = vmax.xlane.f32.xlu1 %v2491_v16 }
 0xbac   :  { %v2500_v46 = vsel %vm778_vm15, %v4671_v30, -inf }
 0xbad   :  { %2501 = vmax.xlane.f32.xlu2 %v2500_v46 }
 0xbb3   :  { %2489 = vmax.xlane.f32.xlu1 %v2488_v18  ;;  %v4681_v54 = vpop.f32.mrf.mxu1 }
 0xbb4   :  { %v2503_v23 = vsel %vm778_vm15, %v4681_v54, -inf }
 0xbc5   :  { %v4677_v59 = vpop.f32.mrf.mxu2 }
 0xbc6   :  { %v2506_v21 = vsel %vm778_vm15, %v4677_v59, -inf }
 0xbc7   :  { %2507 = vmax.xlane.f32.xlu1 %v2506_v21 }
 0xbcd   :  { %v4685_v25 = vpop.f32.mrf.mxu2 }
 0xbce   :  { %v2509_v31 = vsel %vm778_vm15, %v4685_v25, -inf }
 0xbcf   :  { %2504 = vmax.xlane.f32.xlu1 %v2503_v23 }
 0xbd5   :  { %v4687_v28 = vpop.f32.mrf.mxu3 }
 0xbd6   :  { %v2518_v29 = vsel %vm778_vm15, %v4687_v28, -inf }
 0xbd7   :  { %2510 = vmax.xlane.f32.xlu1 %v2509_v31 }
 0xbdd   :  { %v4691_v2 = vpop.f32.mrf.mxu3 }
 0xbde   :  { %v2521_v45 = vsel %vm778_vm15, %v4691_v2, -inf }
 0xbdf   :  { %v4695_v34 = vpop.f32.mrf.mxu0  ;;  %2522 = vmax.xlane.f32.xlu2 %v2521_v45 }
 0xbe0   :  { %v2512_v44 = vsel %vm778_vm15, %v4695_v34, -inf }
 0xbe2   :  { %v4697_v35 = vpop.f32.mrf.mxu1 }
 0xbe3   :  { %v2524_v36 = vsel %vm778_vm15, %v4697_v35, -inf }
 0xbe4   :  { %2525 = vmax.xlane.f32.xlu0 %v2524_v36 }
 0xbe7   :  { %v4701_v37 = vpop.f32.mrf.mxu0 }
 0xbe8   :  { %v2515_v62 = vsel %vm778_vm15, %v4701_v37, -inf }
 0xbe9   :  { %2516 = vmax.xlane.f32.xlu1 %v2515_v62 }
 0xbea   :  { %v4705_v57 = vpop.f32.mrf.mxu1 }
 0xbeb   :  { %v2527_v38 = vsel %vm778_vm15, %v4705_v57, -inf }
 0xbec   :  { %2528 = vmax.xlane.f32.xlu2 %v2527_v38 }
 0xbf1   :  { %2513 = vmax.xlane.f32.xlu1 %v2512_v44 }
 0xbf4   :  { %2519 = vmax.xlane.f32.xlu2 %v2518_v29 }
 0xbfd   :  { %v2484_v39 = vpop.xlane.xlu1 %2483 }
 0xbfe   :  { %v2530_v6 = vsub.f32 %v2273_v53, %v2484_v39 }
 0xc00   :  { %v2546_v0 = vmul.f32 1.442695, %v2530_v6 }
 0xc02   :  { %3857 = vpow2.f32 %v2546_v0 }
 0xc05   :  { %v2487_v40 = vpop.xlane.xlu2 %2486 }
 0xc06   :  { %v2531_v49 = vsub.f32 %v2276_v47, %v2487_v40 }
 0xc08   :  { %v4713_v42 = vpop.eup %3857  ;;  %v2548_v52 = vmul.f32 1.442695, %v2531_v49 }
 0xc09   :  { %v2578_v51 = vsel %vm778_vm15, %v4713_v42, 0.0 }
 0xc0a   :  { %3859 = vpow2.f32 %v2548_v52  ;;  %2579 = vadd.xlane.f32.xlu1 %v2578_v51 }
 0xc0d   :  { %v2496_v50 = vpop.xlane.xlu2 %2495 }
 0xc0e   :  { %v2534_v41 = vsub.f32 %v2331_v48, %v2496_v50 }
 0xc10   :  { %v4717_v10 = vpop.eup %3859  ;;  %v2554_v60 = vmul.f32 1.442695, %v2534_v41 }
 0xc11   :  { %v2581_v43 = vsel %vm778_vm15, %v4717_v10, 0.0 }
 0xc12   :  { %3861 = vpow2.f32 %v2554_v60  ;;  %2582 = vadd.xlane.f32.xlu2 %v2581_v43 }
 0xc15   :  { %v2499_v63 = vpop.xlane.xlu0 %2498 }
 0xc16   :  { %v2535_v61 = vsub.f32 %v2334_v17, %v2499_v63 }
 0xc18   :  { %v4721_v4 = vpop.eup %3861  ;;  %v2556_v5 = vmul.f32 1.442695, %v2535_v61 }
 0xc19   :  { %v2590_v7 = vsel %vm778_vm15, %v4721_v4, 0.0 }
 0xc1a   :  { %3863 = vpow2.f32 %v2556_v5  ;;  %2591 = vadd.xlane.f32.xlu0 %v2590_v7 }
 0xc1e   :  { %v2493_v9 = vpop.xlane.xlu1 %2492 }
 0xc1f   :  { %v2533_v48 = vsub.f32 %v4667_v27, %v2493_v9 }
 0xc20   :  { %v4725_v53 = vpop.eup %3863  ;;  %v2502_v23 = vpop.xlane.xlu2 %2501 }
 0xc21   :  { %v2593_v12 = vsel %vm778_vm15, %v4725_v53, 0.0  ;;  %v2552_v17 = vmul.f32 1.442695, %v2533_v48  ;;  %v2536_v62 = vsub.f32 %v4671_v30, %v2502_v23 }
 0xc22   :  { %2594 = vadd.xlane.f32.xlu0 %v2593_v12 }
 0xc26   :  { %v2490_v47 = vpop.xlane.xlu1 %2489 }
 0xc27   :  { %v2532_v13 = vsub.f32 %v4664_v3, %v2490_v47 }
 0xc29   :  { %v2550_v15 = vmul.f32 1.442695, %v2532_v13 }
 0xc2b   :  { %3865 = vpow2.f32 %v2550_v15 }
 0xc2c   :  { %3867 = vpow2.f32 %v2552_v17 }
 0xc31   :  { %v4731_v20 = vpop.eup %3865 }
 0xc32   :  { %v2584_v16 = vsel %vm778_vm15, %v4731_v20, 0.0  ;;  %v4735_v46 = vpop.eup %3867 }
 0xc33   :  { %2585 = vadd.xlane.f32.xlu2 %v2584_v16  ;;  %v2587_v3 = vsel %vm778_vm15, %v4735_v46, 0.0 }
 0xc3a   :  { %v2508_v18 = vpop.xlane.xlu1 %2507 }
 0xc3b   :  { %v2538_v21 = vsub.f32 %v4677_v59, %v2508_v18  ;;  %2588 = vadd.xlane.f32.xlu2 %v2587_v3  ;;  %v2558_v59 = vmul.f32 1.442695, %v2536_v62 }
 0xc3d   :  { %v2562_v27 = vmul.f32 1.442695, %v2538_v21 }
 0xc3f   :  { %3869 = vpow2.f32 %v2562_v27 }
 0xc42   :  { %v2505_v31 = vpop.xlane.xlu1 %2504 }
 0xc43   :  { %v2537_v45 = vsub.f32 %v4681_v54, %v2505_v31 }
 0xc45   :  { %v4741_v36 = vpop.eup %3869  ;;  %v2560_v38 = vmul.f32 1.442695, %v2537_v45 }
 0xc46   :  { %v2602_v44 = vsel %vm778_vm15, %v4741_v36, 0.0 }
 0xc47   :  { %3871 = vpow2.f32 %v2560_v38  ;;  %2603 = vadd.xlane.f32.xlu2 %v2602_v44 }
 0xc48   :  { %3873 = vpow2.f32 %v2558_v59 }
 0xc4a   :  { %v2511_v29 = vpop.xlane.xlu1 %2510 }
 0xc4b   :  { %v2539_v39 = vsub.f32 %v4685_v25, %v2511_v29 }
 0xc4d   :  { %v4747_v6 = vpop.eup %3871  ;;  %v2564_v0 = vmul.f32 1.442695, %v2539_v39 }
 0xc4e   :  { %v2599_v54 = vsel %vm778_vm15, %v4747_v6, 0.0  ;;  %v4751_v40 = vpop.eup %3873 }
 0xc4f   :  { %3875 = vpow2.f32 %v2564_v0  ;;  %2600 = vadd.xlane.f32.xlu1 %v2599_v54  ;;  %v2596_v25 = vsel %vm778_vm15, %v4751_v40, 0.0 }
 0xc52   :  { %v2523_v30 = vpop.xlane.xlu2 %2522 }
 0xc53   :  { %v2543_v49 = vsub.f32 %v4691_v2, %v2523_v30 }
 0xc55   :  { %v4754_v52 = vpop.eup %3875  ;;  %v2572_v51 = vmul.f32 1.442695, %v2543_v49 }
 0xc56   :  { %v2605_v50 = vsel %vm778_vm15, %v4754_v52, 0.0 }
 0xc57   :  { %3877 = vpow2.f32 %v2572_v51  ;;  %v2526_v41 = vpop.xlane.xlu0 %2525  ;;  %2597 = vadd.xlane.f32.xlu1 %v2596_v25  ;;  %2606 = vadd.xlane.f32.xlu0 %v2605_v50 }
 0xc58   :  { %v2544_v60 = vsub.f32 %v4697_v35, %v2526_v41 }
 0xc5a   :  { %v2574_v43 = vmul.f32 1.442695, %v2544_v60 }
 0xc5c   :  { %v2517_v63 = vpop.xlane.xlu1 %2516  ;;  %3879 = vpow2.f32 %v2574_v43 }
 0xc5d   :  { %v4761_v61 = vpop.eup %3877  ;;  %v2541_v2 = vsub.f32 %v4701_v37, %v2517_v63 }
 0xc5e   :  { %v2617_v5 = vsel %vm778_vm15, %v4761_v61, 0.0 }
 0xc5f   :  { %v2568_v7 = vmul.f32 1.442695, %v2541_v2  ;;  %v2529_v9 = vpop.xlane.xlu2 %2528  ;;  %2618 = vadd.xlane.f32.xlu2 %v2617_v5 }
 0xc60   :  { %v2545_v12 = vsub.f32 %v4705_v57, %v2529_v9 }
 0xc61   :  { %3881 = vpow2.f32 %v2568_v7 }
 0xc62   :  { %v2576_v47 = vmul.f32 1.442695, %v2545_v12  ;;  %v4767_v13 = vpop.eup %3879 }
 0xc63   :  { %v2620_v15 = vsel %vm778_vm15, %v4767_v13, 0.0 }
 0xc64   :  { %3883 = vpow2.f32 %v2576_v47  ;;  %v2514_v35 = vpop.xlane.xlu1 %2513 }
 0xc65   :  { %v2540_v48 = vsub.f32 %v4695_v34, %v2514_v35 }
 0xc67   :  { %v4772_v37 = vpop.eup %3881  ;;  %v2566_v17 = vmul.f32 1.442695, %v2540_v48  ;;  %v2520_v16 = vpop.xlane.xlu2 %2519  ;;  %2621 = vadd.xlane.f32.xlu2 %v2620_v15 }
 0xc68   :  { %v2542_v18 = vsub.f32 %v4687_v28, %v2520_v16  ;;  %v2611_v57 = vsel %vm778_vm15, %v4772_v37, 0.0 }
 0xc69   :  { %2612 = vadd.xlane.f32.xlu1 %v2611_v57  ;;  %3885 = vpow2.f32 %v2566_v17 }
 0xc6a   :  { %v4777_v21 = vpop.eup %3883  ;;  %v2570_v3 = vmul.f32 1.442695, %v2542_v18 }
 0xc6b   :  { %v2623_v34 = vsel %vm778_vm15, %v4777_v21, 0.0 }
 0xc6c   :  { %3887 = vpow2.f32 %v2570_v3  ;;  %2624 = vadd.xlane.f32.xlu0 %v2623_v34 }
 0xc6f   :  { %v4781_v27 = vpop.eup %3885 }
 0xc70   :  { %v2608_v31 = vsel %vm778_vm15, %v4781_v27, 0.0 }
 0xc72   :  { %v4783_v23 = vpop.eup %3887 }
 0xc73   :  { %v2614_v28 = vsel %vm778_vm15, %v4783_v23, 0.0 }
 0xc74   :  { %2615 = vadd.xlane.f32.xlu1 %v2614_v28  ;;  %2609 = vadd.xlane.f32.xlu0 %v2608_v31 }
 0xc7d   :  { %v2580_v45 = vpop.xlane.xlu1 %2579 }
 0xc7e   :  { %3889 = vrcp.f32 %v2580_v45  ;;  %vm2631_vm12 = vweird.f32 %v2580_v45  ;;  %v2637_v41 = vand.u32 2147483648, %v2580_v45  ;;  %v2635_v43 = vand.u32 2147483647, %v2580_v45 }
 0xc80   :  { %v2638_v47 = vor.u32 1.1754944e-38, %v2637_v41  ;;  %vm2636_vm4 = vcmp.eq.f32.partialorder %v2635_v43, 8.507059e+37 }
 0xc84   :  { %v3890_v62 = vpop.eup %3889 }
 0xc85   :  { %v2627_v38 = vmul.f32 %v3890_v62, %v2580_v45  ;;  %v2583_v44 = vpop.xlane.xlu2 %2582  ;;  %vm2632_vm14 = vweird.f32 %v3890_v62 }
 0xc86   :  { %3891 = vrcp.f32 %v2583_v44  ;;  %v2652_v49 = vand.u32 2147483648, %v2583_v44  ;;  %v2650_v50 = vand.u32 2147483647, %v2583_v44  ;;  %vm4789_vm13 = vmor %vm2631_vm12, %vm2632_vm14  ;;  %vm2646_vm1 = vweird.f32 %v2583_v44 }
 0xc87   :  { %v2628_v59 = vsub.f32 1.0, %v2627_v38 }
 0xc88   :  { %v2653_v5 = vor.u32 1.1754944e-38, %v2652_v49  ;;  %vm2651_vm3 = vcmp.eq.f32.partialorder %v2650_v50, 8.507059e+37 }
 0xc89   :  { %v2629_v39 = vmul.f32 %v3890_v62, %v2628_v59 }
 0xc8b   :  { %v2630_v51 = vadd.f32 %v3890_v62, %v2629_v39 }
 0xc8c   :  { %v3892_v29 = vpop.eup %3891 }
 0xc8d   :  { %v2642_v0 = vmul.f32 %v3892_v29, %v2583_v44  ;;  %v2592_v54 = vpop.xlane.xlu0 %2591  ;;  %vm2647_vm11 = vweird.f32 %v3892_v29  ;;  %v2634_v12 = vsel %vm4789_vm13, %v3890_v62, %v2630_v51 }
 0xc8e   :  { %3893 = vrcp.f32 %v2592_v54  ;;  %vm2648_vm2 = vmor %vm2646_vm1, %vm2647_vm11  ;;  %v2639_v17 = vsel %vm2636_vm4, %v2638_v47, %v2634_v12  ;;  %v2697_v38 = vand.u32 2147483648, %v2592_v54  ;;  %vm2691_vm8 = vweird.f32 %v2592_v54 }
 0xc8f   :  { %v2643_v30 = vsub.f32 1.0, %v2642_v0  ;;  %v2640_v18 = vmul.f32 %v4713_v42, %v2639_v17  ;;  %v2695_v42 = vand.u32 2147483647, %v2592_v54 }
 0xc90   :  { %v2698_v49 = vor.u32 1.1754944e-38, %v2697_v38 }
 0xc91   :  { %v2644_v25 = vmul.f32 %v3892_v29, %v2643_v30  ;;  %vm2696_vm11 = vcmp.eq.f32.partialorder %v2695_v42, 8.507059e+37 }
 0xc93   :  { %v2645_v63 = vadd.f32 %v3892_v29, %v2644_v25 }
 0xc94   :  { %v3894_v2 = vpop.eup %3893 }
 0xc95   :  { %v2649_v7 = vsel %vm2648_vm2, %v3892_v29, %v2645_v63  ;;  %v2595_v9 = vpop.xlane.xlu0 %2594  ;;  %v2687_v48 = vmul.f32 %v3894_v2, %v2592_v54  ;;  %vm2692_vm6 = vweird.f32 %v3894_v2 }
 0xc96   :  { %v2654_v35 = vsel %vm2651_vm3, %v2653_v5, %v2649_v7  ;;  %3895 = vrcp.f32 %v2595_v9  ;;  %v2712_v31 = vand.u32 2147483648, %v2595_v9  ;;  %v2710_v62 = vand.u32 2147483647, %v2595_v9  ;;  %vm2693_vm10 = vmor %vm2691_vm8, %vm2692_vm6 }
 0xc97   :  { %v2655_v15 = vmul.f32 %v4717_v10, %v2654_v35  ;;  %v2688_v16 = vsub.f32 1.0, %v2687_v48  ;;  %vm2706_vm7 = vweird.f32 %v2595_v9 }
 0xc98   :  { %v2713_v59 = vor.u32 1.1754944e-38, %v2712_v31  ;;  %vm2711_vm14 = vcmp.eq.f32.partialorder %v2710_v62, 8.507059e+37 }
 0xc99   :  { %3677 = vmatpush.xpose.msk.msra.mxu2 %vm778_vm15, %v2655_v15  ;;  %v2689_v34 = vmul.f32 %v3894_v2, %v2688_v16 }
 0xc9b   :  { %v2690_v10 = vadd.f32 %v3894_v2, %v2689_v34 }
 0xc9c   :  { %v3896_v57 = vpop.eup %3895 }
 0xc9d   :  { %v2702_v3 = vmul.f32 %v3896_v57, %v2595_v9  ;;  %3678 = vmatpush.xpose.msk.msra.mxu2 %vm778_vm15, %v2640_v18  ;;  %vm2707_vm5 = vweird.f32 %v3896_v57  ;;  %v2694_v30 = vsel %vm2693_vm10, %v3894_v2, %v2690_v10 }
 0xc9e   :  { %vm2708_vm9 = vmor %vm2706_vm7, %vm2707_vm5  ;;  %v2699_v51 = vsel %vm2696_vm11, %v2698_v49, %v2694_v30 }
 0xc9f   :  { %v2703_v28 = vsub.f32 1.0, %v2702_v3  ;;  %v2700_v25 = vmul.f32 %v4721_v4, %v2699_v51 }
 0xca0   :  { %3679 = vmatmul.msk.f32.vlgmr.msra.gmra.mxu2 %vm778_vm15, %v4629_v22 }
 0xca1   :  { %v2704_v45 = vmul.f32 %v3896_v57, %v2703_v28 }
 0xca3   :  { %v2705_v44 = vadd.f32 %v3896_v57, %v2704_v45 }
 0xca5   :  { %v2709_v29 = vsel %vm2708_vm9, %v3896_v57, %v2705_v44 }
 0xca6   :  { %v2714_v39 = vsel %vm2711_vm14, %v2713_v59, %v2709_v29  ;;  %v2586_v0 = vpop.xlane.xlu2 %2585 }
 0xca7   :  { %3897 = vrcp.f32 %v2586_v0  ;;  %v2715_v22 = vmul.f32 %v4725_v53, %v2714_v39  ;;  %vm2661_vm1 = vweird.f32 %v2586_v0  ;;  %v2667_v12 = vand.u32 2147483648, %v2586_v0 }
 0xca8   :  { %v2665_v35 = vand.u32 2147483647, %v2586_v0 }
 0xca9   :  { %3683 = vmatpush.xpose.msk.msrb.mxu2 %vm778_vm15, %v2715_v22  ;;  %v2668_v18 = vor.u32 1.1754944e-38, %v2667_v12 }
 0xcaa   :  { %vm2666_vm6 = vcmp.eq.f32.partialorder %v2665_v35, 8.507059e+37 }
 0xcad   :  { %v3898_v50 = vpop.eup %3897  ;;  %3684 = vmatpush.xpose.msk.msrb.mxu2 %vm778_vm15, %v2700_v25 }
 0xcae   :  { %v2657_v54 = vmul.f32 %v3898_v50, %v2586_v0  ;;  %v2589_v41 = vpop.xlane.xlu2 %2588  ;;  %vm2662_vm12 = vweird.f32 %v3898_v50 }
 0xcaf   :  { %3899 = vrcp.f32 %v2589_v41  ;;  %v2682_v53 = vand.u32 2147483648, %v2589_v41  ;;  %v2680_v4 = vand.u32 2147483647, %v2589_v41  ;;  %vm4807_vm2 = vmor %vm2661_vm1, %vm2662_vm12  ;;  %vm2676_vm3 = vweird.f32 %v2589_v41 }
 0xcb0   :  { %3685 = vmatmul.msk.f32.vlgmr.msrb.gmra.mxu2 %vm778_vm15, %v4635_v24  ;;  %v2658_v60 = vsub.f32 1.0, %v2657_v54 }
 0xcb1   :  { %v2683_v15 = vor.u32 1.1754944e-38, %v2682_v53  ;;  %vm2681_vm5 = vcmp.eq.f32.partialorder %v2680_v4, 8.507059e+37 }
 0xcb2   :  { %v2659_v63 = vmul.f32 %v3898_v50, %v2658_v60 }
 0xcb4   :  { %v2660_v7 = vadd.f32 %v3898_v50, %v2659_v63 }
 0xcb5   :  { %v3900_v43 = vpop.eup %3899 }
 0xcb6   :  { %v2672_v2 = vmul.f32 %v3900_v43, %v2589_v41  ;;  %vm2677_vm13 = vweird.f32 %v3900_v43  ;;  %v2664_v16 = vsel %vm4807_vm2, %v3898_v50, %v2660_v7 }
 0xcb7   :  { %vm2678_vm4 = vmor %vm2676_vm3, %vm2677_vm13  ;;  %v2669_v28 = vsel %vm2666_vm6, %v2668_v18, %v2664_v16 }
 0xcb8   :  { %v2673_v5 = vsub.f32 1.0, %v2672_v2  ;;  %v2670_v31 = vmul.f32 %v4731_v20, %v2669_v28 }
 0xcba   :  { %v2674_v9 = vmul.f32 %v3900_v43, %v2673_v5  ;;  %v4811_v24 = vpop.xlane.xlu2 %2603 }
 0xcbb   :  { %3901 = vrcp.f32 %v4811_v24  ;;  %vm2751_vm12 = vweird.f32 %v4811_v24  ;;  %v2757_v4 = vand.u32 2147483648, %v4811_v24 }
 0xcbc   :  { %v2675_v48 = vadd.f32 %v3900_v43, %v2674_v9  ;;  %v2755_v9 = vand.u32 2147483647, %v4811_v24 }
 0xcbe   :  { %v2679_v17 = vsel %vm2678_vm4, %v3900_v43, %v2675_v48  ;;  %vm2756_vm6 = vcmp.eq.f32.partialorder %v2755_v9, 8.507059e+37 }
 0xcbf   :  { %v2684_v57 = vsel %vm2681_vm5, %v2683_v15, %v2679_v17 }
 0xcc0   :  { %v2685_v3 = vmul.f32 %v4735_v46, %v2684_v57 }
 0xcc1   :  { %v4819_v45 = vpop.eup %3901 }
 0xcc2   :  { %v2601_v34 = vpop.xlane.xlu1 %2600  ;;  %3680 = vmatpush.xpose.msk.msra.mxu0 %vm778_vm15, %v2685_v3  ;;  %v2747_v10 = vmul.f32 %v4819_v45, %v4811_v24  ;;  %vm2752_vm14 = vweird.f32 %v4819_v45 }
 0xcc3   :  { %3903 = vrcp.f32 %v2601_v34  ;;  %v2742_v59 = vand.u32 2147483648, %v2601_v34  ;;  %v2740_v39 = vand.u32 2147483647, %v2601_v34  ;;  %vm2736_vm8 = vweird.f32 %v2601_v34  ;;  %vm4841_vm13 = vmor %vm2751_vm12, %vm2752_vm14 }
 0xcc4   :  { %v2748_v20 = vsub.f32 1.0, %v2747_v10 }
 0xcc5   :  { %v2743_v22 = vor.u32 1.1754944e-38, %v2742_v59  ;;  %vm2741_vm10 = vcmp.eq.f32.partialorder %v2740_v39, 8.507059e+37 }
 0xcc6   :  { %3681 = vmatpush.xpose.msk.msra.mxu0 %vm778_vm15, %v2670_v31  ;;  %v2749_v49 = vmul.f32 %v4819_v45, %v2748_v20 }
 0xcc8   :  { %v2750_v43 = vadd.f32 %v4819_v45, %v2749_v49 }
 0xcc9   :  { %v3904_v62 = vpop.eup %3903  ;;  %3682 = vmatmul.msk.f32.vlgmr.msra.gmra.mxu0 %vm778_vm15, %v4631_v11 }
 0xcca   :  { %v2732_v38 = vmul.f32 %v3904_v62, %v2601_v34  ;;  %v2607_v46 = vpop.xlane.xlu0 %2606  ;;  %v4826_v44 = vpop.xlane.xlu1 %2597  ;;  %vm2737_vm7 = vweird.f32 %v3904_v62  ;;  %v2754_v24 = vsel %vm4841_vm13, %v4819_v45, %v2750_v43  ;;  %v2758_v34 = vor.u32 1.1754944e-38, %v2757_v4 }
 0xccb   :  { %3905 = vrcp.f32 %v2607_v46  ;;  %vm2738_vm9 = vmor %vm2736_vm8, %vm2737_vm7  ;;  %v2772_v63 = vand.u32 2147483648, %v2607_v46  ;;  %v2770_v7 = vand.u32 2147483647, %v2607_v46  ;;  %vm2766_vm1 = vweird.f32 %v2607_v46 }
 0xccc   :  { %v2733_v42 = vsub.f32 1.0, %v2732_v38  ;;  %3907 = vrcp.f32 %v4826_v44  ;;  %v2725_v16 = vand.u32 2147483647, %v4826_v44  ;;  %vm2721_vm5 = vweird.f32 %v4826_v44 }
 0xccd   :  { %v2773_v15 = vor.u32 1.1754944e-38, %v2772_v63  ;;  %vm2771_vm4 = vcmp.eq.f32.partialorder %v2770_v7, 8.507059e+37 }
 0xcce   :  { %v2734_v29 = vmul.f32 %v3904_v62, %v2733_v42  ;;  %vm2726_vm8 = vcmp.eq.f32.partialorder %v2725_v16, 8.507059e+37 }
 0xcd0   :  { %v2735_v0 = vadd.f32 %v3904_v62, %v2734_v29 }
 0xcd1   :  { %v3906_v30 = vpop.eup %3905 }
 0xcd2   :  { %v3908_v11 = vpop.eup %3907  ;;  %v2739_v51 = vsel %vm2738_vm9, %v3904_v62, %v2735_v0  ;;  %v2762_v25 = vmul.f32 %v3906_v30, %v2607_v46  ;;  %v4830_v50 = vpop.xlane.xlu2 %2618  ;;  %vm2767_vm11 = vweird.f32 %v3906_v30 }
 0xcd3   :  { %v2744_v54 = vsel %vm2741_vm10, %v2743_v22, %v2739_v51  ;;  %v2717_v41 = vmul.f32 %v3908_v11, %v4826_v44  ;;  %3909 = vrcp.f32 %v4830_v50  ;;  %vm2722_vm2 = vweird.f32 %v3908_v11  ;;  %vm2768_vm3 = vmor %vm2766_vm1, %vm2767_vm11 }
 0xcd4   :  { %v2763_v60 = vsub.f32 1.0, %v2762_v25  ;;  %v2745_v5 = vmul.f32 %v4747_v6, %v2744_v54  ;;  %v2727_v6 = vand.u32 2147483648, %v4826_v44  ;;  %vm2723_vm7 = vmor %vm2721_vm5, %vm2722_vm2  ;;  %v2832_v46 = vand.u32 2147483648, %v4830_v50 }
 0xcd5   :  { %v2718_v2 = vsub.f32 1.0, %v2717_v41  ;;  %v2759_v44 = vsel %vm2756_vm6, %v2758_v34, %v2754_v24  ;;  %v2830_v20 = vand.u32 2147483647, %v4830_v50  ;;  %vm2826_vm10 = vweird.f32 %v4830_v50 }
 0xcd6   :  { %v2764_v53 = vmul.f32 %v3906_v30, %v2763_v60  ;;  %3686 = vmatpush.xpose.msk.msrb.mxu3 %vm778_vm15, %v2745_v5  ;;  %v2728_v31 = vor.u32 1.1754944e-38, %v2727_v6  ;;  %v2833_v49 = vor.u32 1.1754944e-38, %v2832_v46 }
 0xcd7   :  { %v2719_v12 = vmul.f32 %v3908_v11, %v2718_v2  ;;  %vm2831_vm11 = vcmp.eq.f32.partialorder %v2830_v20, 8.507059e+37 }
 0xcd8   :  { %v2765_v35 = vadd.f32 %v3906_v30, %v2764_v53 }
 0xcd9   :  { %v3910_v48 = vpop.eup %3909  ;;  %v2720_v17 = vadd.f32 %v3908_v11, %v2719_v12 }
 0xcda   :  { %v2769_v18 = vsel %vm2768_vm3, %v3906_v30, %v2765_v35  ;;  %v2822_v57 = vmul.f32 %v3910_v48, %v4830_v50  ;;  %v4852_v3 = vpop.xlane.xlu2 %2621  ;;  %vm2827_vm9 = vweird.f32 %v3910_v48 }
 0xcdb   :  { %v2774_v28 = vsel %vm2771_vm4, %v2773_v15, %v2769_v18  ;;  %3911 = vrcp.f32 %v4852_v3  ;;  %v2724_v38 = vsel %vm2723_vm7, %v3908_v11, %v2720_v17  ;;  %vm2828_vm14 = vmor %vm2826_vm10, %vm2827_vm9  ;;  %vm2841_vm4 = vweird.f32 %v4852_v3 }
 0xcdc   :  { %v2823_v62 = vsub.f32 1.0, %v2822_v57  ;;  %v2613_v10 = vpop.xlane.xlu1 %2612  ;;  %v2775_v45 = vmul.f32 %v4754_v52, %v2774_v28  ;;  %v2729_v59 = vsel %vm2726_vm8, %v2728_v31, %v2724_v38  ;;  %v2760_v52 = vmul.f32 %v4741_v36, %v2759_v44 }
 0xcdd   :  { %3913 = vrcp.f32 %v2613_v10  ;;  %v2730_v29 = vmul.f32 %v4751_v40, %v2729_v59  ;;  %v2802_v60 = vand.u32 2147483648, %v2613_v10  ;;  %v2800_v7 = vand.u32 2147483647, %v2613_v10 }
 0xcde   :  { %v2824_v42 = vmul.f32 %v3910_v48, %v2823_v62  ;;  %3689 = vmatpush.xpose.msk.msrb.mxu0 %vm778_vm15, %v2775_v45  ;;  %vm2796_vm13 = vweird.f32 %v2613_v10  ;;  %v2847_v35 = vand.u32 2147483648, %v4852_v3  ;;  %v2845_v15 = vand.u32 2147483647, %v4852_v3 }
 0xcdf   :  { %v2625_v39 = vpop.xlane.xlu0 %2624  ;;  %3687 = vmatpush.xpose.msk.msrb.mxu3 %vm778_vm15, %v2730_v29  ;;  %vm2801_vm5 = vcmp.eq.f32.partialorder %v2800_v7, 8.507059e+37 }
 0xce0   :  { %v2825_v0 = vadd.f32 %v3910_v48, %v2824_v42  ;;  %3915 = vrcp.f32 %v2625_v39  ;;  %v2862_v9 = vand.u32 2147483648, %v2625_v39  ;;  %v2860_v47 = vand.u32 2147483647, %v2625_v39 }
 0xce1   :  { %v4863_v30 = vpop.eup %3911  ;;  %vm2856_vm7 = vweird.f32 %v2625_v39  ;;  %vm2846_vm10 = vcmp.eq.f32.partialorder %v2845_v15, 8.507059e+37 }
 0xce2   :  { %v2829_v22 = vsel %vm2828_vm14, %v3910_v48, %v2825_v0  ;;  %v2837_v11 = vmul.f32 %v4863_v30, %v4852_v3  ;;  %3690 = vmatpush.xpose.msk.msrb.mxu0 %vm778_vm15, %v2760_v52  ;;  %3688 = vmatmul.msk.f32.vlgmr.msrb.gmra.mxu3 %vm778_vm15, %v4640_v8  ;;  %vm2842_vm1 = vweird.f32 %v4863_v30  ;;  %v2863_v18 = vor.u32 1.1754944e-38, %v2862_v9 }
 0xce3   :  { %v3914_v40 = vpop.eup %3913  ;;  %v2834_v51 = vsel %vm2831_vm11, %v2833_v49, %v2829_v22  ;;  %vm4883_vm6 = vmor %vm2841_vm4, %vm2842_vm1  ;;  %vm2861_vm9 = vcmp.eq.f32.partialorder %v2860_v47, 8.507059e+37 }
 0xce4   :  { %v2838_v25 = vsub.f32 1.0, %v2837_v11  ;;  %v2792_v50 = vmul.f32 %v3914_v40, %v2613_v10  ;;  %v2835_v36 = vmul.f32 %v4761_v61, %v2834_v51  ;;  %vm2797_vm12 = vweird.f32 %v3914_v40 }
 0xce5   :  { %3691 = vmatmul.msk.f32.vlgmr.msrb.gmra.mxu0 %vm778_vm15, %v4633_v55  ;;  %v2803_v61 = vor.u32 1.1754944e-38, %v2802_v60  ;;  %vm2798_vm2 = vmor %vm2796_vm13, %vm2797_vm12  ;;  %v2848_v10 = vor.u32 1.1754944e-38, %v2847_v35  ;;  %v3701_v60 = vld [vmem:[%s5099_s4 + $0x20] sm:$0xff] }
 0xce6   :  { %v3916_v54 = vpop.eup %3915  ;;  %v2793_v41 = vsub.f32 1.0, %v2792_v50  ;;  %3695 = vmatpush.xpose.msk.msra.mxu2 %vm778_vm15, %v2835_v36  ;;  %v2839_v43 = vmul.f32 %v4863_v30, %v2838_v25 }
 0xce7   :  { %v2852_v63 = vmul.f32 %v3916_v54, %v2625_v39  ;;  %v2610_v2 = vpop.xlane.xlu0 %2609  ;;  %v4876_v5 = vpop.xlane.xlu1 %2615  ;;  %vm2857_vm3 = vweird.f32 %v3916_v54 }
 0xce8   :  { %v2794_v53 = vmul.f32 %v3914_v40, %v2793_v41  ;;  %3917 = vrcp.f32 %v2610_v2  ;;  %v2840_v4 = vadd.f32 %v4863_v30, %v2839_v43  ;;  %vm2858_vm8 = vmor %vm2856_vm7, %vm2857_vm3  ;;  %v2787_v44 = vand.u32 2147483648, %v2610_v2 }
 0xce9   :  { %v2853_v8 = vsub.f32 1.0, %v2852_v63  ;;  %3919 = vrcp.f32 %v4876_v5  ;;  %v2785_v59 = vand.u32 2147483647, %v2610_v2  ;;  %v2817_v29 = vand.u32 2147483648, %v4876_v5 }
 0xcea   :  { %v2795_v55 = vadd.f32 %v3914_v40, %v2794_v53  ;;  %v2844_v62 = vsel %vm4883_vm6, %v4863_v30, %v2840_v4  ;;  %v2815_v0 = vand.u32 2147483647, %v4876_v5  ;;  %vm2781_vm12 = vweird.f32 %v2610_v2 }
 0xceb   :  { %v2854_v12 = vmul.f32 %v3916_v54, %v2853_v8  ;;  %v2849_v42 = vsel %vm2846_vm10, %v2848_v10, %v2844_v62  ;;  %vm2811_vm1 = vweird.f32 %v4876_v5  ;;  %v2818_v22 = vor.u32 1.1754944e-38, %v2817_v29 }
 0xcec   :  { %v2799_v6 = vsel %vm2798_vm2, %v3914_v40, %v2795_v55  ;;  %v2850_v30 = vmul.f32 %v4767_v13, %v2849_v42  ;;  %vm2786_vm2 = vcmp.eq.f32.partialorder %v2785_v59, 8.507059e+37  ;;  %vm2816_vm4 = vcmp.eq.f32.partialorder %v2815_v0, 8.507059e+37  ;;  %v3752_v55 = vld [vmem:[%s5100_s5 + $0x1] ss:$0 sm:$0xff] }
 0xced   :  { %v2804_v17 = vsel %vm2801_vm5, %v2803_v61, %v2799_v6  ;;  %v2855_v16 = vadd.f32 %v3916_v54, %v2854_v12 }
 0xcee   :  { %v3918_v24 = vpop.eup %3917  ;;  %v2805_v57 = vmul.f32 %v4772_v37, %v2804_v17 }
 0xcef   :  { %v3920_v34 = vpop.eup %3919  ;;  %v2859_v28 = vsel %vm2858_vm8, %v3916_v54, %v2855_v16  ;;  %v2777_v31 = vmul.f32 %v3918_v24, %v2610_v2  ;;  %vm2782_vm14 = vweird.f32 %v3918_v24 }
 0xcf0   :  { %v2864_v38 = vsel %vm2861_vm9, %v2863_v18, %v2859_v28  ;;  %v2807_v3 = vmul.f32 %v3920_v34, %v4876_v5  ;;  %3692 = vmatpush.xpose.msk.msra.mxu1 %vm778_vm15, %v2805_v57  ;;  %vm2812_vm11 = vweird.f32 %v3920_v34  ;;  %vm2783_vm13 = vmor %vm2781_vm12, %vm2782_vm14 }
 0xcf1   :  { %v2778_v45 = vsub.f32 1.0, %v2777_v31  ;;  %v2865_v46 = vmul.f32 %v4777_v21, %v2864_v38  ;;  %v2788_v21 = vor.u32 1.1754944e-38, %v2787_v44  ;;  %vm2813_vm3 = vmor %vm2811_vm1, %vm2812_vm11 }
 0xcf2   :  { %v2808_v37 = vsub.f32 1.0, %v2807_v3 }
 0xcf3   :  { %v2779_v20 = vmul.f32 %v3918_v24, %v2778_v45  ;;  %3698 = vmatpush.xpose.msk.msra.mxu3 %vm778_vm15, %v2865_v46 }
 0xcf4   :  { %v2809_v39 = vmul.f32 %v3920_v34, %v2808_v37 }
 0xcf5   :  { %v2780_v52 = vadd.f32 %v3918_v24, %v2779_v20 }
 0xcf6   :  { %v2810_v49 = vadd.f32 %v3920_v34, %v2809_v39 }
 0xcf7   :  { %3699 = vmatpush.xpose.msk.msra.mxu3 %vm778_vm15, %v2850_v30  ;;  %v2784_v11 = vsel %vm2783_vm13, %v3918_v24, %v2780_v52  ;;  %v3715_v30 = vld [vmem:[%s5103_s8 + $0x38] sm:$0xff] }
 0xcf8   :  { %v2789_v40 = vsel %vm2786_vm2, %v2788_v21, %v2784_v11  ;;  %v2814_v51 = vsel %vm2813_vm3, %v3920_v34, %v2810_v49  ;;  %v3714_v21 = vld [vmem:[%s5103_s8 + $0x30] sm:$0xff]  ;;  %v3713_v49 = vld [vmem:[%s5103_s8 + $0x28] sm:$0xff] }
 0xcf9   :  { %v2790_v25 = vmul.f32 %v4781_v27, %v2789_v40  ;;  %v2819_v50 = vsel %vm2816_vm4, %v2818_v22, %v2814_v51  ;;  %v3712_v22 = vld [vmem:[%s5103_s8 + $0x20] sm:$0xff] }
 0xcfa   :  { %3700 = vmatmul.msk.f32.vlgmr.msra.gmra.mxu3 %vm778_vm15, %v4647_v1  ;;  %v2820_v13 = vmul.f32 %v4783_v23, %v2819_v50  ;;  %v3704_v23 = vld [vmem:[%s5099_s4 + $0x38] sm:$0xff] }
 0xcfb   :  { %3693 = vmatpush.xpose.msk.msra.mxu1 %vm778_vm15, %v2790_v25  ;;  %3191 = vmatpush.msra.mxu0 %v3704_v23 }
 0xcfc   :  { %3696 = vmatpush.xpose.msk.msra.mxu2 %vm778_vm15, %v2820_v13 }
 0xcfe   :  { %3694 = vmatmul.msk.f32.vlgmr.msra.gmra.mxu1 %vm778_vm15, %v4638_v58  ;;  %v3703_v58 = vld [vmem:[%s5099_s4 + $0x30] sm:$0xff] }
 0xcff   :  { %3697 = vmatmul.msk.f32.vlgmr.msra.gmra.mxu2 %vm778_vm15, %v4643_v26  ;;  %v3702_v26 = vld [vmem:[%s5099_s4 + $0x28] sm:$0xff]  ;;  %3192 = vmatpush.msra.mxu0 %v3703_v58 }
 0xd00   :  { %3361 = vmatpush.msrb.mxu1 %v3715_v30 }
 0xd01   :  { %3193 = vmatpush.msra.mxu0 %v3702_v26 }
 0xd02   :  { %3362 = vmatpush.msrb.mxu1 %v3714_v21 }
 0xd03   :  { %3194 = vmatpush.msra.mxu0 %v3701_v60  ;;  %v3753_v60 = vld [vmem:[%s5101_s6 + $0x1] ss:$0 sm:$0xff] }
 0xd04   :  { %3363 = vmatpush.msrb.mxu1 %v3713_v49 }
 0xd06   :  { %3364 = vmatpush.msrb.mxu1 %v3712_v22 }
 0xd23   :  { %v2892_v36 = vpop.f32.mrf.mxu2 }
 0xd24   :  { %3098 = vxpose.xlu1.b32.start [1/4] (short) (narrow) %v2892_v36, 16 }
 0xd33   :  { %v2950_v27 = vpop.f32.mrf.mxu2 }
 0xd46   :  { %v2921_v54 = vpop.f32.mrf.mxu0 }
 0xd47   :  { %3099 = vxpose.xlu1.b32.cont [2/4] (short) (narrow) %v2921_v54, 16 }
 0xd4f   :  { %3100 = vxpose.xlu1.b32.cont [3/4] (short) (narrow) %v2950_v27, 16 }
 0xd62   :  { %v3008_v41 = vpop.f32.mrf.mxu0 }
 0xd63   :  { %3130 = vxpose.xlu0.b32.start [1/4] (short) (narrow) %v3008_v41, 16 }
 0xd65   :  { %v2979_v1 = vpop.f32.mrf.mxu3 }
 0xd66   :  { %3101 = vxpose.xlu1.b32.end [4/4] (short) (narrow) %v2979_v1, 16 }
 0xd7b   :  { %v3037_v43 = vpop.f32.mrf.mxu1 }
 0xd7c   :  { %3131 = vxpose.xlu0.b32.cont [2/4] (short) (narrow) %v3037_v43, 16 }
 0xd7d   :  { %v3095_v2 = vpop.f32.mrf.mxu3 }
 0xd82   :  { %v3066_v63 = vpop.f32.mrf.mxu2 }
 0xd84   :  { %3132 = vxpose.xlu0.b32.cont [3/4] (short) (narrow) %v3066_v63, 16 }
 0xd8c   :  { %3133 = vxpose.xlu0.b32.end [4/4] (short) (narrow) %v3095_v2, 16 }
 0xdf2   :  { %v3114_v5 = vpop.trf.xlu1 }
 0xdf3   :  { %3705 = vmatmul.msk.f32.vlgmr.msra.gmra.mxu0 %vm54_vm0, %v3114_v5  ;;  %v3754_v5 = vld [vmem:[%s5102_s7 + $0x1] ss:$0 sm:$0xff] }
 0xdfa   :  { %v3115_v53 = vpop.trf.xlu1 }
 0xdfb   :  { %3706 = vmatmul.msk.f32.gmra.mxu0 %vm54_vm0, %v3115_v53 }
 0xe18   :  { %v3146_v7 = vpop.trf.xlu0 }
 0xe19   :  { %3707 = vmatmul.msk.f32.gmra.mxu0 %vm54_vm0, %v3146_v7 }
 0xe20   :  { %v3147_v8 = vpop.trf.xlu0 }
 0xe21   :  { %3708 = vmatmul.msk.f32.gmra.mxu0 %vm54_vm0, %v3147_v8 }
 0xe70   :  { %v3196_v61 = vpop.f32.mrf.mxu0 }
 0xe71   :  { %v3208_v9 = vadd.f32 %v3196_v61, %v4562_v33 }
 0xe73   :  { %v4931_v4 = vadd.f32 %v3752_v55, %v3208_v9 }
 0xe75   :  { %v3225_v12 = vsel %vm54_vm0, %v4931_v4, 0.0 }
 0xe76   :  { %3226 = vadd.xlane.f32.xlu2 %v3225_v12 }
 0xe78   :  { %v3199_v47 = vpop.f32.mrf.mxu0 }
 0xe79   :  { %v3209_v35 = vadd.f32 %v3199_v47, %v4567_v56 }
 0xe7b   :  { %v4936_v6 = vadd.f32 %v3752_v55, %v3209_v35 }
 0xe7d   :  { %v3228_v48 = vsel %vm54_vm0, %v4936_v6, 0.0 }
 0xe7e   :  { %3229 = vadd.xlane.f32.xlu2 %v3228_v48 }
 0xe96   :  { %v3202_v15 = vpop.f32.mrf.mxu0 }
 0xe97   :  { %v3210_v17 = vadd.f32 %v3202_v15, %v4572_v32 }
 0xe99   :  { %v4941_v16 = vadd.f32 %v3752_v55, %v3210_v17 }
 0xe9b   :  { %v3231_v33 = vsel %vm54_vm0, %v4941_v16, 0.0 }
 0xe9c   :  { %3232 = vadd.xlane.f32.xlu2 %v3231_v33  ;;  %v3736_v33 = vld [vmem:[%s5105_s10 + $0xf8] sm:$0xff] }
 0xe9d   :  { %3431 = vmatpush.msrb.mxu2 %v3736_v33 }
 0xe9e   :  { %v3205_v24 = vpop.f32.mrf.mxu0 }
 0xe9f   :  { %v3211_v18 = vadd.f32 %v3205_v24, %v4577_v19  ;;  %v3735_v24 = vld [vmem:[%s5105_s10 + $0xf0] sm:$0xff] }
 0xea0   :  { %3432 = vmatpush.msrb.mxu2 %v3735_v24 }
 0xea1   :  { %v4946_v57 = vadd.f32 %v3752_v55, %v3211_v18  ;;  %v3734_v18 = vld [vmem:[%s5105_s10 + $0xe8] sm:$0xff] }
 0xea2   :  { %3433 = vmatpush.msrb.mxu2 %v3734_v18 }
 0xea3   :  { %v3234_v56 = vsel %vm54_vm0, %v4946_v57, 0.0 }
 0xea4   :  { %3235 = vadd.xlane.f32.xlu2 %v3234_v56 }
 0xee9   :  { %v3227_v34 = vpop.xlane.xlu2 %3226 }
 0xeea   :  { %v3237_v28 = vmul.f32 %v3227_v34, %v4070_v14 }
 0xeec   :  { %v3241_v32 = vsub.f32 %v4931_v4, %v3237_v28 }
 0xeee   :  { %v3245_v31 = vmul.f32 %v3241_v32, %v3241_v32 }
 0xef0   :  { %v3249_v62 = vsel %vm54_vm0, %v3245_v31, 0.0 }
 0xef1   :  { %v3230_v10 = vpop.xlane.xlu2 %3229  ;;  %3250 = vadd.xlane.f32.xlu2 %v3249_v62 }
 0xef2   :  { %v3238_v38 = vmul.f32 %v3230_v10, %v4070_v14 }
 0xef4   :  { %v3242_v19 = vsub.f32 %v4936_v6, %v3238_v38 }
 0xef6   :  { %v3246_v3 = vmul.f32 %v3242_v19, %v3242_v19 }
 0xef8   :  { %v3252_v45 = vsel %vm54_vm0, %v3246_v3, 0.0 }
 0xef9   :  { %3253 = vadd.xlane.f32.xlu2 %v3252_v45 }
 0xf0f   :  { %v3233_v46 = vpop.xlane.xlu2 %3232 }
 0xf10   :  { %v3239_v44 = vmul.f32 %v3233_v46, %v4070_v14 }
 0xf12   :  { %v4958_v37 = vsub.f32 %v4941_v16, %v3239_v44 }
 0xf14   :  { %v3247_v42 = vmul.f32 %v4958_v37, %v4958_v37 }
 0xf16   :  { %v3255_v20 = vsel %vm54_vm0, %v3247_v42, 0.0 }
 0xf17   :  { %3256 = vadd.xlane.f32.xlu2 %v3255_v20  ;;  %v3236_v59 = vpop.xlane.xlu2 %3235 }
 0xf18   :  { %v3240_v29 = vmul.f32 %v3236_v59, %v4070_v14 }
 0xf1a   :  { %v4965_v39 = vsub.f32 %v4946_v57, %v3240_v29 }
 0xf1c   :  { %v3248_v0 = vmul.f32 %v4965_v39, %v4965_v39 }
 0xf1e   :  { %v3258_v52 = vsel %vm54_vm0, %v3248_v0, 0.0 }
 0xf1f   :  { %3259 = vadd.xlane.f32.xlu2 %v3258_v52 }
 0xf64   :  { %v3251_v11 = vpop.xlane.xlu2 %3250 }
 0xf65   :  { %v3261_v40 = vmul.f32 %v3251_v11, %v4070_v14  ;;  %v3732_v11 = vld [vmem:[%s5105_s10 + $0xd8] sm:$0xff] }
 0xf67   :  { %v3265_v51 = vadd.f32 1e-05, %v3261_v40  ;;  %v3731_v40 = vld [vmem:[%s5105_s10 + $0xd0] sm:$0xff] }
 0xf69   :  { %3921 = vrsqrt.f32 %v3265_v51  ;;  %vm3275_vm5 = vweird.f32 %v3265_v51 }
 0xf6c   :  { %v3254_v25 = vpop.xlane.xlu2 %3253 }
 0xf6d   :  { %v3262_v50 = vmul.f32 %v3254_v25, %v4070_v14  ;;  %v3728_v25 = vld [vmem:[%s5105_s10 + $0xb8] sm:$0xff] }
 0xf6f   :  { %v3922_v13 = vpop.eup %3921  ;;  %v3266_v36 = vadd.f32 1e-05, %v3262_v50  ;;  %v3727_v50 = vld [vmem:[%s5105_s10 + $0xb0] sm:$0xff] }
 0xf70   :  { %v3270_v54 = vmul.f32 %v3922_v13, %v3265_v51  ;;  %vm3276_vm15 = vweird.f32 %v3922_v13  ;;  %v3729_v51 = vld [vmem:[%s5105_s10 + $0xc0] sm:$0xff] }
 0xf71   :  { %3923 = vrsqrt.f32 %v3266_v36  ;;  %vm3277_vm6 = vmor %vm3275_vm5, %vm3276_vm15  ;;  %vm3285_vm8 = vweird.f32 %v3266_v36 }
 0xf72   :  { %v3271_v27 = vmul.f32 %v3922_v13, %v3270_v54  ;;  %v3724_v54 = vld [vmem:[%s5105_s10 + $0x98] sm:$0xff] }
 0xf74   :  { %v3272_v41 = vmul.f32 0.5, %v3271_v27  ;;  %v3723_v27 = vld [vmem:[%s5105_s10 + $0x90] sm:$0xff] }
 0xf76   :  { %v3273_v1 = vsub.f32 1.5, %v3272_v41  ;;  %v3722_v41 = vld [vmem:[%s5105_s10 + $0x88] sm:$0xff] }
 0xf77   :  { %v3924_v23 = vpop.eup %3923 }
 0xf78   :  { %v3274_v58 = vmul.f32 %v3922_v13, %v3273_v1  ;;  %v3280_v26 = vmul.f32 %v3924_v23, %v3266_v36  ;;  %vm3286_vm7 = vweird.f32 %v3924_v23  ;;  %v3725_v36 = vld [vmem:[%s5105_s10 + $0xa0] sm:$0xff] }
 0xf79   :  { %vm3287_vm9 = vmor %vm3285_vm8, %vm3286_vm7  ;;  %v3721_v1 = vld [vmem:[%s5105_s10 + $0x80] sm:$0xff] }
 0xf7a   :  { %v3278_v43 = vsel %vm3277_vm6, %v3922_v13, %v3274_v58  ;;  %v3281_v63 = vmul.f32 %v3924_v23, %v3280_v26  ;;  %v3726_v13 = vld [vmem:[%s5105_s10 + $0xa8] sm:$0xff] }
 0xf7b   :  { %v3309_v2 = vmul.f32 %v3278_v43, %v3241_v32 }
 0xf7c   :  { %v3282_v53 = vmul.f32 0.5, %v3281_v63 }
 0xf7d   :  { %v3316_v7 = vmul.f32 %v3753_v60, %v3309_v2 }
 0xf7e   :  { %v3283_v8 = vsub.f32 1.5, %v3282_v53 }
 0xf7f   :  { %v3323_v55 = vadd.f32 %v3754_v5, %v3316_v7 }
 0xf80   :  { %v3284_v61 = vmul.f32 %v3924_v23, %v3283_v8 }
 0xf81   :  { %3717 = vmatmul.msk.f32.vlgmr.msrb.gmra.mxu1 %vm54_vm0, %v3323_v55 }
 0xf82   :  { %v3288_v9 = vsel %vm3287_vm9, %v3924_v23, %v3284_v61  ;;  %v3755_v23 = vld [vmem:[%s5104_s9 + $0x1] ss:$0 sm:$0xff] }
 0xf83   :  { %v3310_v12 = vmul.f32 %v3288_v9, %v3242_v19 }
 0xf85   :  { %v3317_v47 = vmul.f32 %v3753_v60, %v3310_v12 }
 0xf87   :  { %v3324_v35 = vadd.f32 %v3754_v5, %v3317_v47 }
 0xf89   :  { %3718 = vmatmul.msk.f32.gmra.mxu1 %vm54_vm0, %v3324_v35 }
 0xf8a   :  { %v3257_v48 = vpop.xlane.xlu2 %3256 }
 0xf8b   :  { %v3263_v15 = vmul.f32 %v3257_v48, %v4070_v14 }
 0xf8d   :  { %v3267_v17 = vadd.f32 1e-05, %v3263_v15 }
 0xf8f   :  { %3925 = vrsqrt.f32 %v3267_v17  ;;  %vm3295_vm14 = vweird.f32 %v3267_v17 }
 0xf92   :  { %v3260_v56 = vpop.xlane.xlu2 %3259 }
 0xf93   :  { %v3264_v34 = vmul.f32 %v3260_v56, %v4070_v14 }
 0xf95   :  { %v3926_v28 = vpop.eup %3925  ;;  %v3268_v32 = vadd.f32 1e-05, %v3264_v34 }
 0xf96   :  { %v3290_v31 = vmul.f32 %v3926_v28, %v3267_v17  ;;  %vm3296_vm10 = vweird.f32 %v3926_v28 }
 0xf97   :  { %3927 = vrsqrt.f32 %v3268_v32  ;;  %vm3297_vm11 = vmor %vm3295_vm14, %vm3296_vm10  ;;  %vm3305_vm13 = vweird.f32 %v3268_v32 }
 0xf98   :  { %v3291_v62 = vmul.f32 %v3926_v28, %v3290_v31 }
 0xf9a   :  { %v3292_v10 = vmul.f32 0.5, %v3291_v62 }
 0xf9c   :  { %v3293_v38 = vsub.f32 1.5, %v3292_v10 }
 0xf9d   :  { %v3928_v19 = vpop.eup %3927 }
 0xf9e   :  { %v3294_v3 = vmul.f32 %v3926_v28, %v3293_v38  ;;  %v3300_v45 = vmul.f32 %v3928_v19, %v3268_v32  ;;  %vm3306_vm12 = vweird.f32 %v3928_v19 }
 0xf9f   :  { %vm3307_vm1 = vmor %vm3305_vm13, %vm3306_vm12 }
 0xfa0   :  { %v3298_v46 = vsel %vm3297_vm11, %v3926_v28, %v3294_v3  ;;  %v3301_v44 = vmul.f32 %v3928_v19, %v3300_v45 }
 0xfa1   :  { %v3311_v42 = vmul.f32 %v3298_v46, %v4958_v37  ;;  %v3733_v37 = vld [vmem:[%s5105_s10 + $0xe0] sm:$0xff] }
 0xfa2   :  { %v3302_v20 = vmul.f32 0.5, %v3301_v44  ;;  %3434 = vmatpush.msrb.mxu2 %v3733_v37 }
 0xfa3   :  { %v3318_v59 = vmul.f32 %v3753_v60, %v3311_v42 }
 0xfa4   :  { %v3303_v29 = vsub.f32 1.5, %v3302_v20  ;;  %3435 = vmatpush.msrb.mxu2 %v3732_v11 }
 0xfa5   :  { %v3325_v0 = vadd.f32 %v3754_v5, %v3318_v59 }
 0xfa6   :  { %v3304_v52 = vmul.f32 %v3928_v19, %v3303_v29  ;;  %3436 = vmatpush.msrb.mxu2 %v3731_v40 }
 0xfa7   :  { %3719 = vmatmul.msk.f32.gmra.mxu1 %vm54_vm0, %v3325_v0 }
 0xfa8   :  { %v3308_v30 = vsel %vm3307_vm1, %v3928_v19, %v3304_v52 }
 0xfa9   :  { %v3312_v21 = vmul.f32 %v3308_v30, %v4965_v39  ;;  %v3730_v39 = vld [vmem:[%s5105_s10 + $0xc8] sm:$0xff] }
 0xfaa   :  { %3437 = vmatpush.msrb.mxu2 %v3730_v39 }
 0xfab   :  { %v3319_v49 = vmul.f32 %v3753_v60, %v3312_v21 }
 0xfac   :  { %3438 = vmatpush.msrb.mxu2 %v3729_v51 }
 0xfad   :  { %v3326_v22 = vadd.f32 %v3754_v5, %v3319_v49 }
 0xfae   :  { %3439 = vmatpush.msrb.mxu2 %v3728_v25 }
 0xfaf   :  { %3720 = vmatmul.msk.f32.gmra.mxu1 %vm54_vm0, %v3326_v22  ;;  %v3756_v22 = vld [vmem:[%s5106_s11 + $0x1] ss:$0 sm:$0xff] }
 0xfb0   :  { %3440 = vmatpush.msrb.mxu2 %v3727_v50 }
 0xfb2   :  { %3441 = vmatpush.msrb.mxu2 %v3726_v13 }
 0xfb4   :  { %3442 = vmatpush.msrb.mxu2 %v3725_v36 }
 0xfb6   :  { %3443 = vmatpush.msrb.mxu2 %v3724_v54 }
 0xfb8   :  { %3444 = vmatpush.msrb.mxu2 %v3723_v27 }
 0xfba   :  { %3445 = vmatpush.msrb.mxu2 %v3722_v41 }
 0xfbc   :  { %3446 = vmatpush.msrb.mxu2 %v3721_v1 }
 0xffe   :  { %v3366_v58 = vpop.f32.mrf.mxu1 }
 0xfff   :  { %v3367_v26 = vadd.f32 %v3755_v23, %v3366_v58 }
0x1001   :  { %v3378_v60 = vmul.f32 %v3367_v26, %v3367_v26 }
0x1003   :  { %v3382_v43 = vmul.f32 %v3378_v60, %v3367_v26 }
0x1005   :  { %v3386_v63 = vmul.f32 0.044715, %v3382_v43 }
0x1006   :  { %v3369_v2 = vpop.f32.mrf.mxu1 }
0x1007   :  { %v3390_v5 = vadd.f32 %v3386_v63, %v3367_v26  ;;  %v3370_v53 = vadd.f32 %v3755_v23, %v3369_v2 }
0x1009   :  { %v3394_v7 = vmul.f32 0.7978846, %v3390_v5  ;;  %v3379_v8 = vmul.f32 %v3370_v53, %v3370_v53 }
0x100b   :  { %3929 = vtanh.f32 %v3394_v7  ;;  %v3383_v55 = vmul.f32 %v3379_v8, %v3370_v53 }
0x100d   :  { %v3387_v61 = vmul.f32 0.044715, %v3383_v55 }
0x100f   :  { %v3391_v9 = vadd.f32 %v3387_v61, %v3370_v53 }
0x1011   :  { %v3930_v12 = vpop.eup %3929  ;;  %v3395_v47 = vmul.f32 0.7978846, %v3391_v9 }
0x1012   :  { %v3402_v35 = vadd.f32 1.0, %v3930_v12 }
0x1013   :  { %3931 = vtanh.f32 %v3395_v47 }
0x1014   :  { %v3406_v48 = vmul.f32 0.5, %v3402_v35 }
0x1016   :  { %v3410_v15 = vmul.f32 %v3406_v48, %v3367_v26 }
0x1018   :  { %3447 = vmatmul.f32.vlgmr.msrb.gmra.mxu2 %v3410_v15 }
0x1019   :  { %v3932_v17 = vpop.eup %3931 }
0x101a   :  { %v3403_v33 = vadd.f32 1.0, %v3932_v17 }
0x101c   :  { %v3407_v24 = vmul.f32 0.5, %v3403_v33 }
0x101e   :  { %v3411_v18 = vmul.f32 %v3407_v24, %v3370_v53 }
0x1020   :  { %3450 = vmatmul.f32.gmra.mxu2 %v3411_v18 }
0x1024   :  { %v3372_v56 = vpop.f32.mrf.mxu1 }
0x1025   :  { %v3373_v34 = vadd.f32 %v3755_v23, %v3372_v56 }
0x1027   :  { %v3380_v28 = vmul.f32 %v3373_v34, %v3373_v34 }
0x1029   :  { %v3384_v32 = vmul.f32 %v3380_v28, %v3373_v34 }
0x102b   :  { %v3388_v31 = vmul.f32 0.044715, %v3384_v32 }
0x102c   :  { %v3375_v62 = vpop.f32.mrf.mxu1 }
0x102d   :  { %v3376_v10 = vadd.f32 %v3755_v23, %v3375_v62  ;;  %v3392_v38 = vadd.f32 %v3388_v31, %v3373_v34 }
0x102f   :  { %v3381_v19 = vmul.f32 %v3376_v10, %v3376_v10  ;;  %v3396_v3 = vmul.f32 0.7978846, %v3392_v38 }
0x1031   :  { %v3385_v45 = vmul.f32 %v3381_v19, %v3376_v10  ;;  %3933 = vtanh.f32 %v3396_v3 }
0x1033   :  { %v3389_v46 = vmul.f32 0.044715, %v3385_v45  ;;  %v3757_v45 = vld [vmem:[%s5107_s12] ss:$0 sm:$0xff]  ;;  %s3976_s12 = smov [#allocation2]  }
0x1035   :  { %v3393_v44 = vadd.f32 %v3389_v46, %v3376_v10 }
0x1037   :  { %v3934_v42 = vpop.eup %3933  ;;  %v3397_v20 = vmul.f32 0.7978846, %v3393_v44 }
0x1038   :  { %v3404_v59 = vadd.f32 1.0, %v3934_v42  ;;  %v3758_v42 = vld [vmem:[%s5108_s13] ss:$0 sm:$0xff]  ;;  %s3585_s13 = sshll.u32 %s3976_s12, 4  ;;  %s3586_s13 = int_to_ptr.vmem [resolvable:$true] %s3585_s13 }
0x1039   :  { %3935 = vtanh.f32 %v3397_v20 }
0x103a   :  { %v3408_v29 = vmul.f32 0.5, %v3404_v59 }
0x103c   :  { %v3412_v0 = vmul.f32 %v3408_v29, %v3373_v34 }
0x103e   :  { %3453 = vmatmul.f32.gmra.mxu2 %v3412_v0 }
0x103f   :  { %v3936_v52 = vpop.eup %3935 }
0x1040   :  { %v3405_v30 = vadd.f32 1.0, %v3936_v52 }
0x1042   :  { %v3409_v21 = vmul.f32 0.5, %v3405_v30 }
0x1044   :  { %v3413_v49 = vmul.f32 %v3409_v21, %v3376_v10 }
0x1046   :  { %3456 = vmatmul.f32.gmra.mxu2 %v3413_v49 }
0x109b   :  { %v3448_v37 = vpop.f32.mrf.mxu2 }
0x109c   :  { %v3460_v11 = vadd.f32 %v3448_v37, %v4931_v4 }
0x109e   :  { %v3469_v40 = vadd.f32 %v3756_v22, %v3460_v11 }
0x10a0   :  { %v3475_v39 = vsel %vm54_vm0, %v3469_v40, 0.0 }
0x10a1   :  { %3476 = vadd.xlane.f32.xlu2 %v3475_v39 }
0x10a3   :  { %v3451_v51 = vpop.f32.mrf.mxu2 }
0x10a4   :  { %v3461_v25 = vadd.f32 %v3451_v51, %v4936_v6 }
0x10a6   :  { %v3470_v50 = vadd.f32 %v3756_v22, %v3461_v25 }
0x10a8   :  { %v3478_v13 = vsel %vm54_vm0, %v3470_v50, 0.0 }
0x10a9   :  { %3479 = vadd.xlane.f32.xlu0 %v3478_v13 }
0x10c1   :  { %v3454_v36 = vpop.f32.mrf.mxu2 }
0x10c2   :  { %v3462_v54 = vadd.f32 %v3454_v36, %v4941_v16 }
0x10c4   :  { %v3471_v27 = vadd.f32 %v3756_v22, %v3462_v54 }
0x10c6   :  { %v3481_v41 = vsel %vm54_vm0, %v3471_v27, 0.0 }
0x10c7   :  { %3482 = vadd.xlane.f32.xlu2 %v3481_v41 }
0x10c9   :  { %v3457_v1 = vpop.f32.mrf.mxu2 }
0x10ca   :  { %v3463_v4 = vadd.f32 %v3457_v1, %v4946_v57 }
0x10cc   :  { %v3472_v23 = vadd.f32 %v3756_v22, %v3463_v4 }
0x10ce   :  { %v3484_v58 = vsel %vm54_vm0, %v3472_v23, 0.0 }
0x10cf   :  { %3485 = vadd.xlane.f32.xlu1 %v3484_v58 }
0x1114   :  { %v3477_v26 = vpop.xlane.xlu2 %3476 }
0x1115   :  { %v3487_v6 = vmul.f32 %v3477_v26, %v4070_v14 }
0x1117   :  { %v3491_v60 = vsub.f32 %v3469_v40, %v3487_v6 }
0x1119   :  { %v3495_v43 = vmul.f32 %v3491_v60, %v3491_v60 }
0x111b   :  { %v3499_v63 = vsel %vm54_vm0, %v3495_v43, 0.0 }
0x111c   :  { %v3480_v2 = vpop.xlane.xlu0 %3479  ;;  %3500 = vadd.xlane.f32.xlu2 %v3499_v63 }
0x111d   :  { %v3488_v16 = vmul.f32 %v3480_v2, %v4070_v14 }
0x111f   :  { %v3492_v5 = vsub.f32 %v3470_v50, %v3488_v16 }
0x1121   :  { %v3496_v53 = vmul.f32 %v3492_v5, %v3492_v5 }
0x1123   :  { %v3502_v7 = vsel %vm54_vm0, %v3496_v53, 0.0 }
0x1124   :  { %3503 = vadd.xlane.f32.xlu2 %v3502_v7 }
0x113a   :  { %v3483_v57 = vpop.xlane.xlu2 %3482 }
0x113b   :  { %v3489_v8 = vmul.f32 %v3483_v57, %v4070_v14 }
0x113d   :  { %v5065_v55 = vsub.f32 %v3471_v27, %v3489_v8 }
0x113f   :  { %v3497_v61 = vmul.f32 %v5065_v55, %v5065_v55 }
0x1141   :  { %v3505_v9 = vsel %vm54_vm0, %v3497_v61, 0.0 }
0x1142   :  { %v3486_v12 = vpop.xlane.xlu1 %3485  ;;  %3506 = vadd.xlane.f32.xlu2 %v3505_v9 }
0x1143   :  { %v3490_v47 = vmul.f32 %v3486_v12, %v4070_v14 }
0x1145   :  { %v5071_v35 = vsub.f32 %v3472_v23, %v3490_v47 }
0x1147   :  { %v3498_v48 = vmul.f32 %v5071_v35, %v5071_v35 }
0x1149   :  { %v3508_v15 = vsel %vm54_vm0, %v3498_v48, 0.0 }
0x114a   :  { %3509 = vadd.xlane.f32.xlu2 %v3508_v15 }
0x118f   :  { %v3501_v17 = vpop.xlane.xlu2 %3500 }
0x1190   :  { %v3511_v33 = vmul.f32 %v3501_v17, %v4070_v14 }
0x1192   :  { %v3515_v24 = vadd.f32 1e-05, %v3511_v33 }
0x1194   :  { %3937 = vrsqrt.f32 %v3515_v24  ;;  %vm3525_vm3 = vweird.f32 %v3515_v24 }
0x1197   :  { %v3504_v18 = vpop.xlane.xlu2 %3503 }
0x1198   :  { %v3512_v56 = vmul.f32 %v3504_v18, %v4070_v14 }
0x119a   :  { %v3938_v34 = vpop.eup %3937  ;;  %v3516_v28 = vadd.f32 1e-05, %v3512_v56 }
0x119b   :  { %v3520_v32 = vmul.f32 %v3938_v34, %v3515_v24  ;;  %vm3526_vm2 = vweird.f32 %v3938_v34 }
0x119c   :  { %3939 = vrsqrt.f32 %v3516_v28  ;;  %vm3527_vm4 = vmor %vm3525_vm3, %vm3526_vm2  ;;  %vm3535_vm5 = vweird.f32 %v3516_v28 }
0x119d   :  { %v3521_v31 = vmul.f32 %v3938_v34, %v3520_v32 }
0x119f   :  { %v3522_v62 = vmul.f32 0.5, %v3521_v31 }
0x11a1   :  { %v3523_v10 = vsub.f32 1.5, %v3522_v62 }
0x11a2   :  { %v3940_v38 = vpop.eup %3939 }
0x11a3   :  { %v3524_v19 = vmul.f32 %v3938_v34, %v3523_v10  ;;  %v3530_v3 = vmul.f32 %v3940_v38, %v3516_v28  ;;  %vm3536_vm15 = vweird.f32 %v3940_v38 }
0x11a4   :  { %vm3537_vm6 = vmor %vm3535_vm5, %vm3536_vm15 }
0x11a5   :  { %v3528_v46 = vsel %vm3527_vm4, %v3938_v34, %v3524_v19  ;;  %v3531_v44 = vmul.f32 %v3940_v38, %v3530_v3 }
0x11a6   :  { %v3559_v20 = vmul.f32 %v3528_v46, %v3491_v60 }
0x11a7   :  { %v3532_v59 = vmul.f32 0.5, %v3531_v44 }
0x11a8   :  { %v3566_v29 = vmul.f32 %v3757_v45, %v3559_v20 }
0x11a9   :  { %v3533_v0 = vsub.f32 1.5, %v3532_v59 }
0x11aa   :  { %v3573_v52 = vadd.f32 %v3758_v42, %v3566_v29 }
0x11ab   :  { %v3534_v30 = vmul.f32 %v3940_v38, %v3533_v0 }
0x11ac   :  { %3577 = vst.msk [vmem:[#allocation2] sm:$0xff] %vm54_vm0, %v3573_v52 }
0x11ad   :  { %v3538_v21 = vsel %vm3537_vm6, %v3940_v38, %v3534_v30 }
0x11ae   :  { %v3560_v49 = vmul.f32 %v3538_v21, %v3492_v5 }
0x11b0   :  { %v3567_v22 = vmul.f32 %v3757_v45, %v3560_v49 }
0x11b2   :  { %v3574_v37 = vadd.f32 %v3758_v42, %v3567_v22 }
0x11b4   :  { %3578 = vst.msk [vmem:[#allocation2 + $0x8] sm:$0xff] %vm54_vm0, %v3574_v37 }
0x11b5   :  { %v3507_v11 = vpop.xlane.xlu2 %3506 }
0x11b6   :  { %v3513_v40 = vmul.f32 %v3507_v11, %v4070_v14 }
0x11b8   :  { %v3517_v39 = vadd.f32 1e-05, %v3513_v40 }
0x11ba   :  { %3941 = vrsqrt.f32 %v3517_v39  ;;  %vm3545_vm8 = vweird.f32 %v3517_v39 }
0x11bd   :  { %v3510_v51 = vpop.xlane.xlu2 %3509 }
0x11be   :  { %v3514_v25 = vmul.f32 %v3510_v51, %v4070_v14 }
0x11c0   :  { %v3942_v50 = vpop.eup %3941  ;;  %v3518_v13 = vadd.f32 1e-05, %v3514_v25 }
0x11c1   :  { %v3540_v36 = vmul.f32 %v3942_v50, %v3517_v39  ;;  %vm3546_vm7 = vweird.f32 %v3942_v50 }
0x11c2   :  { %3943 = vrsqrt.f32 %v3518_v13  ;;  %vm3547_vm9 = vmor %vm3545_vm8, %vm3546_vm7  ;;  %vm3555_vm14 = vweird.f32 %v3518_v13 }
0x11c3   :  { %v3541_v54 = vmul.f32 %v3942_v50, %v3540_v36 }
0x11c5   :  { %v3542_v27 = vmul.f32 0.5, %v3541_v54 }
0x11c7   :  { %v3543_v41 = vsub.f32 1.5, %v3542_v27 }
0x11c8   :  { %v3944_v1 = vpop.eup %3943 }
0x11c9   :  { %v3544_v4 = vmul.f32 %v3942_v50, %v3543_v41  ;;  %v3550_v23 = vmul.f32 %v3944_v1, %v3518_v13  ;;  %vm3556_vm10 = vweird.f32 %v3944_v1 }
0x11ca   :  { %vm3557_vm11 = vmor %vm3555_vm14, %vm3556_vm10 }
0x11cb   :  { %v3548_v58 = vsel %vm3547_vm9, %v3942_v50, %v3544_v4  ;;  %v3551_v26 = vmul.f32 %v3944_v1, %v3550_v23 }
0x11cc   :  { %v3561_v6 = vmul.f32 %v3548_v58, %v5065_v55 }
0x11cd   :  { %v3552_v60 = vmul.f32 0.5, %v3551_v26 }
0x11ce   :  { %v3568_v43 = vmul.f32 %v3757_v45, %v3561_v6 }
0x11cf   :  { %v3553_v14 = vsub.f32 1.5, %v3552_v60 }
0x11d0   :  { %v3575_v63 = vadd.f32 %v3758_v42, %v3568_v43 }
0x11d1   :  { %v3554_v2 = vmul.f32 %v3944_v1, %v3553_v14 }
0x11d2   :  { %3579 = vst.msk [vmem:[#allocation2 + $0x10] sm:$0xff] %vm54_vm0, %v3575_v63 }
0x11d3   :  { %v3558_v16 = vsel %vm3557_vm11, %v3944_v1, %v3554_v2 }
0x11d4   :  { %v3562_v5 = vmul.f32 %v3558_v16, %v5071_v35 }
0x11d6   :  { %v3569_v53 = vmul.f32 %v3757_v45, %v3562_v5 }
0x11d8   :  { %v3576_v7 = vadd.f32 %v3758_v42, %v3569_v53 }
0x11da   :  { %3580 = vst.msk [vmem:[#allocation2 + $0x18] sm:$0xff] %vm54_vm0, %v3576_v7 }
0x11db   :  { %3593 = dma.vmem_to_hbm [thread:$0]  %s3586_s13, 512, %s3588_s17, [#allocation3], %s3977_s18, %s3977_s18, %s3978_s0  }
0x11dc   :  { %3973 = dma.done.wait [#allocation3], 512  }
0x11dd   :  { %3974 = vsyncadd [#allocation3], 4294966784 }
0x11de   :  { %3598 = vsyncpa [#allocation3], 1 }

</bundles_post_ra>
